<compile_context>
chip_gen: v5e
topology: v5e:2x2
jax: 0.10.0
libtpu: 0.0.40
codegen_flags: <defaults>
</compile_context>

<pallas_src>
import functools

import jax
import jax.numpy as jnp
from jax import lax
from jax.experimental import pallas as pl
from jax.experimental.pallas import tpu as pltpu

# ----------------------------- hyper-parameters (small) -----------------------------
B = 2
H_SP = 8          # spatial height
W_SP = 8          # spatial width
DIM = 8           # must equal W_SP (see quirk above)
DEPTH = 2
HEADS = 2
DIM_HEAD = 8
INNER = HEADS * DIM_HEAD
MLP_DIM = 16
N_TOK = 1 + H_SP * W_SP
EPS = 1e-5        # PyTorch LayerNorm default eps


def _hardswish(x):
    # nn.Hardswish: x * relu6(x + 3) / 6
    return x * jnp.clip(x + 3.0, 0.0, 6.0) * (1.0 / 6.0)


# --------------------------- fused whole-network kernel ------------------------------
def _transformer_kernel(x_ref, attn_vec_ref, wqkv_ref, wo_ref, ff_ln_ref, ff_b16_ref,
                        ff_b3_ref, w1_ref, kd_ref, w2_ref, w3_ref, o_ref, pad_ref,
                        *, depth, heads, dim_head, inner, h, w, dim, hid):
    # Load all (tiny) weights once; they stay resident for the whole forward pass.
    av = attn_vec_ref[...]       # (depth, 3, dim)      : attn ln_g, ln_b, bo
    wqkv_all = wqkv_ref[...]     # (depth, dim, 3*inner): [Wq | Wk | Wv]
    wo_all = wo_ref[...]         # (depth, inner, dim)
    fln = ff_ln_ref[...]         # (depth, 2, w, 1)     : ff ln_g, ln_b (column vectors)
    fb16 = ff_b16_ref[...]       # (depth, 3, hid)      : b1, bd, b2
    fb3 = ff_b3_ref[...]         # (depth, dim)         : b3
    w1_all = w1_ref[...]         # (depth, dim, hid)
    kd_all = kd_ref[...]         # (depth, 9, hid)      : depthwise 3x3 taps
    w2_all = w2_ref[...]         # (depth, hid, hid)
    w3_all = w3_ref[...]         # (depth, hid, dim)

    # Zero the halo of the depthwise-conv scratch once; only the interior is
    # (re)written each layer, the border stays zero.
    pad_ref[...] = jnp.zeros_like(pad_ref)

    x = x_ref[0]                 # (N, dim) activations, kept resident across layers
    scale = dim_head ** -0.5

    for l in range(depth):       # static unroll over layers
        # ---------------- Residual(PreNorm(Attention)) on all tokens -----------------
        mean = jnp.mean(x, axis=-1, keepdims=True)
        var = jnp.mean(jnp.square(x - mean), axis=-1, keepdims=True)
        xn = (x - mean) * lax.rsqrt(var + EPS) * av[l, 0] + av[l, 1]

        qkv = jnp.dot(xn, wqkv_all[l], preferred_element_type=jnp.float32)  # (N,3*inner)
        heads_out = []
        for hh in range(heads):                    # static loop over heads
            s = hh * dim_head
            qh = qkv[:, s:s + dim_head]
            kh = qkv[:, inner + s:inner + s + dim_head]
            vh = qkv[:, 2 * inner + s:2 * inner + s + dim_head]
            dots = lax.dot_general(qh, kh, (((1,), (1,)), ((), ())),
                                   preferred_element_type=jnp.float32) * scale
            dots = dots - jnp.max(dots, axis=-1, keepdims=True)
            e = jnp.exp(dots)
            attn = e * pl.reciprocal(jnp.sum(e, axis=-1, keepdims=True), approx=True)
            heads_out.append(jnp.dot(attn, vh, preferred_element_type=jnp.float32))
        out = jnp.concatenate(heads_out, axis=-1)                           # (N, inner)
        x = jnp.dot(out, wo_all[l], preferred_element_type=jnp.float32) + av[l, 2] + x

        # ------------ ExcludeCLS(Residual(FeedForward)) on the image tokens ----------
        toks = x[1:, :]                           # (h*w, dim)  -- CLS handled in-kernel
        x3 = toks.reshape(h, w, dim)              # NHWC view of the NCHW image
        # nn.LayerNorm(dim) applied to NCHW normalizes over W (axis=1 here);
        # gamma/beta are indexed by the W position -> (w, 1) column vectors.
        mean = jnp.mean(x3, axis=1, keepdims=True)
        var = jnp.mean(jnp.square(x3 - mean), axis=1, keepdims=True)
        xn3 = (x3 - mean) * lax.rsqrt(var + EPS) * fln[l, 0] + fln[l, 1]

        # Conv2d(dim, hid, 1) + Hardswish   (1x1 conv == channel matmul)
        y = jnp.dot(xn3.reshape(h * w, dim), w1_all[l],
                    preferred_element_type=jnp.float32) + fb16[l, 0]
        y = _hardswish(y)

        # Depthwise 3x3 conv, padding=1, via pre-zeroed halo scratch (no concats)
        pad_ref[pl.ds(1, h), pl.ds(1, w), :] = y.reshape(h, w, hid)
        acc = jnp.zeros((h, w, hid), jnp.float32)
        for di in range(3):
            for dj in range(3):
                acc = acc + pad_ref[pl.ds(di, h), pl.ds(dj, w), :] * kd_all[l, di * 3 + dj]
        acc = acc + fb16[l, 1]

        # Conv2d(hid, hid, 1) + Hardswish
        z = jnp.dot(acc.reshape(h * w, hid), w2_all[l],
                    preferred_element_type=jnp.float32) + fb16[l, 2]
        z = _hardswish(z)

        # Conv2d(hid, dim, 1) + residual add (pre-FF tokens)
        ff = jnp.dot(z, w3_all[l], preferred_element_type=jnp.float32) + fb3[l]
        toks = ff + toks
        x = jnp.concatenate([x[0:1, :], toks], axis=0)      # re-attach CLS (in VMEM)

    o_ref[0] = x


# ---------------------------------- wrapper -------------------------------------------
_PACK_ORDER = ("attn_vec", "wqkv", "wo", "ff_ln", "ff_b16", "ff_b3",
               "w1", "kd", "w2", "w3")


def transformer_forward(x, packed):
    b_, n, d = x.shape

    def full(arr):
        nd = arr.ndim
        return pl.BlockSpec(arr.shape, lambda b, _nd=nd: (0,) * _nd)

    kernel = functools.partial(_transformer_kernel, depth=DEPTH, heads=HEADS,
                               dim_head=DIM_HEAD, inner=INNER, h=H_SP, w=W_SP,
                               dim=DIM, hid=MLP_DIM)
    weight_args = [packed[k] for k in _PACK_ORDER]
    return pl.pallas_call(
        kernel,
        out_shape=jax.ShapeDtypeStruct((b_, n, d), jnp.float32),
        grid=(b_,),
        in_specs=[pl.BlockSpec((1, n, d), lambda b: (b, 0, 0))]
                 + [full(a) for a in weight_args],
        out_specs=pl.BlockSpec((1, n, d), lambda b: (b, 0, 0)),
        scratch_shapes=[pltpu.VMEM((H_SP + 2, W_SP + 2, MLP_DIM), jnp.float32)],
        compiler_params=pltpu.CompilerParams(dimension_semantics=("parallel",)),
    )(x, *weight_args)


# ------------------------------ deterministic params ---------------------------------
def init_params(key):
    layers = []
    for _ in range(DEPTH):
        keys = jax.random.split(key, 16)
        key = keys[0]

        def rnd(k, shape, scale=0.1):
            return jax.random.normal(k, shape, jnp.float32) * scale

        attn_p = {
            "ln_g": jnp.ones((DIM,), jnp.float32),
            "ln_b": jnp.zeros((DIM,), jnp.float32),
            "wq": rnd(keys[1], (DIM, INNER)),
            "wk": rnd(keys[2], (DIM, INNER)),
            "wv": rnd(keys[3], (DIM, INNER)),
            "wo": rnd(keys[4], (INNER, DIM)),
            "bo": rnd(keys[5], (DIM,)),
        }
        ff_p = {
            "ln_g": jnp.ones((W_SP,), jnp.float32),
            "ln_b": jnp.zeros((W_SP,), jnp.float32),
            "w1": rnd(keys[6], (DIM, MLP_DIM)),
            "b1": rnd(keys[7], (MLP_DIM,)),
            "kd": rnd(keys[8], (9, MLP_DIM)),      # depthwise 3x3 taps, (tap, channel)
            "bd": rnd(keys[9], (MLP_DIM,)),
            "w2": rnd(keys[10], (MLP_DIM, MLP_DIM)),
            "b2": rnd(keys[11], (MLP_DIM,)),
            "w3": rnd(keys[12], (MLP_DIM, DIM)),
            "b3": rnd(keys[13], (DIM,)),
        }
        layers.append((attn_p, ff_p))
    return layers


def pack_params(layers):
    return {
        "attn_vec": jnp.stack([jnp.stack([a["ln_g"], a["ln_b"], a["bo"]])
                               for a, _ in layers]),                         # (D,3,8)
        "wqkv": jnp.stack([jnp.concatenate([a["wq"], a["wk"], a["wv"]], axis=1)
                           for a, _ in layers]),                             # (D,8,48)
        "wo": jnp.stack([a["wo"] for a, _ in layers]),                       # (D,16,8)
        "ff_ln": jnp.stack([jnp.stack([f["ln_g"], f["ln_b"]])[:, :, None]
                            for _, f in layers]),                            # (D,2,8,1)
        "ff_b16": jnp.stack([jnp.stack([f["b1"], f["bd"], f["b2"]])
                             for _, f in layers]),                           # (D,3,16)
        "ff_b3": jnp.stack([f["b3"] for _, f in layers]),                    # (D,8)
        "w1": jnp.stack([f["w1"] for _, f in layers]),                       # (D,8,16)
        "kd": jnp.stack([f["kd"] for _, f in layers]),                       # (D,9,16)
        "w2": jnp.stack([f["w2"] for _, f in layers]),                       # (D,16,16)
        "w3": jnp.stack([f["w3"] for _, f in layers]),                       # (D,16,8)
    }


# ------------------------------ pure-JAX reference -----------------------------------
def _ref_attention(x, p):
    mean = x.mean(-1, keepdims=True)
    var = ((x - mean) ** 2).mean(-1, keepdims=True)
    xn = (x - mean) / jnp.sqrt(var + EPS) * p["ln_g"] + p["ln_b"]
    q, k, v = xn @ p["wq"], xn @ p["wk"], xn @ p["wv"]

    def split(t):
        bb, nn, _ = t.shape
        return t.reshape(bb, nn, HEADS, DIM_HEAD).transpose(0, 2, 1, 3)

    q, k, v = split(q), split(k), split(v)
    dots = jnp.einsum("bhid,bhjd->bhij", q, k) * (DIM_HEAD ** -0.5)
    attn = jax.nn.softmax(dots, axis=-1)
    out = jnp.einsum("bhij,bhjd->bhid", attn, v)
    out = out.transpose(0, 2, 1, 3).reshape(x.shape[0], x.shape[1], INNER)
    return out @ p["wo"] + p["bo"] + x


def _ref_ff(tokens, p):
    bb, hw, d = tokens.shape
    x = tokens.reshape(bb, H_SP, W_SP, d).transpose(0, 3, 1, 2)   # b c h w
    mean = x.mean(-1, keepdims=True)
    var = ((x - mean) ** 2).mean(-1, keepdims=True)
    xn = (x - mean) / jnp.sqrt(var + EPS) * p["ln_g"] + p["ln_b"]

    def hsw(t):
        return t * jnp.clip(t + 3.0, 0.0, 6.0) / 6.0

    y = jnp.einsum("bchw,cm->bmhw", xn, p["w1"]) + p["b1"][None, :, None, None]
    y = hsw(y)
    yp = jnp.pad(y, ((0, 0), (0, 0), (1, 1), (1, 1)))
    acc = jnp.zeros_like(y)
    for di in range(3):
        for dj in range(3):
            acc = acc + yp[:, :, di:di + H_SP, dj:dj + W_SP] * \
                p["kd"][di * 3 + dj][None, :, None, None]
    acc = acc + p["bd"][None, :, None, None]
    z = jnp.einsum("bchw,cm->bmhw", acc, p["w2"]) + p["b2"][None, :, None, None]
    z = hsw(z)
    out = jnp.einsum("bchw,cm->bmhw", z, p["w3"]) + p["b3"][None, :, None, None]
    out = out.transpose(0, 2, 3, 1).reshape(bb, hw, d)
    return out + tokens


def _ref_transformer(x, layers):
    for ap, fp in layers:
        x = _ref_attention(x, ap)
        cls_tok, toks = x[:, :1], x[:, 1:]
        x = jnp.concatenate([cls_tok, _ref_ff(toks, fp)], axis=1)
    return x


# -------------------------------------- main ------------------------------------------
if __name__ == "__main__":
    key = jax.random.PRNGKey(0)
    kx, kp = jax.random.split(key)
    x = jax.random.normal(kx, (B, N_TOK, DIM), jnp.float32)
    layers = init_params(kp)
    packed = pack_params(layers)

    fwd = jax.jit(transformer_forward)
    y = fwd(x, packed)
    jax.block_until_ready(y)

    y_ref = _ref_transformer(x, layers)
    assert y.shape == (B, N_TOK, DIM)
    max_err = float(jnp.max(jnp.abs(y - y_ref)))
    assert jnp.allclose(y, y_ref, atol=2e-2, rtol=2e-2), f"max_err={max_err}"

    print("KERNEL_OK")
</pallas_src>

<mosaic_0001>
module attributes {stable_mosaic.version = 11 : i64} {
  func.func @_transformer_kernel(%arg0: i32, %arg1: memref<1x65x8xf32, #tpu.memory_space<vmem>>, %arg2: memref<2x3x8xf32, #tpu.memory_space<vmem>>, %arg3: memref<2x8x48xf32, #tpu.memory_space<vmem>>, %arg4: memref<2x16x8xf32, #tpu.memory_space<vmem>>, %arg5: memref<2x2x8x1xf32, #tpu.memory_space<vmem>>, %arg6: memref<2x3x16xf32, #tpu.memory_space<vmem>>, %arg7: memref<2x8xf32, #tpu.memory_space<vmem>>, %arg8: memref<2x8x16xf32, #tpu.memory_space<vmem>>, %arg9: memref<2x9x16xf32, #tpu.memory_space<vmem>>, %arg10: memref<2x16x16xf32, #tpu.memory_space<vmem>>, %arg11: memref<2x16x8xf32, #tpu.memory_space<vmem>>, %arg12: memref<1x65x8xf32, #tpu.memory_space<vmem>>, %arg13: memref<10x10x16xf32, #tpu.memory_space<vmem>>) attributes {dimension_semantics = [#tpu.dimension_semantics<parallel>], iteration_bounds = array<i64: 2>, scalar_prefetch = 0 : i64, scratch_operands = 1 : i64, tpu.core_type = #tpu.core_type<tc>, window_params = [{transform_indices = @transform_0, window_bounds = array<i64: 1, 65, 8>}, {pipeline_mode = #tpu.pipeline_mode<synchronous>, transform_indices = @transform_1, window_bounds = array<i64: 2, 3, 8>}, {pipeline_mode = #tpu.pipeline_mode<synchronous>, transform_indices = @transform_2, window_bounds = array<i64: 2, 8, 48>}, {pipeline_mode = #tpu.pipeline_mode<synchronous>, transform_indices = @transform_3, window_bounds = array<i64: 2, 16, 8>}, {pipeline_mode = #tpu.pipeline_mode<synchronous>, transform_indices = @transform_4, window_bounds = array<i64: 2, 2, 8, 1>}, {pipeline_mode = #tpu.pipeline_mode<synchronous>, transform_indices = @transform_5, window_bounds = array<i64: 2, 3, 16>}, {pipeline_mode = #tpu.pipeline_mode<synchronous>, transform_indices = @transform_6, window_bounds = array<i64: 2, 8>}, {pipeline_mode = #tpu.pipeline_mode<synchronous>, transform_indices = @transform_7, window_bounds = array<i64: 2, 8, 16>}, {pipeline_mode = #tpu.pipeline_mode<synchronous>, transform_indices = @transform_8, window_bounds = array<i64: 2, 9, 16>}, {pipeline_mode = #tpu.pipeline_mode<synchronous>, transform_indices = @transform_9, window_bounds = array<i64: 2, 16, 16>}, {pipeline_mode = #tpu.pipeline_mode<synchronous>, transform_indices = @transform_10, window_bounds = array<i64: 2, 16, 8>}, {transform_indices = @transform_11, window_bounds = array<i64: 1, 65, 8>}]} {
    %c0 = arith.constant 0 : index
    %c0_0 = arith.constant 0 : index
    %c0_1 = arith.constant 0 : index
    %0 = vector.load %arg2[%c0, %c0_0, %c0_1] : memref<2x3x8xf32, #tpu.memory_space<vmem>>, vector<2x3x8xf32>
    %c0_2 = arith.constant 0 : index
    %c0_3 = arith.constant 0 : index
    %c0_4 = arith.constant 0 : index
    %1 = vector.load %arg3[%c0_2, %c0_3, %c0_4] : memref<2x8x48xf32, #tpu.memory_space<vmem>>, vector<2x8x48xf32>
    %c0_5 = arith.constant 0 : index
    %c0_6 = arith.constant 0 : index
    %c0_7 = arith.constant 0 : index
    %2 = vector.load %arg4[%c0_5, %c0_6, %c0_7] : memref<2x16x8xf32, #tpu.memory_space<vmem>>, vector<2x16x8xf32>
    %c0_8 = arith.constant 0 : index
    %c0_9 = arith.constant 0 : index
    %c0_10 = arith.constant 0 : index
    %c0_11 = arith.constant 0 : index
    %3 = vector.load %arg5[%c0_8, %c0_9, %c0_10, %c0_11] : memref<2x2x8x1xf32, #tpu.memory_space<vmem>>, vector<2x2x8x1xf32>
    %c0_12 = arith.constant 0 : index
    %c0_13 = arith.constant 0 : index
    %c0_14 = arith.constant 0 : index
    %4 = vector.load %arg6[%c0_12, %c0_13, %c0_14] : memref<2x3x16xf32, #tpu.memory_space<vmem>>, vector<2x3x16xf32>
    %c0_15 = arith.constant 0 : index
    %c0_16 = arith.constant 0 : index
    %5 = vector.load %arg7[%c0_15, %c0_16] : memref<2x8xf32, #tpu.memory_space<vmem>>, vector<2x8xf32>
    %c0_17 = arith.constant 0 : index
    %c0_18 = arith.constant 0 : index
    %c0_19 = arith.constant 0 : index
    %6 = vector.load %arg8[%c0_17, %c0_18, %c0_19] : memref<2x8x16xf32, #tpu.memory_space<vmem>>, vector<2x8x16xf32>
    %c0_20 = arith.constant 0 : index
    %c0_21 = arith.constant 0 : index
    %c0_22 = arith.constant 0 : index
    %7 = vector.load %arg9[%c0_20, %c0_21, %c0_22] : memref<2x9x16xf32, #tpu.memory_space<vmem>>, vector<2x9x16xf32>
    %c0_23 = arith.constant 0 : index
    %c0_24 = arith.constant 0 : index
    %c0_25 = arith.constant 0 : index
    %8 = vector.load %arg10[%c0_23, %c0_24, %c0_25] : memref<2x16x16xf32, #tpu.memory_space<vmem>>, vector<2x16x16xf32>
    %c0_26 = arith.constant 0 : index
    %c0_27 = arith.constant 0 : index
    %c0_28 = arith.constant 0 : index
    %9 = vector.load %arg11[%c0_26, %c0_27, %c0_28] : memref<2x16x8xf32, #tpu.memory_space<vmem>>, vector<2x16x8xf32>
    %cst = arith.constant 0.000000e+00 : f32
    %10 = vector.broadcast %cst : f32 to vector<10x10x16xf32>
    %c0_29 = arith.constant 0 : index
    %c0_30 = arith.constant 0 : index
    %c0_31 = arith.constant 0 : index
    %11 = vector.load %arg13[%c0_29, %c0_30, %c0_31] : memref<10x10x16xf32, #tpu.memory_space<vmem>>, vector<10x10x16xf32>
    tpu.vector_store %arg13[%c0_29, %c0_30, %c0_31], %10 {strides = array<i32>} : memref<10x10x16xf32, #tpu.memory_space<vmem>>, vector<10x10x16xf32>,
    %c0_32 = arith.constant 0 : index
    %c0_33 = arith.constant 0 : index
    %c0_34 = arith.constant 0 : index
    %12 = vector.load %arg1[%c0_32, %c0_33, %c0_34] : memref<1x65x8xf32, #tpu.memory_space<vmem>>, vector<1x65x8xf32>
    %13 = vector.shape_cast %12 : vector<1x65x8xf32> to vector<65x8xf32>
    %cst_35 = arith.constant dense<0.000000e+00> : vector<65xf32>
    %14 = vector.multi_reduction <add>, %13, %cst_35 [1] : vector<65x8xf32> to vector<65xf32>
    %15 = vector.shape_cast %14 : vector<65xf32> to vector<65x1xf32>
    %cst_36 = arith.constant 8.000000e+00 : f32
    %16 = vector.broadcast %cst_36 : f32 to vector<65x1xf32>
    %17 = arith.divf %15, %16 : vector<65x1xf32>
    %18 = vector.broadcast %17 : vector<65x1xf32> to vector<65x8xf32>
    %19 = arith.subf %13, %18 : vector<65x8xf32>
    %20 = arith.mulf %19, %19 : vector<65x8xf32>
    %cst_37 = arith.constant dense<0.000000e+00> : vector<65xf32>
    %21 = vector.multi_reduction <add>, %20, %cst_37 [1] : vector<65x8xf32> to vector<65xf32>
    %22 = vector.shape_cast %21 : vector<65xf32> to vector<65x1xf32>
    %cst_38 = arith.constant 8.000000e+00 : f32
    %23 = vector.broadcast %cst_38 : f32 to vector<65x1xf32>
    %24 = arith.divf %22, %23 : vector<65x1xf32>
    %25 = vector.broadcast %17 : vector<65x1xf32> to vector<65x8xf32>
    %26 = arith.subf %13, %25 : vector<65x8xf32>
    %cst_39 = arith.constant 9.99999974E-6 : f32
    %27 = vector.broadcast %cst_39 : f32 to vector<65x1xf32>
    %28 = arith.addf %24, %27 : vector<65x1xf32>
    %29 = math.rsqrt %28 : vector<65x1xf32>
    %30 = vector.broadcast %29 : vector<65x1xf32> to vector<65x8xf32>
    %31 = arith.mulf %26, %30 : vector<65x8xf32>
    %32 = vector.extract_strided_slice %0 {offsets = [0, 0, 0], sizes = [1, 1, 8], strides = [1, 1, 1]} : vector<2x3x8xf32> to vector<1x1x8xf32>
    %33 = vector.shape_cast %32 : vector<1x1x8xf32> to vector<8xf32>
    %34 = vector.shape_cast %33 : vector<8xf32> to vector<1x8xf32>
    %35 = vector.broadcast %34 : vector<1x8xf32> to vector<65x8xf32>
    %36 = arith.mulf %31, %35 : vector<65x8xf32>
    %37 = vector.extract_strided_slice %0 {offsets = [0, 1, 0], sizes = [1, 1, 8], strides = [1, 1, 1]} : vector<2x3x8xf32> to vector<1x1x8xf32>
    %38 = vector.shape_cast %37 : vector<1x1x8xf32> to vector<8xf32>
    %39 = vector.shape_cast %38 : vector<8xf32> to vector<1x8xf32>
    %40 = vector.broadcast %39 : vector<1x8xf32> to vector<65x8xf32>
    %41 = arith.addf %36, %40 : vector<65x8xf32>
    %42 = vector.extract_strided_slice %1 {offsets = [0, 0, 0], sizes = [1, 8, 48], strides = [1, 1, 1]} : vector<2x8x48xf32> to vector<1x8x48xf32>
    %43 = vector.shape_cast %42 : vector<1x8x48xf32> to vector<8x48xf32>
    %cst_40 = arith.constant dense<0.000000e+00> : vector<65x48xf32>
    %44 = tpu.matmul %41, %43, %cst_40 {dimension_numbers = #tpu.dot_dimension_numbers<[1], [0], [0], [1], [0, 0, 1, 1], [], []>} : vector<65x8xf32>, vector<8x48xf32>, vector<65x48xf32> -> vector<65x48xf32>
    %45 = vector.extract_strided_slice %44 {offsets = [0, 0], sizes = [65, 8], strides = [1, 1]} : vector<65x48xf32> to vector<65x8xf32>
    %46 = vector.extract_strided_slice %44 {offsets = [0, 16], sizes = [65, 8], strides = [1, 1]} : vector<65x48xf32> to vector<65x8xf32>
    %47 = vector.extract_strided_slice %44 {offsets = [0, 32], sizes = [65, 8], strides = [1, 1]} : vector<65x48xf32> to vector<65x8xf32>
    %cst_41 = arith.constant dense<0.000000e+00> : vector<65x65xf32>
    %48 = tpu.matmul %45, %46, %cst_41 {dimension_numbers = #tpu.dot_dimension_numbers<[1], [1], [0], [0], [0, 0, 1, 0], [], []>} : vector<65x8xf32>, vector<65x8xf32>, vector<65x65xf32> -> vector<65x65xf32>
    %cst_42 = arith.constant 0.353553385 : f32
    %49 = vector.broadcast %cst_42 : f32 to vector<65x65xf32>
    %50 = arith.mulf %48, %49 : vector<65x65xf32>
    %cst_43 = arith.constant dense<0xFF800000> : vector<65xf32>
    %51 = vector.multi_reduction <maximumf>, %50, %cst_43 [1] : vector<65x65xf32> to vector<65xf32>
    %52 = vector.shape_cast %51 : vector<65xf32> to vector<65x1xf32>
    %53 = vector.broadcast %52 : vector<65x1xf32> to vector<65x65xf32>
    %54 = arith.subf %50, %53 : vector<65x65xf32>
    %55 = math.exp %54 : vector<65x65xf32>
    %cst_44 = arith.constant dense<0.000000e+00> : vector<65xf32>
    %56 = vector.multi_reduction <add>, %55, %cst_44 [1] : vector<65x65xf32> to vector<65xf32>
    %57 = vector.shape_cast %56 : vector<65xf32> to vector<65x1xf32>
    %58 = tpu.reciprocal %57 {approx = true} : vector<65x1xf32> -> vector<65x1xf32>
    %59 = vector.broadcast %58 : vector<65x1xf32> to vector<65x65xf32>
    %60 = arith.mulf %55, %59 : vector<65x65xf32>
    %cst_45 = arith.constant dense<0.000000e+00> : vector<65x8xf32>
    %61 = tpu.matmul %60, %47, %cst_45 {dimension_numbers = #tpu.dot_dimension_numbers<[1], [0], [0], [1], [0, 0, 1, 1], [], []>} : vector<65x65xf32>, vector<65x8xf32>, vector<65x8xf32> -> vector<65x8xf32>
    %62 = vector.extract_strided_slice %44 {offsets = [0, 8], sizes = [65, 8], strides = [1, 1]} : vector<65x48xf32> to vector<65x8xf32>
    %63 = vector.extract_strided_slice %44 {offsets = [0, 24], sizes = [65, 8], strides = [1, 1]} : vector<65x48xf32> to vector<65x8xf32>
    %64 = vector.extract_strided_slice %44 {offsets = [0, 40], sizes = [65, 8], strides = [1, 1]} : vector<65x48xf32> to vector<65x8xf32>
    %cst_46 = arith.constant dense<0.000000e+00> : vector<65x65xf32>
    %65 = tpu.matmul %62, %63, %cst_46 {dimension_numbers = #tpu.dot_dimension_numbers<[1], [1], [0], [0], [0, 0, 1, 0], [], []>} : vector<65x8xf32>, vector<65x8xf32>, vector<65x65xf32> -> vector<65x65xf32>
    %cst_47 = arith.constant 0.353553385 : f32
    %66 = vector.broadcast %cst_47 : f32 to vector<65x65xf32>
    %67 = arith.mulf %65, %66 : vector<65x65xf32>
    %cst_48 = arith.constant dense<0xFF800000> : vector<65xf32>
    %68 = vector.multi_reduction <maximumf>, %67, %cst_48 [1] : vector<65x65xf32> to vector<65xf32>
    %69 = vector.shape_cast %68 : vector<65xf32> to vector<65x1xf32>
    %70 = vector.broadcast %69 : vector<65x1xf32> to vector<65x65xf32>
    %71 = arith.subf %67, %70 : vector<65x65xf32>
    %72 = math.exp %71 : vector<65x65xf32>
    %cst_49 = arith.constant dense<0.000000e+00> : vector<65xf32>
    %73 = vector.multi_reduction <add>, %72, %cst_49 [1] : vector<65x65xf32> to vector<65xf32>
    %74 = vector.shape_cast %73 : vector<65xf32> to vector<65x1xf32>
    %75 = tpu.reciprocal %74 {approx = true} : vector<65x1xf32> -> vector<65x1xf32>
    %76 = vector.broadcast %75 : vector<65x1xf32> to vector<65x65xf32>
    %77 = arith.mulf %72, %76 : vector<65x65xf32>
    %cst_50 = arith.constant dense<0.000000e+00> : vector<65x8xf32>
    %78 = tpu.matmul %77, %64, %cst_50 {dimension_numbers = #tpu.dot_dimension_numbers<[1], [0], [0], [1], [0, 0, 1, 1], [], []>} : vector<65x65xf32>, vector<65x8xf32>, vector<65x8xf32> -> vector<65x8xf32>
    %79 = tpu.concatenate %61, %78 in 1 : vector<65x8xf32>, vector<65x8xf32> -> vector<65x16xf32>
    %80 = vector.extract_strided_slice %2 {offsets = [0, 0, 0], sizes = [1, 16, 8], strides = [1, 1, 1]} : vector<2x16x8xf32> to vector<1x16x8xf32>
    %81 = vector.shape_cast %80 : vector<1x16x8xf32> to vector<16x8xf32>
    %cst_51 = arith.constant dense<0.000000e+00> : vector<65x8xf32>
    %82 = tpu.matmul %79, %81, %cst_51 {dimension_numbers = #tpu.dot_dimension_numbers<[1], [0], [0], [1], [0, 0, 1, 1], [], []>} : vector<65x16xf32>, vector<16x8xf32>, vector<65x8xf32> -> vector<65x8xf32>
    %83 = vector.extract_strided_slice %0 {offsets = [0, 2, 0], sizes = [1, 1, 8], strides = [1, 1, 1]} : vector<2x3x8xf32> to vector<1x1x8xf32>
    %84 = vector.shape_cast %83 : vector<1x1x8xf32> to vector<8xf32>
    %85 = vector.shape_cast %84 : vector<8xf32> to vector<1x8xf32>
    %86 = vector.broadcast %85 : vector<1x8xf32> to vector<65x8xf32>
    %87 = arith.addf %82, %86 : vector<65x8xf32>
    %88 = arith.addf %87, %13 : vector<65x8xf32>
    %89 = vector.extract_strided_slice %88 {offsets = [1, 0], sizes = [64, 8], strides = [1, 1]} : vector<65x8xf32> to vector<64x8xf32>
    %90 = vector.shape_cast %89 : vector<64x8xf32> to vector<8x8x8xf32>
    %cst_52 = arith.constant dense<0.000000e+00> : vector<8x8xf32>
    %91 = vector.multi_reduction <add>, %90, %cst_52 [1] : vector<8x8x8xf32> to vector<8x8xf32>
    %92 = vector.shape_cast %91 : vector<8x8xf32> to vector<8x1x8xf32>
    %cst_53 = arith.constant 8.000000e+00 : f32
    %93 = vector.broadcast %cst_53 : f32 to vector<8x1x8xf32>
    %94 = arith.divf %92, %93 : vector<8x1x8xf32>
    %95 = vector.broadcast %94 : vector<8x1x8xf32> to vector<8x8x8xf32>
    %96 = arith.subf %90, %95 : vector<8x8x8xf32>
    %97 = arith.mulf %96, %96 : vector<8x8x8xf32>
    %cst_54 = arith.constant dense<0.000000e+00> : vector<8x8xf32>
    %98 = vector.multi_reduction <add>, %97, %cst_54 [1] : vector<8x8x8xf32> to vector<8x8xf32>
    %99 = vector.shape_cast %98 : vector<8x8xf32> to vector<8x1x8xf32>
    %cst_55 = arith.constant 8.000000e+00 : f32
    %100 = vector.broadcast %cst_55 : f32 to vector<8x1x8xf32>
    %101 = arith.divf %99, %100 : vector<8x1x8xf32>
    %102 = vector.broadcast %94 : vector<8x1x8xf32> to vector<8x8x8xf32>
    %103 = arith.subf %90, %102 : vector<8x8x8xf32>
    %cst_56 = arith.constant 9.99999974E-6 : f32
    %104 = vector.broadcast %cst_56 : f32 to vector<8x1x8xf32>
    %105 = arith.addf %101, %104 : vector<8x1x8xf32>
    %106 = math.rsqrt %105 : vector<8x1x8xf32>
    %107 = vector.broadcast %106 : vector<8x1x8xf32> to vector<8x8x8xf32>
    %108 = arith.mulf %103, %107 : vector<8x8x8xf32>
    %109 = vector.extract_strided_slice %3 {offsets = [0, 0, 0, 0], sizes = [1, 1, 8, 1], strides = [1, 1, 1, 1]} : vector<2x2x8x1xf32> to vector<1x1x8x1xf32>
    %110 = vector.shape_cast %109 : vector<1x1x8x1xf32> to vector<8x1xf32>
    %111 = vector.shape_cast %110 : vector<8x1xf32> to vector<1x8x1xf32>
    %112 = vector.broadcast %111 : vector<1x8x1xf32> to vector<8x8x8xf32>
    %113 = arith.mulf %108, %112 : vector<8x8x8xf32>
    %114 = vector.extract_strided_slice %3 {offsets = [0, 1, 0, 0], sizes = [1, 1, 8, 1], strides = [1, 1, 1, 1]} : vector<2x2x8x1xf32> to vector<1x1x8x1xf32>
    %115 = vector.shape_cast %114 : vector<1x1x8x1xf32> to vector<8x1xf32>
    %116 = vector.shape_cast %115 : vector<8x1xf32> to vector<1x8x1xf32>
    %117 = vector.broadcast %116 : vector<1x8x1xf32> to vector<8x8x8xf32>
    %118 = arith.addf %113, %117 : vector<8x8x8xf32>
    %119 = vector.shape_cast %118 : vector<8x8x8xf32> to vector<64x8xf32>
    %120 = vector.extract_strided_slice %6 {offsets = [0, 0, 0], sizes = [1, 8, 16], strides = [1, 1, 1]} : vector<2x8x16xf32> to vector<1x8x16xf32>
    %121 = vector.shape_cast %120 : vector<1x8x16xf32> to vector<8x16xf32>
    %cst_57 = arith.constant dense<0.000000e+00> : vector<64x16xf32>
    %122 = tpu.matmul %119, %121, %cst_57 {dimension_numbers = #tpu.dot_dimension_numbers<[1], [0], [0], [1], [0, 0, 1, 1], [], []>} : vector<64x8xf32>, vector<8x16xf32>, vector<64x16xf32> -> vector<64x16xf32>
    %123 = vector.extract_strided_slice %4 {offsets = [0, 0, 0], sizes = [1, 1, 16], strides = [1, 1, 1]} : vector<2x3x16xf32> to vector<1x1x16xf32>
    %124 = vector.shape_cast %123 : vector<1x1x16xf32> to vector<16xf32>
    %125 = vector.shape_cast %124 : vector<16xf32> to vector<1x16xf32>
    %126 = vector.broadcast %125 : vector<1x16xf32> to vector<64x16xf32>
    %127 = arith.addf %122, %126 : vector<64x16xf32>
    %cst_58 = arith.constant 3.000000e+00 : f32
    %128 = vector.broadcast %cst_58 : f32 to vector<64x16xf32>
    %129 = arith.addf %127, %128 : vector<64x16xf32>
    %cst_59 = arith.constant 0.000000e+00 : f32
    %cst_60 = arith.constant 6.000000e+00 : f32
    %130 = vector.broadcast %cst_59 : f32 to vector<64x16xf32>
    %131 = arith.maximumf %130, %129 : vector<64x16xf32>
    %132 = vector.broadcast %cst_60 : f32 to vector<64x16xf32>
    %133 = arith.minimumf %132, %131 : vector<64x16xf32>
    %134 = arith.mulf %127, %133 : vector<64x16xf32>
    %cst_61 = arith.constant 0.166666672 : f32
    %135 = vector.broadcast %cst_61 : f32 to vector<64x16xf32>
    %136 = arith.mulf %134, %135 : vector<64x16xf32>
    %137 = vector.shape_cast %136 : vector<64x16xf32> to vector<8x8x16xf32>
    %c1 = arith.constant 1 : index
    %c1_62 = arith.constant 1 : index
    %c0_63 = arith.constant 0 : index
    %138 = vector.load %arg13[%c1, %c1_62, %c0_63] : memref<10x10x16xf32, #tpu.memory_space<vmem>>, vector<8x8x16xf32>
    tpu.vector_store %arg13[%c1, %c1_62, %c0_63], %137 {strides = array<i32>} : memref<10x10x16xf32, #tpu.memory_space<vmem>>, vector<8x8x16xf32>,
    %cst_64 = arith.constant 0.000000e+00 : f32
    %139 = vector.broadcast %cst_64 : f32 to vector<8x8x16xf32>
    %c0_65 = arith.constant 0 : index
    %c0_66 = arith.constant 0 : index
    %c0_67 = arith.constant 0 : index
    %140 = vector.load %arg13[%c0_65, %c0_66, %c0_67] : memref<10x10x16xf32, #tpu.memory_space<vmem>>, vector<8x8x16xf32>
    %141 = vector.extract_strided_slice %7 {offsets = [0, 0, 0], sizes = [1, 1, 16], strides = [1, 1, 1]} : vector<2x9x16xf32> to vector<1x1x16xf32>
    %142 = vector.shape_cast %141 : vector<1x1x16xf32> to vector<16xf32>
    %143 = vector.shape_cast %142 : vector<16xf32> to vector<1x1x16xf32>
    %144 = vector.broadcast %143 : vector<1x1x16xf32> to vector<8x8x16xf32>
    %145 = arith.mulf %140, %144 : vector<8x8x16xf32>
    %146 = arith.addf %139, %145 : vector<8x8x16xf32>
    %c0_68 = arith.constant 0 : index
    %c1_69 = arith.constant 1 : index
    %c0_70 = arith.constant 0 : index
    %147 = vector.load %arg13[%c0_68, %c1_69, %c0_70] : memref<10x10x16xf32, #tpu.memory_space<vmem>>, vector<8x8x16xf32>
    %148 = vector.extract_strided_slice %7 {offsets = [0, 1, 0], sizes = [1, 1, 16], strides = [1, 1, 1]} : vector<2x9x16xf32> to vector<1x1x16xf32>
    %149 = vector.shape_cast %148 : vector<1x1x16xf32> to vector<16xf32>
    %150 = vector.shape_cast %149 : vector<16xf32> to vector<1x1x16xf32>
    %151 = vector.broadcast %150 : vector<1x1x16xf32> to vector<8x8x16xf32>
    %152 = arith.mulf %147, %151 : vector<8x8x16xf32>
    %153 = arith.addf %146, %152 : vector<8x8x16xf32>
    %c0_71 = arith.constant 0 : index
    %c2 = arith.constant 2 : index
    %c0_72 = arith.constant 0 : index
    %154 = vector.load %arg13[%c0_71, %c2, %c0_72] : memref<10x10x16xf32, #tpu.memory_space<vmem>>, vector<8x8x16xf32>
    %155 = vector.extract_strided_slice %7 {offsets = [0, 2, 0], sizes = [1, 1, 16], strides = [1, 1, 1]} : vector<2x9x16xf32> to vector<1x1x16xf32>
    %156 = vector.shape_cast %155 : vector<1x1x16xf32> to vector<16xf32>
    %157 = vector.shape_cast %156 : vector<16xf32> to vector<1x1x16xf32>
    %158 = vector.broadcast %157 : vector<1x1x16xf32> to vector<8x8x16xf32>
    %159 = arith.mulf %154, %158 : vector<8x8x16xf32>
    %160 = arith.addf %153, %159 : vector<8x8x16xf32>
    %c1_73 = arith.constant 1 : index
    %c0_74 = arith.constant 0 : index
    %c0_75 = arith.constant 0 : index
    %161 = vector.load %arg13[%c1_73, %c0_74, %c0_75] : memref<10x10x16xf32, #tpu.memory_space<vmem>>, vector<8x8x16xf32>
    %162 = vector.extract_strided_slice %7 {offsets = [0, 3, 0], sizes = [1, 1, 16], strides = [1, 1, 1]} : vector<2x9x16xf32> to vector<1x1x16xf32>
    %163 = vector.shape_cast %162 : vector<1x1x16xf32> to vector<16xf32>
    %164 = vector.shape_cast %163 : vector<16xf32> to vector<1x1x16xf32>
    %165 = vector.broadcast %164 : vector<1x1x16xf32> to vector<8x8x16xf32>
    %166 = arith.mulf %161, %165 : vector<8x8x16xf32>
    %167 = arith.addf %160, %166 : vector<8x8x16xf32>
    %c1_76 = arith.constant 1 : index
    %c1_77 = arith.constant 1 : index
    %c0_78 = arith.constant 0 : index
    %168 = vector.load %arg13[%c1_76, %c1_77, %c0_78] : memref<10x10x16xf32, #tpu.memory_space<vmem>>, vector<8x8x16xf32>
    %169 = vector.extract_strided_slice %7 {offsets = [0, 4, 0], sizes = [1, 1, 16], strides = [1, 1, 1]} : vector<2x9x16xf32> to vector<1x1x16xf32>
    %170 = vector.shape_cast %169 : vector<1x1x16xf32> to vector<16xf32>
    %171 = vector.shape_cast %170 : vector<16xf32> to vector<1x1x16xf32>
    %172 = vector.broadcast %171 : vector<1x1x16xf32> to vector<8x8x16xf32>
    %173 = arith.mulf %168, %172 : vector<8x8x16xf32>
    %174 = arith.addf %167, %173 : vector<8x8x16xf32>
    %c1_79 = arith.constant 1 : index
    %c2_80 = arith.constant 2 : index
    %c0_81 = arith.constant 0 : index
    %175 = vector.load %arg13[%c1_79, %c2_80, %c0_81] : memref<10x10x16xf32, #tpu.memory_space<vmem>>, vector<8x8x16xf32>
    %176 = vector.extract_strided_slice %7 {offsets = [0, 5, 0], sizes = [1, 1, 16], strides = [1, 1, 1]} : vector<2x9x16xf32> to vector<1x1x16xf32>
    %177 = vector.shape_cast %176 : vector<1x1x16xf32> to vector<16xf32>
    %178 = vector.shape_cast %177 : vector<16xf32> to vector<1x1x16xf32>
    %179 = vector.broadcast %178 : vector<1x1x16xf32> to vector<8x8x16xf32>
    %180 = arith.mulf %175, %179 : vector<8x8x16xf32>
    %181 = arith.addf %174, %180 : vector<8x8x16xf32>
    %c2_82 = arith.constant 2 : index
    %c0_83 = arith.constant 0 : index
    %c0_84 = arith.constant 0 : index
    %182 = vector.load %arg13[%c2_82, %c0_83, %c0_84] : memref<10x10x16xf32, #tpu.memory_space<vmem>>, vector<8x8x16xf32>
    %183 = vector.extract_strided_slice %7 {offsets = [0, 6, 0], sizes = [1, 1, 16], strides = [1, 1, 1]} : vector<2x9x16xf32> to vector<1x1x16xf32>
    %184 = vector.shape_cast %183 : vector<1x1x16xf32> to vector<16xf32>
    %185 = vector.shape_cast %184 : vector<16xf32> to vector<1x1x16xf32>
    %186 = vector.broadcast %185 : vector<1x1x16xf32> to vector<8x8x16xf32>
    %187 = arith.mulf %182, %186 : vector<8x8x16xf32>
    %188 = arith.addf %181, %187 : vector<8x8x16xf32>
    %c2_85 = arith.constant 2 : index
    %c1_86 = arith.constant 1 : index
    %c0_87 = arith.constant 0 : index
    %189 = vector.load %arg13[%c2_85, %c1_86, %c0_87] : memref<10x10x16xf32, #tpu.memory_space<vmem>>, vector<8x8x16xf32>
    %190 = vector.extract_strided_slice %7 {offsets = [0, 7, 0], sizes = [1, 1, 16], strides = [1, 1, 1]} : vector<2x9x16xf32> to vector<1x1x16xf32>
    %191 = vector.shape_cast %190 : vector<1x1x16xf32> to vector<16xf32>
    %192 = vector.shape_cast %191 : vector<16xf32> to vector<1x1x16xf32>
    %193 = vector.broadcast %192 : vector<1x1x16xf32> to vector<8x8x16xf32>
    %194 = arith.mulf %189, %193 : vector<8x8x16xf32>
    %195 = arith.addf %188, %194 : vector<8x8x16xf32>
    %c2_88 = arith.constant 2 : index
    %c2_89 = arith.constant 2 : index
    %c0_90 = arith.constant 0 : index
    %196 = vector.load %arg13[%c2_88, %c2_89, %c0_90] : memref<10x10x16xf32, #tpu.memory_space<vmem>>, vector<8x8x16xf32>
    %197 = vector.extract_strided_slice %7 {offsets = [0, 8, 0], sizes = [1, 1, 16], strides = [1, 1, 1]} : vector<2x9x16xf32> to vector<1x1x16xf32>
    %198 = vector.shape_cast %197 : vector<1x1x16xf32> to vector<16xf32>
    %199 = vector.shape_cast %198 : vector<16xf32> to vector<1x1x16xf32>
    %200 = vector.broadcast %199 : vector<1x1x16xf32> to vector<8x8x16xf32>
    %201 = arith.mulf %196, %200 : vector<8x8x16xf32>
    %202 = arith.addf %195, %201 : vector<8x8x16xf32>
    %203 = vector.extract_strided_slice %4 {offsets = [0, 1, 0], sizes = [1, 1, 16], strides = [1, 1, 1]} : vector<2x3x16xf32> to vector<1x1x16xf32>
    %204 = vector.shape_cast %203 : vector<1x1x16xf32> to vector<16xf32>
    %205 = vector.shape_cast %204 : vector<16xf32> to vector<1x1x16xf32>
    %206 = vector.broadcast %205 : vector<1x1x16xf32> to vector<8x8x16xf32>
    %207 = arith.addf %202, %206 : vector<8x8x16xf32>
    %208 = vector.shape_cast %207 : vector<8x8x16xf32> to vector<64x16xf32>
    %209 = vector.extract_strided_slice %8 {offsets = [0, 0, 0], sizes = [1, 16, 16], strides = [1, 1, 1]} : vector<2x16x16xf32> to vector<1x16x16xf32>
    %210 = vector.shape_cast %209 : vector<1x16x16xf32> to vector<16x16xf32>
    %cst_91 = arith.constant dense<0.000000e+00> : vector<64x16xf32>
    %211 = tpu.matmul %208, %210, %cst_91 {dimension_numbers = #tpu.dot_dimension_numbers<[1], [0], [0], [1], [0, 0, 1, 1], [], []>} : vector<64x16xf32>, vector<16x16xf32>, vector<64x16xf32> -> vector<64x16xf32>
    %212 = vector.extract_strided_slice %4 {offsets = [0, 2, 0], sizes = [1, 1, 16], strides = [1, 1, 1]} : vector<2x3x16xf32> to vector<1x1x16xf32>
    %213 = vector.shape_cast %212 : vector<1x1x16xf32> to vector<16xf32>
    %214 = vector.shape_cast %213 : vector<16xf32> to vector<1x16xf32>
    %215 = vector.broadcast %214 : vector<1x16xf32> to vector<64x16xf32>
    %216 = arith.addf %211, %215 : vector<64x16xf32>
    %cst_92 = arith.constant 3.000000e+00 : f32
    %217 = vector.broadcast %cst_92 : f32 to vector<64x16xf32>
    %218 = arith.addf %216, %217 : vector<64x16xf32>
    %cst_93 = arith.constant 0.000000e+00 : f32
    %cst_94 = arith.constant 6.000000e+00 : f32
    %219 = vector.broadcast %cst_93 : f32 to vector<64x16xf32>
    %220 = arith.maximumf %219, %218 : vector<64x16xf32>
    %221 = vector.broadcast %cst_94 : f32 to vector<64x16xf32>
    %222 = arith.minimumf %221, %220 : vector<64x16xf32>
    %223 = arith.mulf %216, %222 : vector<64x16xf32>
    %cst_95 = arith.constant 0.166666672 : f32
    %224 = vector.broadcast %cst_95 : f32 to vector<64x16xf32>
    %225 = arith.mulf %223, %224 : vector<64x16xf32>
    %226 = vector.extract_strided_slice %9 {offsets = [0, 0, 0], sizes = [1, 16, 8], strides = [1, 1, 1]} : vector<2x16x8xf32> to vector<1x16x8xf32>
    %227 = vector.shape_cast %226 : vector<1x16x8xf32> to vector<16x8xf32>
    %cst_96 = arith.constant dense<0.000000e+00> : vector<64x8xf32>
    %228 = tpu.matmul %225, %227, %cst_96 {dimension_numbers = #tpu.dot_dimension_numbers<[1], [0], [0], [1], [0, 0, 1, 1], [], []>} : vector<64x16xf32>, vector<16x8xf32>, vector<64x8xf32> -> vector<64x8xf32>
    %229 = vector.extract_strided_slice %5 {offsets = [0, 0], sizes = [1, 8], strides = [1, 1]} : vector<2x8xf32> to vector<1x8xf32>
    %230 = vector.shape_cast %229 : vector<1x8xf32> to vector<8xf32>
    %231 = vector.shape_cast %230 : vector<8xf32> to vector<1x8xf32>
    %232 = vector.broadcast %231 : vector<1x8xf32> to vector<64x8xf32>
    %233 = arith.addf %228, %232 : vector<64x8xf32>
    %234 = arith.addf %233, %89 : vector<64x8xf32>
    %235 = vector.extract_strided_slice %88 {offsets = [0, 0], sizes = [1, 8], strides = [1, 1]} : vector<65x8xf32> to vector<1x8xf32>
    %236 = tpu.concatenate %235, %234 in 0 : vector<1x8xf32>, vector<64x8xf32> -> vector<65x8xf32>
    %cst_97 = arith.constant dense<0.000000e+00> : vector<65xf32>
    %237 = vector.multi_reduction <add>, %236, %cst_97 [1] : vector<65x8xf32> to vector<65xf32>
    %238 = vector.shape_cast %237 : vector<65xf32> to vector<65x1xf32>
    %cst_98 = arith.constant 8.000000e+00 : f32
    %239 = vector.broadcast %cst_98 : f32 to vector<65x1xf32>
    %240 = arith.divf %238, %239 : vector<65x1xf32>
    %241 = vector.broadcast %240 : vector<65x1xf32> to vector<65x8xf32>
    %242 = arith.subf %236, %241 : vector<65x8xf32>
    %243 = arith.mulf %242, %242 : vector<65x8xf32>
    %cst_99 = arith.constant dense<0.000000e+00> : vector<65xf32>
    %244 = vector.multi_reduction <add>, %243, %cst_99 [1] : vector<65x8xf32> to vector<65xf32>
    %245 = vector.shape_cast %244 : vector<65xf32> to vector<65x1xf32>
    %cst_100 = arith.constant 8.000000e+00 : f32
    %246 = vector.broadcast %cst_100 : f32 to vector<65x1xf32>
    %247 = arith.divf %245, %246 : vector<65x1xf32>
    %248 = vector.broadcast %240 : vector<65x1xf32> to vector<65x8xf32>
    %249 = arith.subf %236, %248 : vector<65x8xf32>
    %cst_101 = arith.constant 9.99999974E-6 : f32
    %250 = vector.broadcast %cst_101 : f32 to vector<65x1xf32>
    %251 = arith.addf %247, %250 : vector<65x1xf32>
    %252 = math.rsqrt %251 : vector<65x1xf32>
    %253 = vector.broadcast %252 : vector<65x1xf32> to vector<65x8xf32>
    %254 = arith.mulf %249, %253 : vector<65x8xf32>
    %255 = vector.extract_strided_slice %0 {offsets = [1, 0, 0], sizes = [1, 1, 8], strides = [1, 1, 1]} : vector<2x3x8xf32> to vector<1x1x8xf32>
    %256 = vector.shape_cast %255 : vector<1x1x8xf32> to vector<8xf32>
    %257 = vector.shape_cast %256 : vector<8xf32> to vector<1x8xf32>
    %258 = vector.broadcast %257 : vector<1x8xf32> to vector<65x8xf32>
    %259 = arith.mulf %254, %258 : vector<65x8xf32>
    %260 = vector.extract_strided_slice %0 {offsets = [1, 1, 0], sizes = [1, 1, 8], strides = [1, 1, 1]} : vector<2x3x8xf32> to vector<1x1x8xf32>
    %261 = vector.shape_cast %260 : vector<1x1x8xf32> to vector<8xf32>
    %262 = vector.shape_cast %261 : vector<8xf32> to vector<1x8xf32>
    %263 = vector.broadcast %262 : vector<1x8xf32> to vector<65x8xf32>
    %264 = arith.addf %259, %263 : vector<65x8xf32>
    %265 = vector.extract_strided_slice %1 {offsets = [1, 0, 0], sizes = [1, 8, 48], strides = [1, 1, 1]} : vector<2x8x48xf32> to vector<1x8x48xf32>
    %266 = vector.shape_cast %265 : vector<1x8x48xf32> to vector<8x48xf32>
    %cst_102 = arith.constant dense<0.000000e+00> : vector<65x48xf32>
    %267 = tpu.matmul %264, %266, %cst_102 {dimension_numbers = #tpu.dot_dimension_numbers<[1], [0], [0], [1], [0, 0, 1, 1], [], []>} : vector<65x8xf32>, vector<8x48xf32>, vector<65x48xf32> -> vector<65x48xf32>
    %268 = vector.extract_strided_slice %267 {offsets = [0, 0], sizes = [65, 8], strides = [1, 1]} : vector<65x48xf32> to vector<65x8xf32>
    %269 = vector.extract_strided_slice %267 {offsets = [0, 16], sizes = [65, 8], strides = [1, 1]} : vector<65x48xf32> to vector<65x8xf32>
    %270 = vector.extract_strided_slice %267 {offsets = [0, 32], sizes = [65, 8], strides = [1, 1]} : vector<65x48xf32> to vector<65x8xf32>
    %cst_103 = arith.constant dense<0.000000e+00> : vector<65x65xf32>
    %271 = tpu.matmul %268, %269, %cst_103 {dimension_numbers = #tpu.dot_dimension_numbers<[1], [1], [0], [0], [0, 0, 1, 0], [], []>} : vector<65x8xf32>, vector<65x8xf32>, vector<65x65xf32> -> vector<65x65xf32>
    %cst_104 = arith.constant 0.353553385 : f32
    %272 = vector.broadcast %cst_104 : f32 to vector<65x65xf32>
    %273 = arith.mulf %271, %272 : vector<65x65xf32>
    %cst_105 = arith.constant dense<0xFF800000> : vector<65xf32>
    %274 = vector.multi_reduction <maximumf>, %273, %cst_105 [1] : vector<65x65xf32> to vector<65xf32>
    %275 = vector.shape_cast %274 : vector<65xf32> to vector<65x1xf32>
    %276 = vector.broadcast %275 : vector<65x1xf32> to vector<65x65xf32>
    %277 = arith.subf %273, %276 : vector<65x65xf32>
    %278 = math.exp %277 : vector<65x65xf32>
    %cst_106 = arith.constant dense<0.000000e+00> : vector<65xf32>
    %279 = vector.multi_reduction <add>, %278, %cst_106 [1] : vector<65x65xf32> to vector<65xf32>
    %280 = vector.shape_cast %279 : vector<65xf32> to vector<65x1xf32>
    %281 = tpu.reciprocal %280 {approx = true} : vector<65x1xf32> -> vector<65x1xf32>
    %282 = vector.broadcast %281 : vector<65x1xf32> to vector<65x65xf32>
    %283 = arith.mulf %278, %282 : vector<65x65xf32>
    %cst_107 = arith.constant dense<0.000000e+00> : vector<65x8xf32>
    %284 = tpu.matmul %283, %270, %cst_107 {dimension_numbers = #tpu.dot_dimension_numbers<[1], [0], [0], [1], [0, 0, 1, 1], [], []>} : vector<65x65xf32>, vector<65x8xf32>, vector<65x8xf32> -> vector<65x8xf32>
    %285 = vector.extract_strided_slice %267 {offsets = [0, 8], sizes = [65, 8], strides = [1, 1]} : vector<65x48xf32> to vector<65x8xf32>
    %286 = vector.extract_strided_slice %267 {offsets = [0, 24], sizes = [65, 8], strides = [1, 1]} : vector<65x48xf32> to vector<65x8xf32>
    %287 = vector.extract_strided_slice %267 {offsets = [0, 40], sizes = [65, 8], strides = [1, 1]} : vector<65x48xf32> to vector<65x8xf32>
    %cst_108 = arith.constant dense<0.000000e+00> : vector<65x65xf32>
    %288 = tpu.matmul %285, %286, %cst_108 {dimension_numbers = #tpu.dot_dimension_numbers<[1], [1], [0], [0], [0, 0, 1, 0], [], []>} : vector<65x8xf32>, vector<65x8xf32>, vector<65x65xf32> -> vector<65x65xf32>
    %cst_109 = arith.constant 0.353553385 : f32
    %289 = vector.broadcast %cst_109 : f32 to vector<65x65xf32>
    %290 = arith.mulf %288, %289 : vector<65x65xf32>
    %cst_110 = arith.constant dense<0xFF800000> : vector<65xf32>
    %291 = vector.multi_reduction <maximumf>, %290, %cst_110 [1] : vector<65x65xf32> to vector<65xf32>
    %292 = vector.shape_cast %291 : vector<65xf32> to vector<65x1xf32>
    %293 = vector.broadcast %292 : vector<65x1xf32> to vector<65x65xf32>
    %294 = arith.subf %290, %293 : vector<65x65xf32>
    %295 = math.exp %294 : vector<65x65xf32>
    %cst_111 = arith.constant dense<0.000000e+00> : vector<65xf32>
    %296 = vector.multi_reduction <add>, %295, %cst_111 [1] : vector<65x65xf32> to vector<65xf32>
    %297 = vector.shape_cast %296 : vector<65xf32> to vector<65x1xf32>
    %298 = tpu.reciprocal %297 {approx = true} : vector<65x1xf32> -> vector<65x1xf32>
    %299 = vector.broadcast %298 : vector<65x1xf32> to vector<65x65xf32>
    %300 = arith.mulf %295, %299 : vector<65x65xf32>
    %cst_112 = arith.constant dense<0.000000e+00> : vector<65x8xf32>
    %301 = tpu.matmul %300, %287, %cst_112 {dimension_numbers = #tpu.dot_dimension_numbers<[1], [0], [0], [1], [0, 0, 1, 1], [], []>} : vector<65x65xf32>, vector<65x8xf32>, vector<65x8xf32> -> vector<65x8xf32>
    %302 = tpu.concatenate %284, %301 in 1 : vector<65x8xf32>, vector<65x8xf32> -> vector<65x16xf32>
    %303 = vector.extract_strided_slice %2 {offsets = [1, 0, 0], sizes = [1, 16, 8], strides = [1, 1, 1]} : vector<2x16x8xf32> to vector<1x16x8xf32>
    %304 = vector.shape_cast %303 : vector<1x16x8xf32> to vector<16x8xf32>
    %cst_113 = arith.constant dense<0.000000e+00> : vector<65x8xf32>
    %305 = tpu.matmul %302, %304, %cst_113 {dimension_numbers = #tpu.dot_dimension_numbers<[1], [0], [0], [1], [0, 0, 1, 1], [], []>} : vector<65x16xf32>, vector<16x8xf32>, vector<65x8xf32> -> vector<65x8xf32>
    %306 = vector.extract_strided_slice %0 {offsets = [1, 2, 0], sizes = [1, 1, 8], strides = [1, 1, 1]} : vector<2x3x8xf32> to vector<1x1x8xf32>
    %307 = vector.shape_cast %306 : vector<1x1x8xf32> to vector<8xf32>
    %308 = vector.shape_cast %307 : vector<8xf32> to vector<1x8xf32>
    %309 = vector.broadcast %308 : vector<1x8xf32> to vector<65x8xf32>
    %310 = arith.addf %305, %309 : vector<65x8xf32>
    %311 = arith.addf %310, %236 : vector<65x8xf32>
    %312 = vector.extract_strided_slice %311 {offsets = [1, 0], sizes = [64, 8], strides = [1, 1]} : vector<65x8xf32> to vector<64x8xf32>
    %313 = vector.shape_cast %312 : vector<64x8xf32> to vector<8x8x8xf32>
    %cst_114 = arith.constant dense<0.000000e+00> : vector<8x8xf32>
    %314 = vector.multi_reduction <add>, %313, %cst_114 [1] : vector<8x8x8xf32> to vector<8x8xf32>
    %315 = vector.shape_cast %314 : vector<8x8xf32> to vector<8x1x8xf32>
    %cst_115 = arith.constant 8.000000e+00 : f32
    %316 = vector.broadcast %cst_115 : f32 to vector<8x1x8xf32>
    %317 = arith.divf %315, %316 : vector<8x1x8xf32>
    %318 = vector.broadcast %317 : vector<8x1x8xf32> to vector<8x8x8xf32>
    %319 = arith.subf %313, %318 : vector<8x8x8xf32>
    %320 = arith.mulf %319, %319 : vector<8x8x8xf32>
    %cst_116 = arith.constant dense<0.000000e+00> : vector<8x8xf32>
    %321 = vector.multi_reduction <add>, %320, %cst_116 [1] : vector<8x8x8xf32> to vector<8x8xf32>
    %322 = vector.shape_cast %321 : vector<8x8xf32> to vector<8x1x8xf32>
    %cst_117 = arith.constant 8.000000e+00 : f32
    %323 = vector.broadcast %cst_117 : f32 to vector<8x1x8xf32>
    %324 = arith.divf %322, %323 : vector<8x1x8xf32>
    %325 = vector.broadcast %317 : vector<8x1x8xf32> to vector<8x8x8xf32>
    %326 = arith.subf %313, %325 : vector<8x8x8xf32>
    %cst_118 = arith.constant 9.99999974E-6 : f32
    %327 = vector.broadcast %cst_118 : f32 to vector<8x1x8xf32>
    %328 = arith.addf %324, %327 : vector<8x1x8xf32>
    %329 = math.rsqrt %328 : vector<8x1x8xf32>
    %330 = vector.broadcast %329 : vector<8x1x8xf32> to vector<8x8x8xf32>
    %331 = arith.mulf %326, %330 : vector<8x8x8xf32>
    %332 = vector.extract_strided_slice %3 {offsets = [1, 0, 0, 0], sizes = [1, 1, 8, 1], strides = [1, 1, 1, 1]} : vector<2x2x8x1xf32> to vector<1x1x8x1xf32>
    %333 = vector.shape_cast %332 : vector<1x1x8x1xf32> to vector<8x1xf32>
    %334 = vector.shape_cast %333 : vector<8x1xf32> to vector<1x8x1xf32>
    %335 = vector.broadcast %334 : vector<1x8x1xf32> to vector<8x8x8xf32>
    %336 = arith.mulf %331, %335 : vector<8x8x8xf32>
    %337 = vector.extract_strided_slice %3 {offsets = [1, 1, 0, 0], sizes = [1, 1, 8, 1], strides = [1, 1, 1, 1]} : vector<2x2x8x1xf32> to vector<1x1x8x1xf32>
    %338 = vector.shape_cast %337 : vector<1x1x8x1xf32> to vector<8x1xf32>
    %339 = vector.shape_cast %338 : vector<8x1xf32> to vector<1x8x1xf32>
    %340 = vector.broadcast %339 : vector<1x8x1xf32> to vector<8x8x8xf32>
    %341 = arith.addf %336, %340 : vector<8x8x8xf32>
    %342 = vector.shape_cast %341 : vector<8x8x8xf32> to vector<64x8xf32>
    %343 = vector.extract_strided_slice %6 {offsets = [1, 0, 0], sizes = [1, 8, 16], strides = [1, 1, 1]} : vector<2x8x16xf32> to vector<1x8x16xf32>
    %344 = vector.shape_cast %343 : vector<1x8x16xf32> to vector<8x16xf32>
    %cst_119 = arith.constant dense<0.000000e+00> : vector<64x16xf32>
    %345 = tpu.matmul %342, %344, %cst_119 {dimension_numbers = #tpu.dot_dimension_numbers<[1], [0], [0], [1], [0, 0, 1, 1], [], []>} : vector<64x8xf32>, vector<8x16xf32>, vector<64x16xf32> -> vector<64x16xf32>
    %346 = vector.extract_strided_slice %4 {offsets = [1, 0, 0], sizes = [1, 1, 16], strides = [1, 1, 1]} : vector<2x3x16xf32> to vector<1x1x16xf32>
    %347 = vector.shape_cast %346 : vector<1x1x16xf32> to vector<16xf32>
    %348 = vector.shape_cast %347 : vector<16xf32> to vector<1x16xf32>
    %349 = vector.broadcast %348 : vector<1x16xf32> to vector<64x16xf32>
    %350 = arith.addf %345, %349 : vector<64x16xf32>
    %cst_120 = arith.constant 3.000000e+00 : f32
    %351 = vector.broadcast %cst_120 : f32 to vector<64x16xf32>
    %352 = arith.addf %350, %351 : vector<64x16xf32>
    %cst_121 = arith.constant 0.000000e+00 : f32
    %cst_122 = arith.constant 6.000000e+00 : f32
    %353 = vector.broadcast %cst_121 : f32 to vector<64x16xf32>
    %354 = arith.maximumf %353, %352 : vector<64x16xf32>
    %355 = vector.broadcast %cst_122 : f32 to vector<64x16xf32>
    %356 = arith.minimumf %355, %354 : vector<64x16xf32>
    %357 = arith.mulf %350, %356 : vector<64x16xf32>
    %cst_123 = arith.constant 0.166666672 : f32
    %358 = vector.broadcast %cst_123 : f32 to vector<64x16xf32>
    %359 = arith.mulf %357, %358 : vector<64x16xf32>
    %360 = vector.shape_cast %359 : vector<64x16xf32> to vector<8x8x16xf32>
    %c1_124 = arith.constant 1 : index
    %c1_125 = arith.constant 1 : index
    %c0_126 = arith.constant 0 : index
    %361 = vector.load %arg13[%c1_124, %c1_125, %c0_126] : memref<10x10x16xf32, #tpu.memory_space<vmem>>, vector<8x8x16xf32>
    tpu.vector_store %arg13[%c1_124, %c1_125, %c0_126], %360 {strides = array<i32>} : memref<10x10x16xf32, #tpu.memory_space<vmem>>, vector<8x8x16xf32>,
    %cst_127 = arith.constant 0.000000e+00 : f32
    %362 = vector.broadcast %cst_127 : f32 to vector<8x8x16xf32>
    %c0_128 = arith.constant 0 : index
    %c0_129 = arith.constant 0 : index
    %c0_130 = arith.constant 0 : index
    %363 = vector.load %arg13[%c0_128, %c0_129, %c0_130] : memref<10x10x16xf32, #tpu.memory_space<vmem>>, vector<8x8x16xf32>
    %364 = vector.extract_strided_slice %7 {offsets = [1, 0, 0], sizes = [1, 1, 16], strides = [1, 1, 1]} : vector<2x9x16xf32> to vector<1x1x16xf32>
    %365 = vector.shape_cast %364 : vector<1x1x16xf32> to vector<16xf32>
    %366 = vector.shape_cast %365 : vector<16xf32> to vector<1x1x16xf32>
    %367 = vector.broadcast %366 : vector<1x1x16xf32> to vector<8x8x16xf32>
    %368 = arith.mulf %363, %367 : vector<8x8x16xf32>
    %369 = arith.addf %362, %368 : vector<8x8x16xf32>
    %c0_131 = arith.constant 0 : index
    %c1_132 = arith.constant 1 : index
    %c0_133 = arith.constant 0 : index
    %370 = vector.load %arg13[%c0_131, %c1_132, %c0_133] : memref<10x10x16xf32, #tpu.memory_space<vmem>>, vector<8x8x16xf32>
    %371 = vector.extract_strided_slice %7 {offsets = [1, 1, 0], sizes = [1, 1, 16], strides = [1, 1, 1]} : vector<2x9x16xf32> to vector<1x1x16xf32>
    %372 = vector.shape_cast %371 : vector<1x1x16xf32> to vector<16xf32>
    %373 = vector.shape_cast %372 : vector<16xf32> to vector<1x1x16xf32>
    %374 = vector.broadcast %373 : vector<1x1x16xf32> to vector<8x8x16xf32>
    %375 = arith.mulf %370, %374 : vector<8x8x16xf32>
    %376 = arith.addf %369, %375 : vector<8x8x16xf32>
    %c0_134 = arith.constant 0 : index
    %c2_135 = arith.constant 2 : index
    %c0_136 = arith.constant 0 : index
    %377 = vector.load %arg13[%c0_134, %c2_135, %c0_136] : memref<10x10x16xf32, #tpu.memory_space<vmem>>, vector<8x8x16xf32>
    %378 = vector.extract_strided_slice %7 {offsets = [1, 2, 0], sizes = [1, 1, 16], strides = [1, 1, 1]} : vector<2x9x16xf32> to vector<1x1x16xf32>
    %379 = vector.shape_cast %378 : vector<1x1x16xf32> to vector<16xf32>
    %380 = vector.shape_cast %379 : vector<16xf32> to vector<1x1x16xf32>
    %381 = vector.broadcast %380 : vector<1x1x16xf32> to vector<8x8x16xf32>
    %382 = arith.mulf %377, %381 : vector<8x8x16xf32>
    %383 = arith.addf %376, %382 : vector<8x8x16xf32>
    %c1_137 = arith.constant 1 : index
    %c0_138 = arith.constant 0 : index
    %c0_139 = arith.constant 0 : index
    %384 = vector.load %arg13[%c1_137, %c0_138, %c0_139] : memref<10x10x16xf32, #tpu.memory_space<vmem>>, vector<8x8x16xf32>
    %385 = vector.extract_strided_slice %7 {offsets = [1, 3, 0], sizes = [1, 1, 16], strides = [1, 1, 1]} : vector<2x9x16xf32> to vector<1x1x16xf32>
    %386 = vector.shape_cast %385 : vector<1x1x16xf32> to vector<16xf32>
    %387 = vector.shape_cast %386 : vector<16xf32> to vector<1x1x16xf32>
    %388 = vector.broadcast %387 : vector<1x1x16xf32> to vector<8x8x16xf32>
    %389 = arith.mulf %384, %388 : vector<8x8x16xf32>
    %390 = arith.addf %383, %389 : vector<8x8x16xf32>
    %c1_140 = arith.constant 1 : index
    %c1_141 = arith.constant 1 : index
    %c0_142 = arith.constant 0 : index
    %391 = vector.load %arg13[%c1_140, %c1_141, %c0_142] : memref<10x10x16xf32, #tpu.memory_space<vmem>>, vector<8x8x16xf32>
    %392 = vector.extract_strided_slice %7 {offsets = [1, 4, 0], sizes = [1, 1, 16], strides = [1, 1, 1]} : vector<2x9x16xf32> to vector<1x1x16xf32>
    %393 = vector.shape_cast %392 : vector<1x1x16xf32> to vector<16xf32>
    %394 = vector.shape_cast %393 : vector<16xf32> to vector<1x1x16xf32>
    %395 = vector.broadcast %394 : vector<1x1x16xf32> to vector<8x8x16xf32>
    %396 = arith.mulf %391, %395 : vector<8x8x16xf32>
    %397 = arith.addf %390, %396 : vector<8x8x16xf32>
    %c1_143 = arith.constant 1 : index
    %c2_144 = arith.constant 2 : index
    %c0_145 = arith.constant 0 : index
    %398 = vector.load %arg13[%c1_143, %c2_144, %c0_145] : memref<10x10x16xf32, #tpu.memory_space<vmem>>, vector<8x8x16xf32>
    %399 = vector.extract_strided_slice %7 {offsets = [1, 5, 0], sizes = [1, 1, 16], strides = [1, 1, 1]} : vector<2x9x16xf32> to vector<1x1x16xf32>
    %400 = vector.shape_cast %399 : vector<1x1x16xf32> to vector<16xf32>
    %401 = vector.shape_cast %400 : vector<16xf32> to vector<1x1x16xf32>
    %402 = vector.broadcast %401 : vector<1x1x16xf32> to vector<8x8x16xf32>
    %403 = arith.mulf %398, %402 : vector<8x8x16xf32>
    %404 = arith.addf %397, %403 : vector<8x8x16xf32>
    %c2_146 = arith.constant 2 : index
    %c0_147 = arith.constant 0 : index
    %c0_148 = arith.constant 0 : index
    %405 = vector.load %arg13[%c2_146, %c0_147, %c0_148] : memref<10x10x16xf32, #tpu.memory_space<vmem>>, vector<8x8x16xf32>
    %406 = vector.extract_strided_slice %7 {offsets = [1, 6, 0], sizes = [1, 1, 16], strides = [1, 1, 1]} : vector<2x9x16xf32> to vector<1x1x16xf32>
    %407 = vector.shape_cast %406 : vector<1x1x16xf32> to vector<16xf32>
    %408 = vector.shape_cast %407 : vector<16xf32> to vector<1x1x16xf32>
    %409 = vector.broadcast %408 : vector<1x1x16xf32> to vector<8x8x16xf32>
    %410 = arith.mulf %405, %409 : vector<8x8x16xf32>
    %411 = arith.addf %404, %410 : vector<8x8x16xf32>
    %c2_149 = arith.constant 2 : index
    %c1_150 = arith.constant 1 : index
    %c0_151 = arith.constant 0 : index
    %412 = vector.load %arg13[%c2_149, %c1_150, %c0_151] : memref<10x10x16xf32, #tpu.memory_space<vmem>>, vector<8x8x16xf32>
    %413 = vector.extract_strided_slice %7 {offsets = [1, 7, 0], sizes = [1, 1, 16], strides = [1, 1, 1]} : vector<2x9x16xf32> to vector<1x1x16xf32>
    %414 = vector.shape_cast %413 : vector<1x1x16xf32> to vector<16xf32>
    %415 = vector.shape_cast %414 : vector<16xf32> to vector<1x1x16xf32>
    %416 = vector.broadcast %415 : vector<1x1x16xf32> to vector<8x8x16xf32>
    %417 = arith.mulf %412, %416 : vector<8x8x16xf32>
    %418 = arith.addf %411, %417 : vector<8x8x16xf32>
    %c2_152 = arith.constant 2 : index
    %c2_153 = arith.constant 2 : index
    %c0_154 = arith.constant 0 : index
    %419 = vector.load %arg13[%c2_152, %c2_153, %c0_154] : memref<10x10x16xf32, #tpu.memory_space<vmem>>, vector<8x8x16xf32>
    %420 = vector.extract_strided_slice %7 {offsets = [1, 8, 0], sizes = [1, 1, 16], strides = [1, 1, 1]} : vector<2x9x16xf32> to vector<1x1x16xf32>
    %421 = vector.shape_cast %420 : vector<1x1x16xf32> to vector<16xf32>
    %422 = vector.shape_cast %421 : vector<16xf32> to vector<1x1x16xf32>
    %423 = vector.broadcast %422 : vector<1x1x16xf32> to vector<8x8x16xf32>
    %424 = arith.mulf %419, %423 : vector<8x8x16xf32>
    %425 = arith.addf %418, %424 : vector<8x8x16xf32>
    %426 = vector.extract_strided_slice %4 {offsets = [1, 1, 0], sizes = [1, 1, 16], strides = [1, 1, 1]} : vector<2x3x16xf32> to vector<1x1x16xf32>
    %427 = vector.shape_cast %426 : vector<1x1x16xf32> to vector<16xf32>
    %428 = vector.shape_cast %427 : vector<16xf32> to vector<1x1x16xf32>
    %429 = vector.broadcast %428 : vector<1x1x16xf32> to vector<8x8x16xf32>
    %430 = arith.addf %425, %429 : vector<8x8x16xf32>
    %431 = vector.shape_cast %430 : vector<8x8x16xf32> to vector<64x16xf32>
    %432 = vector.extract_strided_slice %8 {offsets = [1, 0, 0], sizes = [1, 16, 16], strides = [1, 1, 1]} : vector<2x16x16xf32> to vector<1x16x16xf32>
    %433 = vector.shape_cast %432 : vector<1x16x16xf32> to vector<16x16xf32>
    %cst_155 = arith.constant dense<0.000000e+00> : vector<64x16xf32>
    %434 = tpu.matmul %431, %433, %cst_155 {dimension_numbers = #tpu.dot_dimension_numbers<[1], [0], [0], [1], [0, 0, 1, 1], [], []>} : vector<64x16xf32>, vector<16x16xf32>, vector<64x16xf32> -> vector<64x16xf32>
    %435 = vector.extract_strided_slice %4 {offsets = [1, 2, 0], sizes = [1, 1, 16], strides = [1, 1, 1]} : vector<2x3x16xf32> to vector<1x1x16xf32>
    %436 = vector.shape_cast %435 : vector<1x1x16xf32> to vector<16xf32>
    %437 = vector.shape_cast %436 : vector<16xf32> to vector<1x16xf32>
    %438 = vector.broadcast %437 : vector<1x16xf32> to vector<64x16xf32>
    %439 = arith.addf %434, %438 : vector<64x16xf32>
    %cst_156 = arith.constant 3.000000e+00 : f32
    %440 = vector.broadcast %cst_156 : f32 to vector<64x16xf32>
    %441 = arith.addf %439, %440 : vector<64x16xf32>
    %cst_157 = arith.constant 0.000000e+00 : f32
    %cst_158 = arith.constant 6.000000e+00 : f32
    %442 = vector.broadcast %cst_157 : f32 to vector<64x16xf32>
    %443 = arith.maximumf %442, %441 : vector<64x16xf32>
    %444 = vector.broadcast %cst_158 : f32 to vector<64x16xf32>
    %445 = arith.minimumf %444, %443 : vector<64x16xf32>
    %446 = arith.mulf %439, %445 : vector<64x16xf32>
    %cst_159 = arith.constant 0.166666672 : f32
    %447 = vector.broadcast %cst_159 : f32 to vector<64x16xf32>
    %448 = arith.mulf %446, %447 : vector<64x16xf32>
    %449 = vector.extract_strided_slice %9 {offsets = [1, 0, 0], sizes = [1, 16, 8], strides = [1, 1, 1]} : vector<2x16x8xf32> to vector<1x16x8xf32>
    %450 = vector.shape_cast %449 : vector<1x16x8xf32> to vector<16x8xf32>
    %cst_160 = arith.constant dense<0.000000e+00> : vector<64x8xf32>
    %451 = tpu.matmul %448, %450, %cst_160 {dimension_numbers = #tpu.dot_dimension_numbers<[1], [0], [0], [1], [0, 0, 1, 1], [], []>} : vector<64x16xf32>, vector<16x8xf32>, vector<64x8xf32> -> vector<64x8xf32>
    %452 = vector.extract_strided_slice %5 {offsets = [1, 0], sizes = [1, 8], strides = [1, 1]} : vector<2x8xf32> to vector<1x8xf32>
    %453 = vector.shape_cast %452 : vector<1x8xf32> to vector<8xf32>
    %454 = vector.shape_cast %453 : vector<8xf32> to vector<1x8xf32>
    %455 = vector.broadcast %454 : vector<1x8xf32> to vector<64x8xf32>
    %456 = arith.addf %451, %455 : vector<64x8xf32>
    %457 = arith.addf %456, %312 : vector<64x8xf32>
    %458 = vector.extract_strided_slice %311 {offsets = [0, 0], sizes = [1, 8], strides = [1, 1]} : vector<65x8xf32> to vector<1x8xf32>
    %459 = tpu.concatenate %458, %457 in 0 : vector<1x8xf32>, vector<64x8xf32> -> vector<65x8xf32>
    %c0_161 = arith.constant 0 : index
    %c0_162 = arith.constant 0 : index
    %c0_163 = arith.constant 0 : index
    %460 = vector.load %arg12[%c0_161, %c0_162, %c0_163] : memref<1x65x8xf32, #tpu.memory_space<vmem>>, vector<1x65x8xf32>
    %461 = vector.shape_cast %460 : vector<1x65x8xf32> to vector<65x8xf32>
    %462 = vector.shape_cast %459 : vector<65x8xf32> to vector<1x65x8xf32>
    tpu.vector_store %arg12[%c0_161, %c0_162, %c0_163], %462 {strides = array<i32>} : memref<1x65x8xf32, #tpu.memory_space<vmem>>, vector<1x65x8xf32>,
    return
  }
  func.func @transform_0(%arg0: i32) -> (i32, i32, i32) {
    %c0_i32 = arith.constant 0 : i32
    %c0_i32_0 = arith.constant 0 : i32
    %c0_i32_1 = arith.constant 0 : i32
    return %arg0, %c0_i32, %c0_i32_0 : i32, i32, i32
  }
  func.func @transform_1(%arg0: i32) -> (i32, i32, i32) {
    %c0_i32 = arith.constant 0 : i32
    %c0_i32_0 = arith.constant 0 : i32
    %c0_i32_1 = arith.constant 0 : i32
    %c0_i32_2 = arith.constant 0 : i32
    return %c0_i32, %c0_i32_0, %c0_i32_1 : i32, i32, i32
  }
  func.func @transform_2(%arg0: i32) -> (i32, i32, i32) {
    %c0_i32 = arith.constant 0 : i32
    %c0_i32_0 = arith.constant 0 : i32
    %c0_i32_1 = arith.constant 0 : i32
    %c0_i32_2 = arith.constant 0 : i32
    return %c0_i32, %c0_i32_0, %c0_i32_1 : i32, i32, i32
  }
  func.func @transform_3(%arg0: i32) -> (i32, i32, i32) {
    %c0_i32 = arith.constant 0 : i32
    %c0_i32_0 = arith.constant 0 : i32
    %c0_i32_1 = arith.constant 0 : i32
    %c0_i32_2 = arith.constant 0 : i32
    return %c0_i32, %c0_i32_0, %c0_i32_1 : i32, i32, i32
  }
  func.func @transform_4(%arg0: i32) -> (i32, i32, i32, i32) {
    %c0_i32 = arith.constant 0 : i32
    %c0_i32_0 = arith.constant 0 : i32
    %c0_i32_1 = arith.constant 0 : i32
    %c0_i32_2 = arith.constant 0 : i32
    %c0_i32_3 = arith.constant 0 : i32
    return %c0_i32, %c0_i32_0, %c0_i32_1, %c0_i32_2 : i32, i32, i32, i32
  }
  func.func @transform_5(%arg0: i32) -> (i32, i32, i32) {
    %c0_i32 = arith.constant 0 : i32
    %c0_i32_0 = arith.constant 0 : i32
    %c0_i32_1 = arith.constant 0 : i32
    %c0_i32_2 = arith.constant 0 : i32
    return %c0_i32, %c0_i32_0, %c0_i32_1 : i32, i32, i32
  }
  func.func @transform_6(%arg0: i32) -> (i32, i32) {
    %c0_i32 = arith.constant 0 : i32
    %c0_i32_0 = arith.constant 0 : i32
    %c0_i32_1 = arith.constant 0 : i32
    return %c0_i32, %c0_i32_0 : i32, i32
  }
  func.func @transform_7(%arg0: i32) -> (i32, i32, i32) {
    %c0_i32 = arith.constant 0 : i32
    %c0_i32_0 = arith.constant 0 : i32
    %c0_i32_1 = arith.constant 0 : i32
    %c0_i32_2 = arith.constant 0 : i32
    return %c0_i32, %c0_i32_0, %c0_i32_1 : i32, i32, i32
  }
  func.func @transform_8(%arg0: i32) -> (i32, i32, i32) {
    %c0_i32 = arith.constant 0 : i32
    %c0_i32_0 = arith.constant 0 : i32
    %c0_i32_1 = arith.constant 0 : i32
    %c0_i32_2 = arith.constant 0 : i32
    return %c0_i32, %c0_i32_0, %c0_i32_1 : i32, i32, i32
  }
  func.func @transform_9(%arg0: i32) -> (i32, i32, i32) {
    %c0_i32 = arith.constant 0 : i32
    %c0_i32_0 = arith.constant 0 : i32
    %c0_i32_1 = arith.constant 0 : i32
    %c0_i32_2 = arith.constant 0 : i32
    return %c0_i32, %c0_i32_0, %c0_i32_1 : i32, i32, i32
  }
  func.func @transform_10(%arg0: i32) -> (i32, i32, i32) {
    %c0_i32 = arith.constant 0 : i32
    %c0_i32_0 = arith.constant 0 : i32
    %c0_i32_1 = arith.constant 0 : i32
    %c0_i32_2 = arith.constant 0 : i32
    return %c0_i32, %c0_i32_0, %c0_i32_1 : i32, i32, i32
  }
  func.func @transform_11(%arg0: i32) -> (i32, i32, i32) {
    %c0_i32 = arith.constant 0 : i32
    %c0_i32_0 = arith.constant 0 : i32
    %c0_i32_1 = arith.constant 0 : i32
    return %arg0, %c0_i32, %c0_i32_0 : i32, i32, i32
  }
}

</mosaic_0001>

<bundles_post_ra>
// kernel: transformer_forward.1
= control target key start
LH: loop header
LB: loop body
LE: loop exit
PB: predicated region body
PF: predicated region fallthrough
CT: control target
= control target key end

     0   :  { %s4973_s17 = smov 0   ;;  %s6853_s0 = inlined_call_operand.vmem [shape: f32[2,65,8], index: 0, kind: input, shape index: {}]   ;;  %s6854_s1 = inlined_call_operand.vmem [shape: f32[2,3,8], index: 1, kind: input, shape index: {}]   ;;  %s6855_s2 = inlined_call_operand.vmem [shape: f32[2,8,48], index: 2, kind: input, shape index: {}]   ;;  %s6856_s3 = inlined_call_operand.vmem [shape: f32[2,16,8], index: 3, kind: input, shape index: {}]   ;;  %s6857_s4 = inlined_call_operand.vmem [shape: f32[2,2,8,1], index: 4, kind: input, shape index: {}]   ;;  %s6858_s5 = inlined_call_operand.vmem [shape: f32[2,3,16], index: 5, kind: input, shape index: {}]   ;;  %s6859_s6 = inlined_call_operand.vmem [shape: f32[2,8], index: 6, kind: input, shape index: {}]   ;;  %s6860_s7 = inlined_call_operand.vmem [shape: f32[2,8,16], index: 7, kind: input, shape index: {}]   ;;  %s6861_s8 = inlined_call_operand.vmem [shape: f32[2,9,16], index: 8, kind: input, shape index: {}]   ;;  %s6862_s9 = inlined_call_operand.vmem [shape: f32[2,16,16], index: 9, kind: input, shape index: {}]   ;;  %s6863_s10 = inlined_call_operand.vmem [shape: f32[2,16,8], index: 10, kind: input, shape index: {}]   ;;  %s6864_s11 = inlined_call_operand.vmem [shape: f32[2,65,8], index: 11, kind: output, shape index: {}]  }
   0x1 LB: > { %s4352_s18 = sadd.s32 4294967295, %s4902_s17   ;;  %p4356_p0 = scmp.ge.s32.totalorder %s4902_s17, 1  ;;  %s4902_s17 = sphi %s4973_s17, %s21_s17  }
   0x2   : > { %p337_p1 = scmp.lt.s32.totalorder %s4902_s17, 3 }
   0x4   : > { %p338_p2 = pnand %p4356_p0, %p337_p1 }
   0x5   : > { %p377_p3 = scmp.lt.s32.totalorder (!%p338_p2), %s4352_s18, 1  ;;  %s4905_s27 = smov (!%p338_p2), 112  }
   0x6   : > { %341 = sbr.rel (%p338_p2) target bundleno = 4496 (0x1190), region = 64  ;;  %s4906_s28 = smov (!%p338_p2), 96  }
   0x7   : > { %s4907_s29 = smov (!%p338_p2), 104   ;;  %s4908_s30 = smov (!%p338_p2), 120  }
   0x8   : > { %s4909_s12 = smov (!%p338_p2), 88   ;;  %s4910_s13 = smov (!%p338_p2), 8  }
   0xb   : > { %s6872_s18 = smov (!%p377_p3, %s4352_s18), 1  ;;  %vm447_vm0 = vcmask 64512   ;;  %vm472_vm1 = vcmask 57344   ;;  %v4904_v18 = vmov 8.0  }
   0xc   : > { %s4567_s19 = smul.u32 72, %s6872_s18  ;;  %4670 = vrcp.f32 %v4904_v18 }
   0xe   : > { %s4989_s22 = scalar_lea.vmem %s6853_s0, %s4567_s19  ;;  %s6814_s15 = scalar_lea.vmem %s6864_s11, %s4567_s19 }
   0xf   : > { %v444_v0 = vld [vmem:[%s4989_s22 + $0x30] sm:$0xff]  ;;  %v442_v1 = vld [vmem:[%s4989_s22 + $0x20] sm:$0xff]  ;;  %v445_v6 = vld [vmem:[%s4989_s22 + $0x38] sm:$0xff] }
  0x10   : > { %v466_v2 = vsel %vm447_vm0, %v444_v0, 0.0  ;;  %v460_v3 = vsel %vm447_vm0, %v442_v1, 0.0  ;;  %v438_v4 = vld [vmem:[%s4989_s22] sm:$0xff]  ;;  %v443_v7 = vld [vmem:[%s4989_s22 + $0x28] sm:$0xff]  ;;  %v469_v9 = vsel %vm447_vm0, %v445_v6, 0.0  ;;  %v440_v13 = vld [vmem:[%s4989_s22 + $0x10] sm:$0xff] }
  0x11   : > { %467 = vadd.xlane.f32.xlu1 %v466_v2  ;;  %461 = vadd.xlane.f32.xlu0 %v460_v3  ;;  %v448_v5 = vsel %vm447_vm0, %v438_v4, 0.0  ;;  %v446_v8 = vld [vmem:[%s4989_s22 + $0x40] sm:$0x1]  ;;  %v463_v10 = vsel %vm447_vm0, %v443_v7, 0.0  ;;  %v439_v12 = vld [vmem:[%s4989_s22 + $0x8] sm:$0xff]  ;;  %v454_v15 = vsel %vm447_vm0, %v440_v13, 0.0 }
  0x12   : > { %449 = vadd.xlane.f32.xlu2 %v448_v5  ;;  %v473_v11 = vsel %vm472_vm1, %v446_v8, 0.0  ;;  %v451_v14 = vsel %vm447_vm0, %v439_v12, 0.0  ;;  %v441_v16 = vld [vmem:[%s4989_s22 + $0x18] sm:$0xff]  ;;  %v4671_v19 = vpop.eup %4670 }
  0x13   : > { %v457_v17 = vsel %vm447_vm0, %v441_v16, 0.0  ;;  %v477_v20 = vmul.f32 8.0, %v4671_v19  ;;  %vm481_vm2 = vweird.f32 %v4671_v19 }
  0x15   : > { %v478_v21 = vsub.f32 1.0, %v477_v20 }
  0x17   : > { %v479_v22 = vmul.f32 %v4671_v19, %v478_v21 }
  0x19   : > { %470 = vadd.xlane.f32.xlu1 %v469_v9  ;;  %464 = vadd.xlane.f32.xlu0 %v463_v10  ;;  %v480_v23 = vadd.f32 %v4671_v19, %v479_v22 }
  0x1a   : > { %474 = vadd.xlane.f32.xlu2 %v473_v11 }
  0x1b   : > { %v5009_v24 = vsel %vm481_vm2, %v4671_v19, %v480_v23 }
  0x21   : > { %452 = vadd.xlane.f32.xlu0 %v451_v14  ;;  %455 = vadd.xlane.f32.xlu1 %v454_v15 }
  0x29   : > { %458 = vadd.xlane.f32.xlu0 %v457_v17 }
  0x84   : > { %v468_v25 = vpop.xlane.xlu1 %467  ;;  %v462_v26 = vpop.xlane.xlu0 %461 }
  0x85   : > { %v487_v27 = vmul.f32 %v5009_v24, %v462_v26  ;;  %v450_v28 = vpop.xlane.xlu2 %449  ;;  %v489_v29 = vmul.f32 %v5009_v24, %v468_v25 }
  0x86   : > { %v483_v38 = vmul.f32 %v5009_v24, %v450_v28 }
  0x87   : > { %v5013_v30 = vsub.f32 %v442_v1, %v487_v27  ;;  %v5017_v32 = vsub.f32 %v444_v0, %v489_v29 }
  0x88   : > { %v5030_v44 = vsub.f32 %v438_v4, %v483_v38 }
  0x89   : > { %v505_v31 = vmul.f32 %v5013_v30, %v5013_v30  ;;  %v507_v40 = vmul.f32 %v5017_v32, %v5017_v32 }
  0x8a   : > { %v501_v55 = vmul.f32 %v5030_v44, %v5030_v44 }
  0x8b   : > { %v522_v33 = vsel %vm447_vm0, %v505_v31, 0.0  ;;  %v528_v47 = vsel %vm447_vm0, %v507_v40, 0.0  ;;  %v387_v40 = vld [vmem:[%s6854_s1] sm:$0x7] }
  0x8c   : > { %v471_v34 = vpop.xlane.xlu1 %470  ;;  %v465_v35 = vpop.xlane.xlu0 %464  ;;  %523 = vadd.xlane.f32.xlu2 %v522_v33  ;;  %v510_v60 = vsel %vm447_vm0, %v501_v55, 0.0 }
  0x8d   : > { %v490_v36 = vmul.f32 %v5009_v24, %v471_v34  ;;  %v488_v37 = vmul.f32 %v5009_v24, %v465_v35  ;;  %v475_v39 = vpop.xlane.xlu2 %474 }
  0x8e   : > { %v491_v41 = vmul.f32 %v5009_v24, %v475_v39 }
  0x8f   : > { %v5026_v42 = vsub.f32 %v445_v6, %v490_v36  ;;  %v5028_v43 = vsub.f32 %v443_v7, %v488_v37  ;;  %v389_v6 = vld [vmem:[%s6855_s2] sm:$0xff] }
  0x90   : > { %v5037_v48 = vsub.f32 %v446_v8, %v491_v41  ;;  %4557 = vmatpush.msra.mxu1 %v389_v6  ;;  %716 = vmatpush.msra.mxu0 %v389_v6 }
  0x91   : > { %v506_v45 = vmul.f32 %v5028_v43, %v5028_v43  ;;  %v508_v46 = vmul.f32 %v5026_v42, %v5026_v42 }
  0x92   : > { %v509_v56 = vmul.f32 %v5037_v48, %v5037_v48 }
  0x93   : > { %v525_v49 = vsel %vm447_vm0, %v506_v45, 0.0  ;;  %v531_v50 = vsel %vm447_vm0, %v508_v46, 0.0 }
  0x94   : > { %526 = vadd.xlane.f32.xlu1 %v525_v49  ;;  %532 = vadd.xlane.f32.xlu0 %v531_v50  ;;  %v453_v51 = vpop.xlane.xlu0 %452  ;;  %v456_v52 = vpop.xlane.xlu1 %455  ;;  %v534_v61 = vsel %vm472_vm1, %v509_v56, 0.0  ;;  %v5101_v49 = vperm.slane %v387_v40, 0 }
  0x95   : > { %v484_v53 = vmul.f32 %v5009_v24, %v453_v51  ;;  %529 = vadd.xlane.f32.xlu2 %v528_v47  ;;  %v485_v54 = vmul.f32 %v5009_v24, %v456_v52 }
  0x97   : > { %v5047_v57 = vsub.f32 %v439_v12, %v484_v53  ;;  %v5049_v58 = vsub.f32 %v440_v13, %v485_v54 }
  0x99   : > { %v502_v59 = vmul.f32 %v5047_v57, %v5047_v57  ;;  %v503_v1 = vmul.f32 %v5049_v58, %v5049_v58 }
  0x9b   : > { %v513_v62 = vsel %vm447_vm0, %v502_v59, 0.0  ;;  %v516_v3 = vsel %vm447_vm0, %v503_v1, 0.0 }
  0x9c   : > { %514 = vadd.xlane.f32.xlu0 %v513_v62  ;;  %v459_v63 = vpop.xlane.xlu0 %458  ;;  %511 = vadd.xlane.f32.xlu1 %v510_v60 }
  0x9d   : > { %v486_v0 = vmul.f32 %v5009_v24, %v459_v63  ;;  %535 = vadd.xlane.f32.xlu2 %v534_v61  ;;  %v5106_v61 = vperm.slane %v387_v40, 1 }
  0x9f   : > { %v5059_v2 = vsub.f32 %v441_v16, %v486_v0 }
  0xa1   : > { %v504_v4 = vmul.f32 %v5059_v2, %v5059_v2 }
  0xa3   : > { %v519_v5 = vsel %vm447_vm0, %v504_v4, 0.0 }
  0xa4   : > { %517 = vadd.xlane.f32.xlu1 %v516_v3 }
  0xa5   : > { %520 = vadd.xlane.f32.xlu2 %v519_v5 }
  0xff   : > { %v524_v7 = vpop.xlane.xlu2 %523 }
 0x100   : > { %v541_v8 = vmul.f32 %v524_v7, %v5009_v24 }
 0x102   : > { %v550_v9 = vadd.f32 1e-05, %v541_v8 }
 0x104   : > { %4672 = vrsqrt.f32 %v550_v9  ;;  %vm601_vm4 = vweird.f32 %v550_v9 }
 0x107   : > { %v527_v10 = vpop.xlane.xlu1 %526  ;;  %v533_v11 = vpop.xlane.xlu0 %532 }
 0x108   : > { %v542_v12 = vmul.f32 %v527_v10, %v5009_v24  ;;  %v544_v13 = vmul.f32 %v533_v11, %v5009_v24  ;;  %v530_v14 = vpop.xlane.xlu2 %529 }
 0x109   : > { %v543_v15 = vmul.f32 %v530_v14, %v5009_v24 }
 0x10a   : > { %v4673_v16 = vpop.eup %4672  ;;  %v551_v17 = vadd.f32 1e-05, %v542_v12  ;;  %v5072_v18 = vadd.f32 1e-05, %v544_v13 }
 0x10b   : > { %v596_v19 = vmul.f32 %v4673_v16, %v550_v9  ;;  %v5074_v20 = vadd.f32 1e-05, %v543_v15  ;;  %vm602_vm3 = vweird.f32 %v4673_v16 }
 0x10c   : > { %4674 = vrsqrt.f32 %v551_v17  ;;  %vm603_vm5 = vmor %vm601_vm4, %vm602_vm3  ;;  %vm611_vm7 = vweird.f32 %v551_v17  ;;  %vm631_vm3 = vweird.f32 %v5072_v18 }
 0x10d   : > { %v597_v21 = vmul.f32 %v4673_v16, %v596_v19  ;;  %4676 = vrsqrt.f32 %v5072_v18  ;;  %vm621_vm8 = vweird.f32 %v5074_v20 }
 0x10e   : > { %4678 = vrsqrt.f32 %v5074_v20 }
 0x10f   : > { %v598_v22 = vmul.f32 0.5, %v597_v21  ;;  %v515_v23 = vpop.xlane.xlu0 %514  ;;  %v512_v25 = vpop.xlane.xlu1 %511 }
 0x110   : > { %v538_v26 = vmul.f32 %v515_v23, %v5009_v24  ;;  %v537_v27 = vmul.f32 %v512_v25, %v5009_v24  ;;  %v536_v28 = vpop.xlane.xlu2 %535 }
 0x111   : > { %v599_v29 = vsub.f32 1.5, %v598_v22  ;;  %v545_v31 = vmul.f32 %v536_v28, %v5009_v24 }
 0x112   : > { %v4675_v33 = vpop.eup %4674  ;;  %v5081_v34 = vadd.f32 1e-05, %v538_v26  ;;  %v5083_v35 = vadd.f32 1e-05, %v537_v27 }
 0x113   : > { %v5085_v36 = vpop.eup %4676  ;;  %v600_v37 = vmul.f32 %v4673_v16, %v599_v29  ;;  %v606_v38 = vmul.f32 %v4675_v33, %v551_v17  ;;  %v5087_v39 = vadd.f32 1e-05, %v545_v31  ;;  %vm612_vm6 = vweird.f32 %v4675_v33 }
 0x114   : > { %v5092_v41 = vpop.eup %4678  ;;  %4680 = vrsqrt.f32 %v5081_v34  ;;  %v626_v47 = vmul.f32 %v5085_v36, %v5072_v18  ;;  %vm613_vm10 = vmor %vm611_vm7, %vm612_vm6  ;;  %vm571_vm11 = vweird.f32 %v5081_v34  ;;  %vm561_vm13 = vweird.f32 %v5083_v35 }
 0x115   : > { %v607_v45 = vmul.f32 %v4675_v33, %v606_v38  ;;  %v616_v46 = vmul.f32 %v5092_v41, %v5074_v20  ;;  %4682 = vrsqrt.f32 %v5083_v35  ;;  %v604_v53 = vsel %vm603_vm5, %v4673_v16, %v600_v37 }
 0x116   : > { %4684 = vrsqrt.f32 %v5087_v39  ;;  %v649_v56 = vmul.f32 %v604_v53, %v5013_v30  ;;  %v627_v63 = vmul.f32 %v5085_v36, %v626_v47  ;;  %vm622_vm9 = vweird.f32 %v5092_v41 }
 0x117   : > { %v608_v50 = vmul.f32 0.5, %v607_v45  ;;  %v617_v51 = vmul.f32 %v5092_v41, %v616_v46  ;;  %v518_v52 = vpop.xlane.xlu1 %517  ;;  %vm5140_vm14 = vmor %vm621_vm8, %vm622_vm9  ;;  %vm632_vm4 = vweird.f32 %v5085_v36  ;;  %vm641_vm9 = vweird.f32 %v5087_v39 }
 0x118   : > { %v539_v54 = vmul.f32 %v518_v52, %v5009_v24  ;;  %v521_v55 = vpop.xlane.xlu2 %520  ;;  %v659_v3 = vmul.f32 %v5101_v49, %v649_v56  ;;  %v628_v10 = vmul.f32 0.5, %v627_v63  ;;  %vm5164_vm6 = vmor %vm631_vm3, %vm632_vm4  ;;  %vm861_vm3 = vcmask 531456  }
 0x119   : > { %v609_v59 = vsub.f32 1.5, %v608_v50  ;;  %v618_v60 = vmul.f32 0.5, %v617_v51  ;;  %v540_v1 = vmul.f32 %v521_v55, %v5009_v24  ;;  %vm886_vm4 = vcmask 524288  }
 0x11a   : > { %v5108_v62 = vpop.eup %4680  ;;  %v5111_v0 = vadd.f32 1e-05, %v539_v54  ;;  %v669_v13 = vadd.f32 %v5106_v61, %v659_v3  ;;  %v629_v25 = vsub.f32 1.5, %v628_v10 }
 0x11b   : > { %v4683_v4 = vpop.eup %4682  ;;  %v610_v5 = vmul.f32 %v4675_v33, %v609_v59  ;;  %v619_v6 = vsub.f32 1.5, %v618_v60  ;;  %v566_v30 = vmul.f32 %v5108_v62, %v5081_v34  ;;  %v5124_v12 = vadd.f32 1e-05, %v540_v1 }
 0x11c   : > { %v5117_v7 = vpop.eup %4684  ;;  %v556_v8 = vmul.f32 %v4683_v4, %v5083_v35  ;;  %4686 = vrsqrt.f32 %v5111_v0  ;;  %4363 = vmatmul.msk.f32.vlgmr.msra.gmra.mxu1 %vm447_vm0, %v669_v13  ;;  %vm572_vm12 = vweird.f32 %v5108_v62  ;;  %vm562_vm15 = vweird.f32 %v4683_v4 }
 0x11d   : > { %v567_v9 = vmul.f32 %v5108_v62, %v566_v30  ;;  %v620_v14 = vmul.f32 %v5092_v41, %v619_v6  ;;  %v636_v16 = vmul.f32 %v5117_v7, %v5087_v39  ;;  %v614_v17 = vsel %vm613_vm10, %v4675_v33, %v610_v5  ;;  %vm5151_vm2 = vmor %vm571_vm11, %vm572_vm12 }
 0x11e   : > { %v557_v11 = vmul.f32 %v4683_v4, %v556_v8  ;;  %4688 = vrsqrt.f32 %v5124_v12  ;;  %v650_v21 = vmul.f32 %v614_v17, %v5028_v43  ;;  %vm563_vm5 = vmor %vm561_vm13, %vm562_vm15  ;;  %vm581_vm7 = vweird.f32 %v5111_v0 }
 0x11f   : > { %v568_v15 = vmul.f32 0.5, %v567_v9  ;;  %v637_v28 = vmul.f32 %v5117_v7, %v636_v16  ;;  %v624_v31 = vsel %vm5140_vm14, %v5092_v41, %v620_v14  ;;  %v630_v41 = vmul.f32 %v5085_v36, %v629_v25 }
 0x120   : > { %v558_v19 = vmul.f32 0.5, %v557_v11  ;;  %v660_v43 = vmul.f32 %v5101_v49, %v650_v21  ;;  %v651_v46 = vmul.f32 %v624_v31, %v5017_v32  ;;  %vm642_vm10 = vweird.f32 %v5117_v7 }
 0x121   : > { %v569_v22 = vsub.f32 1.5, %v568_v15  ;;  %v638_v47 = vmul.f32 0.5, %v637_v28  ;;  %v634_v60 = vsel %vm5164_vm6, %v5085_v36, %v630_v41  ;;  %vm643_vm12 = vmor %vm641_vm9, %vm642_vm10  ;;  %vm591_vm13 = vweird.f32 %v5124_v12 }
 0x122   : > { %v4687_v23 = vpop.eup %4686  ;;  %v559_v27 = vsub.f32 1.5, %v558_v19  ;;  %v670_v37 = vadd.f32 %v5106_v61, %v660_v43  ;;  %v661_v55 = vmul.f32 %v5101_v49, %v651_v46  ;;  %v652_v1 = vmul.f32 %v634_v60, %v5026_v42 }
 0x123   : > { %v576_v29 = vmul.f32 %v4687_v23, %v5111_v0  ;;  %v570_v33 = vmul.f32 %v5108_v62, %v569_v22  ;;  %vm582_vm8 = vweird.f32 %v4687_v23  ;;  %vm1520_vm6 = vcmask 1046528  }
 0x124   : > { %v560_v34 = vmul.f32 %v4683_v4, %v559_v27  ;;  %v4689_v40 = vpop.eup %4688  ;;  %4364 = vmatmul.msk.f32.gmra.mxu1 %vm447_vm0, %v670_v37  ;;  %vm583_vm11 = vmor %vm581_vm7, %vm582_vm8  ;;  %v671_v0 = vadd.f32 %v5106_v61, %v661_v55  ;;  %v662_v39 = vmul.f32 %v5101_v49, %v652_v1 }
 0x125   : > { %v577_v38 = vmul.f32 %v4687_v23, %v576_v29  ;;  %v586_v51 = vmul.f32 %v4689_v40, %v5124_v12  ;;  %v574_v35 = vsel %vm5151_vm2, %v5108_v62, %v570_v33  ;;  %vm592_vm14 = vweird.f32 %v4689_v40 }
 0x126   : > { %v564_v45 = vsel %vm563_vm5, %v4683_v4, %v560_v34  ;;  %v646_v59 = vmul.f32 %v574_v35, %v5047_v57  ;;  %vm593_vm15 = vmor %vm591_vm13, %vm592_vm14  ;;  %v672_v8 = vadd.f32 %v5106_v61, %v662_v39  ;;  %vm1015_vm2 = vcmask 1040384  }
 0x127   : > { %v578_v50 = vmul.f32 0.5, %v577_v38  ;;  %v645_v52 = vmul.f32 %v564_v45, %v5030_v44  ;;  %v587_v54 = vmul.f32 %v4689_v40, %v586_v51  ;;  %v639_v44 = vsub.f32 1.5, %v638_v47 }
 0x128   : > { %v656_v57 = vmul.f32 %v5101_v49, %v646_v59  ;;  %vm416_vm5 = vcmask 130048  }
 0x129   : > { %v579_v53 = vsub.f32 1.5, %v578_v50  ;;  %v655_v32 = vmul.f32 %v5101_v49, %v645_v52  ;;  %v588_v62 = vmul.f32 0.5, %v587_v54  ;;  %v640_v3 = vmul.f32 %v5117_v7, %v639_v44 }
 0x12a   : > { %v666_v5 = vadd.f32 %v5106_v61, %v656_v57 }
 0x12b   : > { %v665_v56 = vadd.f32 %v5106_v61, %v655_v32  ;;  %v580_v63 = vmul.f32 %v4687_v23, %v579_v53  ;;  %v589_v4 = vsub.f32 1.5, %v588_v62  ;;  %v644_v42 = vsel %vm643_vm12, %v5117_v7, %v640_v3 }
 0x12c   : > { %4365 = vmatmul.msk.f32.gmra.mxu1 %vm447_vm0, %v671_v0  ;;  %v653_v9 = vmul.f32 %v644_v42, %v5037_v48 }
 0x12d   : > { %4359 = vmatmul.msk.f32.vlgmr.msra.gmra.mxu0 %vm447_vm0, %v665_v56  ;;  %v584_v36 = vsel %vm583_vm11, %v4687_v23, %v580_v63  ;;  %v590_v30 = vmul.f32 %v4689_v40, %v589_v4 }
 0x12e   : > { %v647_v6 = vmul.f32 %v584_v36, %v5049_v58  ;;  %v663_v12 = vmul.f32 %v5101_v49, %v653_v9 }
 0x12f   : > { %v594_v11 = vsel %vm593_vm15, %v4689_v40, %v590_v30 }
 0x130   : > { %v657_v10 = vmul.f32 %v5101_v49, %v647_v6  ;;  %v648_v58 = vmul.f32 %v594_v11, %v5059_v2  ;;  %v673_v7 = vadd.f32 %v5106_v61, %v663_v12 }
 0x132   : > { %v667_v13 = vadd.f32 %v5106_v61, %v657_v10  ;;  %v658_v14 = vmul.f32 %v5101_v49, %v648_v58 }
 0x134   : > { %4366 = vmatmul.msk.f32.gmra.mxu1 %vm447_vm0, %v672_v8  ;;  %v668_v48 = vadd.f32 %v5106_v61, %v658_v14 }
 0x135   : > { %4360 = vmatmul.msk.f32.gmra.mxu0 %vm447_vm0, %v666_v5 }
 0x13c   : > { %4367 = vmatmul.msk.f32.gmra.mxu1 %vm447_vm0, %v673_v7 }
 0x13d   : > { %4361 = vmatmul.msk.f32.gmra.mxu0 %vm447_vm0, %v667_v13 }
 0x145   : > { %4362 = vmatmul.msk.f32.gmra.mxu0 %vm447_vm0, %v668_v48 }
 0x199   : > { %v5207_v15 = vpop.f32.mrf.mxu1 }
 0x1a1   : > { %v5209_v16 = vpop.f32.mrf.mxu1 }
 0x1a2   : > { %v5239_v23 = vpack.i.bf16 %v5207_v15, %v5209_v16 }
 0x1a9   : > { %v5213_v19 = vpop.f32.mrf.mxu1 }
 0x1aa   : > { %v5211_v17 = vpop.f32.mrf.mxu0  ;;  %766 = vrot.lane.b32.xlu2 %v5213_v19, %s4905_s27 }
 0x1b1   : > { %v5219_v49 = vpop.f32.mrf.mxu1 }
 0x1b2   : > { %v5217_v2 = vpop.f32.mrf.mxu0  ;;  %762 = vrot.lane.b32.xlu2 %v5207_v15, %s4905_s27  ;;  %768 = vrot.lane.b32.xlu1 %v5219_v49, %s4905_s27  ;;  %v5263_v27 = vpack.i.bf16 %v5213_v19, %v5219_v49 }
 0x1b3   : > { %v5249_v25 = vpack.i.bf16 %v5211_v17, %v5217_v2 }
 0x1b9   : > { %v5227_v21 = vpop.f32.mrf.mxu1 }
 0x1ba   : > { %v5225_v61 = vpop.f32.mrf.mxu0  ;;  %756 = vrot.lane.b32.xlu2 %v5217_v2, %s4905_s27  ;;  %770 = vrot.lane.b32.xlu0 %v5227_v21, %s4905_s27 }
 0x1c2   : > { %v5233_v22 = vpop.f32.mrf.mxu0  ;;  %4591 = vrot.lane.b32.xlu2 %v5239_v23, %s4906_s28  ;;  %764 = vrot.lane.b32.xlu0 %v5209_v16, %s4905_s27 }
 0x1c3   : > { %760 = vrot.lane.b32.xlu1 %v5233_v22, %s4905_s27  ;;  %v5257_v26 = vpack.i.bf16 %v5225_v61, %v5233_v22 }
 0x1ca   : > { %4601 = vrot.lane.b32.xlu2 %v5249_v25, %s4906_s28  ;;  %758 = vrot.lane.b32.xlu0 %v5225_v61, %s4905_s27 }
 0x1cb   : > { %754 = vrot.lane.b32.xlu1 %v5211_v17, %s4905_s27 }
 0x1d2   : > { %1090 = vrot.lane.b32.xlu2 %v5209_v16, %s4907_s29  ;;  %4586 = vrot.lane.b32.xlu0 %v5263_v27, %s4906_s28 }
 0x1d3   : > { %4596 = vrot.lane.b32.xlu1 %v5257_v26, %s4906_s28 }
 0x1da   : > { %1096 = vrot.lane.b32.xlu2 %v5227_v21, %s4907_s29  ;;  %1094 = vrot.lane.b32.xlu0 %v5219_v49, %s4907_s29 }
 0x1db   : > { %1092 = vrot.lane.b32.xlu1 %v5213_v19, %s4907_s29 }
 0x1e3   : > { %978 = vrot.lane.b32.xlu1 %v5227_v21, %s4906_s28 }
 0x204   : > { %v767_v43 = vpop.permute.xlu2 %766 }
 0x20c   : > { %v763_v31 = vpop.permute.xlu2 %762 }
 0x214   : > { %v757_v37 = vpop.permute.xlu2 %756 }
 0x21c   : > { %v4592_v41 = vpop.permute.xlu2 %4591 }
 0x21d   : > { %v4593_v18 = vunpack.i.l.bf16 %v4592_v41  ;;  %v4594_v35 = vunpack.i.h.bf16 %v4592_v41 }
 0x224   : > { %v769_v28 = vpop.permute.xlu1 %768  ;;  %v4602_v46 = vpop.permute.xlu2 %4601 }
 0x225   : > { %v4603_v55 = vunpack.i.l.bf16 %v4602_v46  ;;  %v4604_v44 = vunpack.i.h.bf16 %v4602_v46 }
 0x22c   : > { %v771_v29 = vpop.permute.xlu0 %770  ;;  %v1091_v53 = vpop.permute.xlu2 %1090 }
 0x22d   : > { %4368 = vmatpush.xpose.msk.msrb.mxu1 %vm447_vm0, %v771_v29 }
 0x231   : > { %4369 = vmatpush.xpose.msk.msrb.mxu1 %vm447_vm0, %v769_v28 }
 0x234   : > { %v765_v20 = vpop.permute.xlu0 %764  ;;  %v1097_v56 = vpop.permute.xlu2 %1096 }
 0x235   : > { %v761_v33 = vpop.permute.xlu1 %760  ;;  %4370 = vmatpush.xpose.msk.msrb.mxu1 %vm447_vm0, %v767_v43 }
 0x239   : > { %4371 = vmatpush.xpose.msk.msrb.mxu1 %vm447_vm0, %v765_v20 }
 0x23c   : > { %v759_v40 = vpop.permute.xlu0 %758 }
 0x23d   : > { %v755_v34 = vpop.permute.xlu1 %754  ;;  %4372 = vmatpush.xpose.msk.msrb.mxu1 %vm447_vm0, %v763_v31 }
 0x241   : > { %4373 = vmatpush.xpose.msk.msrb.mxu1 %vm447_vm0, %v761_v33 }
 0x244   : > { %v4587_v47 = vpop.permute.xlu0 %4586 }
 0x245   : > { %v4597_v38 = vpop.permute.xlu1 %4596  ;;  %4374 = vmatpush.xpose.msk.msrb.mxu1 %vm447_vm0, %v759_v40  ;;  %v4588_v51 = vunpack.i.l.bf16 %v4587_v47  ;;  %v4589_v52 = vunpack.i.h.bf16 %v4587_v47 }
 0x246   : > { %v4598_v54 = vunpack.i.l.bf16 %v4597_v38  ;;  %v4599_v32 = vunpack.i.h.bf16 %v4597_v38 }
 0x249   : > { %4375 = vmatpush.xpose.msk.msrb.mxu1 %vm447_vm0, %v757_v37 }
 0x24c   : > { %v1095_v59 = vpop.permute.xlu0 %1094 }
 0x24d   : > { %v1093_v45 = vpop.permute.xlu1 %1092  ;;  %4376 = vmatpush.xpose.msk.msrb.mxu1 %vm447_vm0, %v755_v34 }
 0x250   : > { %4377 = vmatmul.msk.f32.vlgmr.msrb.gmra.mxu1 %vm447_vm0, %v5211_v17 }
 0x255   : > { %v979_v50 = vpop.permute.xlu1 %978 }
 0x256   : > { %4386 = vmatpush.msk.msra.mxu2 %vm1015_vm2, %v979_v50  ;;  %4558 = vmatpush.msk.msra.mxu3 %vm1015_vm2, %v979_v50 }
 0x258   : > { %1026 = vmatpush.msra.mxu2 %v4588_v51  ;;  %4559 = vmatpush.msra.mxu3 %v4588_v51 }
 0x259   : > { %4378 = vmatmul.msk.f32.gmra.mxu1 %vm447_vm0, %v5217_v2 }
 0x25a   : > { %1027 = vmatpush.msra.mxu2 %v4589_v52  ;;  %4560 = vmatpush.msra.mxu3 %v4589_v52 }
 0x25c   : > { %1028 = vmatpush.msra.mxu2 %v4593_v18  ;;  %4561 = vmatpush.msra.mxu3 %v4593_v18 }
 0x25e   : > { %1029 = vmatpush.msra.mxu2 %v4594_v35  ;;  %4562 = vmatpush.msra.mxu3 %v4594_v35 }
 0x260   : > { %1030 = vmatpush.msra.mxu2 %v4598_v54  ;;  %4563 = vmatpush.msra.mxu3 %v4598_v54 }
 0x261   : > { %4379 = vmatmul.msk.f32.gmra.mxu1 %vm447_vm0, %v5225_v61 }
 0x262   : > { %1031 = vmatpush.msra.mxu2 %v4599_v32  ;;  %4564 = vmatpush.msra.mxu3 %v4599_v32 }
 0x264   : > { %1032 = vmatpush.msra.mxu2 %v4603_v55  ;;  %4565 = vmatpush.msra.mxu3 %v4603_v55 }
 0x266   : > { %1033 = vmatpush.msra.mxu2 %v4604_v44  ;;  %4566 = vmatpush.msra.mxu3 %v4604_v44 }
 0x268   : > { %4396 = vmatpush.xpose.msk.msrb.mxu3 %vm447_vm0, %v1097_v56 }
 0x269   : > { %4380 = vmatmul.msk.f32.gmra.mxu1 %vm447_vm0, %v5233_v22 }
 0x26c   : > { %4397 = vmatpush.xpose.msk.msrb.mxu3 %vm447_vm0, %v1095_v59 }
 0x270   : > { %4398 = vmatpush.xpose.msk.msrb.mxu3 %vm447_vm0, %v1093_v45 }
 0x271   : > { %4381 = vmatmul.msk.f32.gmra.mxu1 %vm447_vm0, %v5207_v15 }
 0x274   : > { %4399 = vmatpush.xpose.msk.msrb.mxu3 %vm447_vm0, %v1091_v53 }
 0x279   : > { %4382 = vmatmul.msk.f32.gmra.mxu1 %vm447_vm0, %v5209_v16 }
 0x281   : > { %4383 = vmatmul.msk.f32.gmra.mxu1 %vm447_vm0, %v5213_v19 }
 0x289   : > { %4384 = vmatmul.msk.f32.gmra.mxu1 %vm447_vm0, %v5219_v49 }
 0x291   : > { %4385 = vmatmul.msk.f32.gmra.mxu1 %vm447_vm0, %v5227_v21 }
 0x2cd   : > { %v5310_v60 = vpop.f32.mrf.mxu1 }
 0x2ce   : > { %v5371_v59 = vmul.f32 0.35355338, %v5310_v60 }
 0x2d6   : > { %v5312_v63 = vpop.f32.mrf.mxu1 }
 0x2de   : > { %v5314_v62 = vpop.f32.mrf.mxu1 }
 0x2df   : > { %v5364_v53 = vmul.f32 0.35355338, %v5314_v62 }
 0x2e6   : > { %v5316_v0 = vpop.f32.mrf.mxu1 }
 0x2ee   : > { %v837_v1 = vpop.f32.mrf.mxu1 }
 0x2ef   : > { %v856_v3 = vmul.f32 0.35355338, %v837_v1  ;;  %v862_v1 = vsel %vm861_vm3, %v5371_v59, -inf }
 0x2f1   : > { %v874_v57 = vsel %vm861_vm3, %v856_v3, -inf }
 0x2f2   : > { %875 = vmax.xlane.f32.xlu0 %v874_v57 }
 0x2f6   : > { %v840_v4 = vpop.f32.mrf.mxu1 }
 0x2f7   : > { %v857_v36 = vmul.f32 0.35355338, %v840_v4 }
 0x2f9   : > { %v877_v39 = vsel %vm861_vm3, %v857_v36, -inf }
 0x2fa   : > { %878 = vmax.xlane.f32.xlu2 %v877_v39 }
 0x2fe   : > { %v843_v5 = vpop.f32.mrf.mxu1 }
 0x2ff   : > { %v858_v6 = vmul.f32 0.35355338, %v843_v5 }
 0x301   : > { %v880_v42 = vsel %vm861_vm3, %v858_v6, -inf }
 0x302   : > { %881 = vmax.xlane.f32.xlu1 %v880_v42 }
 0x306   : > { %v846_v30 = vpop.f32.mrf.mxu1 }
 0x307   : > { %v859_v8 = vmul.f32 0.35355338, %v846_v30 }
 0x309   : > { %v883_v9 = vsel %vm861_vm3, %v859_v8, -inf }
 0x30a   : > { %884 = vmax.xlane.f32.xlu0 %v883_v9 }
 0x30e   : > { %v849_v10 = vpop.f32.mrf.mxu1 }
 0x30f   : > { %v860_v11 = vmul.f32 0.35355338, %v849_v10 }
 0x311   : > { %v887_v12 = vsel %vm886_vm4, %v860_v11, -inf }
 0x312   : > { %888 = vmax.xlane.f32.xlu2 %v887_v12 }
 0x32a   : > { %1086 = vrot.lane.b32.xlu2 %v5233_v22, %s4907_s29 }
 0x332   : > { %1084 = vrot.lane.b32.xlu2 %v5225_v61, %s4907_s29 }
 0x33a   : > { %1080 = vrot.lane.b32.xlu2 %v5211_v17, %s4907_s29 }
 0x365   : > { %v876_v13 = vpop.xlane.xlu0 %875 }
 0x366   : > { %v894_v58 = vsub.f32 %v856_v3, %v876_v13 }
 0x368   : > { %v907_v7 = vmul.f32 1.442695, %v894_v58 }
 0x36a   : > { %4690 = vpow2.f32 %v907_v7 }
 0x36d   : > { %v879_v14 = vpop.xlane.xlu2 %878 }
 0x36e   : > { %v895_v48 = vsub.f32 %v857_v36, %v879_v14 }
 0x370   : > { %v4691_v43 = vpop.eup %4690  ;;  %v909_v28 = vmul.f32 1.442695, %v895_v48 }
 0x371   : > { %v929_v29 = vsel %vm861_vm3, %v4691_v43, 0.0 }
 0x372   : > { %4692 = vpow2.f32 %v909_v28  ;;  %930 = vadd.xlane.f32.xlu0 %v929_v29 }
 0x375   : > { %v882_v31 = vpop.xlane.xlu1 %881 }
 0x376   : > { %v896_v33 = vsub.f32 %v858_v6, %v882_v31 }
 0x378   : > { %v4693_v20 = vpop.eup %4692  ;;  %v911_v34 = vmul.f32 1.442695, %v896_v33 }
 0x379   : > { %v932_v37 = vsel %vm861_vm3, %v4693_v20, 0.0 }
 0x37a   : > { %4694 = vpow2.f32 %v911_v34  ;;  %933 = vadd.xlane.f32.xlu1 %v932_v37 }
 0x37d   : > { %v885_v41 = vpop.xlane.xlu0 %884 }
 0x37e   : > { %v897_v45 = vsub.f32 %v859_v8, %v885_v41 }
 0x380   : > { %v4695_v38 = vpop.eup %4694  ;;  %v913_v46 = vmul.f32 1.442695, %v897_v45 }
 0x381   : > { %v935_v40 = vsel %vm861_vm3, %v4695_v38, 0.0 }
 0x382   : > { %936 = vadd.xlane.f32.xlu2 %v935_v40  ;;  %4696 = vpow2.f32 %v913_v46 }
 0x385   : > { %v889_v47 = vpop.xlane.xlu2 %888 }
 0x386   : > { %1082 = vrot.lane.b32.xlu0 %v5217_v2, %s4907_s29  ;;  %v898_v50 = vsub.f32 %v860_v11, %v889_v47 }
 0x388   : > { %v4697_v51 = vpop.eup %4696  ;;  %v915_v52 = vmul.f32 1.442695, %v898_v50 }
 0x389   : > { %v938_v18 = vsel %vm861_vm3, %v4697_v51, 0.0 }
 0x38a   : > { %4698 = vpow2.f32 %v915_v52 }
 0x393   : > { %1088 = vrot.lane.b32.xlu1 %v5207_v15, %s4907_s29 }
 0x39a   : > { %1062 = vrot.lane.b32.xlu2 %v5211_v17, %s4908_s30  ;;  %v4699_v17 = vpop.eup %4698 }
 0x3a2   : > { %1064 = vrot.lane.b32.xlu2 %v5217_v2, %s4908_s30  ;;  %v941_v2 = vsel %vm886_vm4, %v4699_v17, 0.0 }
 0x3aa   : > { %1070 = vrot.lane.b32.xlu2 %v5207_v15, %s4908_s30  ;;  %v1087_v15 = vpop.permute.xlu2 %1086 }
 0x3b0   : > { %939 = vadd.xlane.f32.xlu0 %v938_v18 }
 0x3b2   : > { %1074 = vrot.lane.b32.xlu2 %v5213_v19, %s4908_s30  ;;  %v5359_v19 = vmul.f32 0.35355338, %v5312_v63  ;;  %v1085_v35 = vpop.permute.xlu2 %1084 }
 0x3ba   : > { %1078 = vrot.lane.b32.xlu2 %v5227_v21, %s4908_s30  ;;  %v1081_v54 = vpop.permute.xlu2 %1080 }
 0x3bd   : > { %942 = vadd.xlane.f32.xlu1 %v941_v2 }
 0x3c4   : > { %1066 = vrot.lane.b32.xlu0 %v5225_v61, %s4908_s30  ;;  %v865_v61 = vsel %vm861_vm3, %v5359_v19, -inf }
 0x3cc   : > { %1072 = vrot.lane.b32.xlu0 %v5209_v16, %s4908_s30 }
 0x3d4   : > { %1076 = vrot.lane.b32.xlu0 %v5219_v49, %s4908_s30  ;;  %v868_v49 = vsel %vm861_vm3, %v5364_v53, -inf }
 0x3d6   : > { %1068 = vrot.lane.b32.xlu1 %v5233_v22, %s4908_s30 }
 0x3dc   : > { %4606 = vrot.lane.b32.xlu0 %v5263_v27, %s4909_s12 }
 0x3e3   : > { %866 = vmax.xlane.f32.xlu2 %v865_v61 }
 0x3e5   : > { %v931_v16 = vpop.xlane.xlu0 %930 }
 0x3e6   : > { %4700 = vrcp.f32 %v931_v16 }
 0x3eb   : > { %869 = vmax.xlane.f32.xlu2 %v868_v49 }
 0x3ec   : > { %v4701_v22 = vpop.eup %4700 }
 0x3ed   : > { %v934_v27 = vpop.xlane.xlu1 %933  ;;  %v957_v32 = vmul.f32 %v4701_v22, %v4691_v43 }
 0x3ee   : > { %4702 = vrcp.f32 %v934_v27 }
 0x3ef   : > { %4391 = vmatmul.msk.f32.vlgmr.msra.gmra.mxu3 %vm861_vm3, %v957_v32 }
 0x3f4   : > { %v4703_v55 = vpop.eup %4702 }
 0x3f5   : > { %v937_v44 = vpop.xlane.xlu2 %936  ;;  %v958_v56 = vmul.f32 %v4703_v55, %v4693_v20  ;;  %v5429_v55 = vmul.f32 0.35355338, %v5316_v0 }
 0x3f6   : > { %4704 = vrcp.f32 %v937_v44 }
 0x3f7   : > { %4392 = vmatmul.msk.f32.gmra.mxu3 %vm861_vm3, %v958_v56  ;;  %v871_v44 = vsel %vm861_vm3, %v5429_v55, -inf }
 0x3f8   : > { %v1083_v57 = vpop.permute.xlu0 %1082 }
 0x3fc   : > { %v4705_v63 = vpop.eup %4704 }
 0x3fd   : > { %v959_v62 = vmul.f32 %v4705_v63, %v4695_v38  ;;  %v1063_v42 = vpop.permute.xlu2 %1062 }
 0x3ff   : > { %4393 = vmatmul.msk.f32.gmra.mxu3 %vm861_vm3, %v959_v62 }
 0x400   : > { %863 = vmax.xlane.f32.xlu1 %v862_v1 }
 0x405   : > { %v1089_v3 = vpop.permute.xlu1 %1088  ;;  %v1065_v30 = vpop.permute.xlu2 %1064 }
 0x406   : > { %4400 = vmatpush.xpose.msk.msrb.mxu3 %vm447_vm0, %v1089_v3 }
 0x40a   : > { %4401 = vmatpush.xpose.msk.msrb.mxu3 %vm447_vm0, %v1087_v15 }
 0x40d   : > { %v1071_v9 = vpop.permute.xlu2 %1070 }
 0x40e   : > { %4402 = vmatpush.xpose.msk.msrb.mxu3 %vm447_vm0, %v1085_v35 }
 0x412   : > { %4403 = vmatpush.xpose.msk.msrb.mxu3 %vm447_vm0, %v1083_v57 }
 0x415   : > { %v1075_v11 = vpop.permute.xlu2 %1074 }
 0x416   : > { %4404 = vmatpush.xpose.msk.msrb.mxu3 %vm447_vm0, %v1081_v54 }
 0x419   : > { %1302 = vrot.lane.b32.xlu1 %v5227_v21, %s4909_s12 }
 0x41d   : > { %v1079_v13 = vpop.permute.xlu2 %1078 }
 0x423   : > { %v940_v60 = vpop.xlane.xlu0 %939 }
 0x424   : > { %4706 = vrcp.f32 %v940_v60 }
 0x42a   : > { %v4707_v4 = vpop.eup %4706 }
 0x42b   : > { %v960_v36 = vmul.f32 %v4707_v4, %v4697_v51 }
 0x42d   : > { %4394 = vmatmul.msk.f32.gmra.mxu3 %vm861_vm3, %v960_v36 }
 0x430   : > { %v943_v39 = vpop.xlane.xlu1 %942 }
 0x431   : > { %4708 = vrcp.f32 %v943_v39 }
 0x436   : > { %v1067_v8 = vpop.permute.xlu0 %1066 }
 0x437   : > { %v4709_v5 = vpop.eup %4708 }
 0x438   : > { %v961_v6 = vmul.f32 %v4709_v5, %v4699_v17 }
 0x43a   : > { %4395 = vmatmul.msk.f32.gmra.mxu3 %vm861_vm3, %v961_v6 }
 0x43e   : > { %v1073_v10 = vpop.permute.xlu0 %1072 }
 0x442   : > { %4405 = vmatmul.msk.f32.vlgmr.msrb.gmra.mxu3 %vm447_vm0, %v1063_v42 }
 0x446   : > { %v1077_v12 = vpop.permute.xlu0 %1076 }
 0x448   : > { %v1069_v21 = vpop.permute.xlu1 %1068 }
 0x44a   : > { %4406 = vmatmul.msk.f32.gmra.mxu3 %vm447_vm0, %v1065_v30 }
 0x44e   : > { %v4607_v7 = vpop.permute.xlu0 %4606 }
 0x44f   : > { %v4608_v48 = vunpack.i.l.bf16 %v4607_v7  ;;  %v4609_v43 = vunpack.i.h.bf16 %v4607_v7 }
 0x452   : > { %4407 = vmatmul.msk.f32.gmra.mxu3 %vm447_vm0, %v1067_v8 }
 0x456   : > { %v867_v1 = vpop.xlane.xlu2 %866 }
 0x45a   : > { %4408 = vmatmul.msk.f32.gmra.mxu3 %vm447_vm0, %v1069_v21 }
 0x45e   : > { %v870_v0 = vpop.xlane.xlu2 %869 }
 0x462   : > { %4409 = vmatmul.msk.f32.gmra.mxu3 %vm447_vm0, %v1071_v9 }
 0x46a   : > { %4410 = vmatmul.msk.f32.gmra.mxu3 %vm447_vm0, %v1073_v10 }
 0x472   : > { %4411 = vmatmul.msk.f32.gmra.mxu3 %vm447_vm0, %v1075_v11  ;;  %v5397_v28 = vpop.f32.mrf.mxu3 }
 0x473   : > { %v5394_v58 = vpop.xlane.xlu1 %863 }
 0x474   : > { %v890_v21 = vsub.f32 %v5371_v59, %v5394_v58 }
 0x476   : > { %v899_v11 = vmul.f32 1.442695, %v890_v21 }
 0x47a   : > { %4412 = vmatmul.msk.f32.gmra.mxu3 %vm447_vm0, %v1077_v12  ;;  %v5399_v29 = vpop.f32.mrf.mxu3 }
 0x482   : > { %4413 = vmatmul.msk.f32.gmra.mxu3 %vm447_vm0, %v1079_v13  ;;  %v5401_v31 = vpop.f32.mrf.mxu3 }
 0x48b   : > { %v1303_v14 = vpop.permute.xlu1 %1302 }
 0x48c   : > { %4414 = vmatpush.msk.msrb.mxu0 %vm1015_vm2, %v1303_v14  ;;  %v891_v14 = vsub.f32 %v5359_v19, %v867_v1 }
 0x48e   : > { %1349 = vmatpush.msrb.mxu0 %v4608_v48  ;;  %v901_v58 = vmul.f32 1.442695, %v891_v14 }
 0x490   : > { %1350 = vmatpush.msrb.mxu0 %v4609_v43 }
 0x4b0   : > { %v5403_v33 = vpop.f32.mrf.mxu3 }
 0x4bd   : > { %v5405_v20 = vpop.f32.mrf.mxu3 }
 0x4c5   : > { %v1151_v34 = vpop.f32.mrf.mxu3 }
 0x4c6   : > { %v1178_v37 = vmul.f32 0.35355338, %v1151_v34 }
 0x4c8   : > { %v1187_v38 = vsel %vm861_vm3, %v1178_v37, -inf }
 0x4c9   : > { %1188 = vmax.xlane.f32.xlu0 %v1187_v38 }
 0x4cd   : > { %v1154_v40 = vpop.f32.mrf.mxu3 }
 0x4ce   : > { %v1179_v41 = vmul.f32 0.35355338, %v1154_v40 }
 0x4d0   : > { %v1190_v45 = vsel %vm861_vm3, %v1179_v41, -inf }
 0x4d1   : > { %1191 = vmax.xlane.f32.xlu1 %v1190_v45 }
 0x4d5   : > { %v1157_v46 = vpop.f32.mrf.mxu3 }
 0x4d6   : > { %v5409_v47 = vmul.f32 0.35355338, %v1157_v46 }
 0x4d8   : > { %v1193_v50 = vsel %vm861_vm3, %v5409_v47, -inf }
 0x4d9   : > { %1194 = vmax.xlane.f32.xlu2 %v1193_v50 }
 0x4dd   : > { %v1160_v51 = vpop.f32.mrf.mxu3 }
 0x4de   : > { %v1181_v52 = vmul.f32 0.35355338, %v1160_v51 }
 0x4e0   : > { %v1196_v18 = vsel %vm861_vm3, %v1181_v52, -inf }
 0x4e1   : > { %1197 = vmax.xlane.f32.xlu0 %v1196_v18 }
 0x4e5   : > { %v1163_v17 = vpop.f32.mrf.mxu3 }
 0x4e6   : > { %v1182_v2 = vmul.f32 0.35355338, %v1163_v17 }
 0x4e8   : > { %v1199_v15 = vsel %vm861_vm3, %v1182_v2, -inf }
 0x4e9   : > { %1200 = vmax.xlane.f32.xlu2 %v1199_v15 }
 0x4ea   : > { %4616 = vrot.lane.b32.xlu1 %v5257_v26, %s4909_s12 }
 0x4ed   : > { %v1166_v61 = vpop.f32.mrf.mxu3 }
 0x4ee   : > { %v1183_v35 = vmul.f32 0.35355338, %v1166_v61 }
 0x4f0   : > { %v1202_v16 = vsel %vm861_vm3, %v1183_v35, -inf }
 0x4f1   : > { %1203 = vmax.xlane.f32.xlu0 %v1202_v16 }
 0x4f5   : > { %v1169_v49 = vpop.f32.mrf.mxu3 }
 0x4f6   : > { %v5418_v22 = vmul.f32 0.35355338, %v1169_v49 }
 0x4f8   : > { %v1205_v54 = vsel %vm861_vm3, %v5418_v22, -inf }
 0x4f9   : > { %1206 = vmax.xlane.f32.xlu2 %v1205_v54 }
 0x4fd   : > { %v1172_v27 = vpop.f32.mrf.mxu3 }
 0x4fe   : > { %v5422_v32 = vmul.f32 0.35355338, %v1172_v27 }
 0x500   : > { %v1208_v26 = vsel %vm861_vm3, %v5422_v32, -inf }
 0x505   : > { %v1175_v5 = vpop.f32.mrf.mxu3 }
 0x506   : > { %v5441_v6 = vmul.f32 0.35355338, %v1175_v5 }
 0x508   : > { %v1211_v10 = vsel %vm886_vm4, %v5441_v6, -inf }
 0x511   : > { %4611 = vrot.lane.b32.xlu2 %v5239_v23, %s4909_s12 }
 0x514   : > { %1209 = vmax.xlane.f32.xlu1 %v1208_v26 }
 0x53a   : > { %872 = vmax.xlane.f32.xlu2 %v871_v44 }
 0x53c   : > { %v1189_v56 = vpop.xlane.xlu0 %1188 }
 0x53d   : > { %v1214_v63 = vsub.f32 %v1178_v37, %v1189_v56 }
 0x53f   : > { %v1223_v62 = vmul.f32 1.442695, %v1214_v63 }
 0x541   : > { %4710 = vpow2.f32 %v1223_v62 }
 0x544   : > { %v1192_v3 = vpop.xlane.xlu1 %1191 }
 0x545   : > { %v1215_v57 = vsub.f32 %v1179_v41, %v1192_v3 }
 0x547   : > { %v5433_v60 = vpop.eup %4710  ;;  %v1225_v23 = vmul.f32 1.442695, %v1215_v57 }
 0x548   : > { %v1241_v4 = vsel %vm861_vm3, %v5433_v60, 0.0 }
 0x549   : > { %4712 = vpow2.f32 %v1225_v23  ;;  %1242 = vadd.xlane.f32.xlu0 %v1241_v4 }
 0x54c   : > { %v1195_v42 = vpop.xlane.xlu2 %1194 }
 0x54d   : > { %v1216_v61 = vsub.f32 %v5409_v47, %v1195_v42 }
 0x54f   : > { %v5437_v36 = vpop.eup %4712  ;;  %v1227_v26 = vmul.f32 1.442695, %v1216_v61 }
 0x550   : > { %v1244_v39 = vsel %vm861_vm3, %v5437_v36, 0.0 }
 0x551   : > { %1245 = vadd.xlane.f32.xlu1 %v1244_v39 }
 0x554   : > { %v1198_v30 = vpop.xlane.xlu0 %1197 }
 0x555   : > { %v1217_v8 = vsub.f32 %v1181_v52, %v1198_v30 }
 0x557   : > { %v1229_v9 = vmul.f32 1.442695, %v1217_v8 }
 0x559   : > { %4714 = vpow2.f32 %v1229_v9  ;;  %1212 = vmax.xlane.f32.xlu1 %v1211_v10 }
 0x55a   : > { %4716 = vpow2.f32 %v899_v11 }
 0x55c   : > { %v1201_v12 = vpop.xlane.xlu2 %1200  ;;  %v4617_v16 = vpop.permute.xlu1 %4616 }
 0x55d   : > { %v1218_v13 = vsub.f32 %v1182_v2, %v1201_v12  ;;  %4621 = vrot.lane.b32.xlu0 %v5249_v25, %s4909_s12  ;;  %v892_v25 = vsub.f32 %v5364_v53, %v870_v0  ;;  %v4618_v44 = vunpack.i.l.bf16 %v4617_v16  ;;  %v4619_v56 = vunpack.i.h.bf16 %v4617_v16 }
 0x55f   : > { %v5449_v7 = vpop.eup %4714  ;;  %v1231_v48 = vmul.f32 1.442695, %v1218_v13  ;;  %v903_v45 = vmul.f32 1.442695, %v892_v25 }
 0x560   : > { %v1250_v59 = vsel %vm861_vm3, %v5449_v7, 0.0  ;;  %v5454_v34 = vpop.eup %4716 }
 0x561   : > { %4718 = vpow2.f32 %v1231_v48  ;;  %1251 = vadd.xlane.f32.xlu2 %v1250_v59  ;;  %v917_v19 = vsel %vm861_vm3, %v5454_v34, 0.0 }
 0x562   : > { %4720 = vpow2.f32 %v901_v58 }
 0x564   : > { %v1204_v43 = vpop.xlane.xlu0 %1203 }
 0x565   : > { %v1219_v37 = vsub.f32 %v1183_v35, %v1204_v43 }
 0x567   : > { %v5456_v38 = vpop.eup %4718  ;;  %v1233_v40 = vmul.f32 1.442695, %v1219_v37 }
 0x568   : > { %v1253_v41 = vsel %vm861_vm3, %v5456_v38, 0.0  ;;  %v5463_v50 = vpop.eup %4720 }
 0x569   : > { %4722 = vpow2.f32 %v1233_v40  ;;  %918 = vadd.xlane.f32.xlu2 %v917_v19  ;;  %1254 = vadd.xlane.f32.xlu1 %v1253_v41  ;;  %v920_v18 = vsel %vm861_vm3, %v5463_v50, 0.0 }
 0x56a   : > { %4724 = vpow2.f32 %v903_v45 }
 0x56c   : > { %v1207_v46 = vpop.xlane.xlu2 %1206 }
 0x56d   : > { %v1220_v51 = vsub.f32 %v5418_v22, %v1207_v46 }
 0x56f   : > { %v5466_v52 = vpop.eup %4722  ;;  %v1235_v53 = vmul.f32 1.442695, %v1220_v51 }
 0x570   : > { %v1256_v17 = vsel %vm861_vm3, %v5466_v52, 0.0  ;;  %v5472_v15 = vpop.eup %4724 }
 0x571   : > { %4726 = vpow2.f32 %v1235_v53  ;;  %921 = vadd.xlane.f32.xlu2 %v920_v18  ;;  %1257 = vadd.xlane.f32.xlu1 %v1256_v17  ;;  %v923_v54 = vsel %vm861_vm3, %v5472_v15, 0.0 }
 0x572   : > { %4728 = vpow2.f32 %v1227_v26 }
 0x574   : > { %v4612_v2 = vpop.permute.xlu2 %4611 }
 0x575   : > { %v4613_v35 = vunpack.i.l.bf16 %v4612_v2  ;;  %v4614_v22 = vunpack.i.h.bf16 %v4612_v2 }
 0x577   : > { %v5475_v49 = vpop.eup %4726  ;;  %1351 = vmatpush.msrb.mxu0 %v4613_v35 }
 0x578   : > { %v1259_v27 = vsel %vm861_vm3, %v5475_v49, 0.0  ;;  %v4729_v47 = vpop.eup %4728 }
 0x579   : > { %924 = vadd.xlane.f32.xlu2 %v923_v54  ;;  %1352 = vmatpush.msrb.mxu0 %v4614_v22  ;;  %v1247_v63 = vsel %vm861_vm3, %v4729_v47, 0.0 }
 0x57a   : > { %1260 = vadd.xlane.f32.xlu1 %v1259_v27 }
 0x57b   : > { %1353 = vmatpush.msrb.mxu0 %v4618_v44 }
 0x57d   : > { %1354 = vmatpush.msrb.mxu0 %v4619_v56 }
 0x587   : > { %1248 = vadd.xlane.f32.xlu0 %v1247_v63  ;;  %v1210_v62 = vpop.xlane.xlu1 %1209 }
 0x588   : > { %v1221_v1 = vsub.f32 %v5422_v32, %v1210_v62 }
 0x58a   : > { %v1237_v3 = vmul.f32 1.442695, %v1221_v1 }
 0x58c   : > { %4730 = vpow2.f32 %v1237_v3 }
 0x592   : > { %v5483_v57 = vpop.eup %4730 }
 0x593   : > { %v1262_v23 = vsel %vm861_vm3, %v5483_v57, 0.0 }
 0x594   : > { %1263 = vadd.xlane.f32.xlu1 %v1262_v23 }
 0x5ad   : > { %v873_v4 = vpop.xlane.xlu2 %872 }
 0x5ae   : > { %v893_v0 = vsub.f32 %v5429_v55, %v873_v4  ;;  %v392_v4 = vld [vmem:[%s6856_s3 + $0x8] sm:$0xff] }
 0x5af   : > { %1472 = vmatpush.msrb.mxu2 %v392_v4 }
 0x5b0   : > { %v905_v39 = vmul.f32 1.442695, %v893_v0 }
 0x5b2   : > { %4732 = vpow2.f32 %v905_v39  ;;  %v391_v39 = vld [vmem:[%s6856_s3] sm:$0xff] }
 0x5b3   : > { %1473 = vmatpush.msrb.mxu2 %v391_v39  ;;  %v4887_v39 = vld [vmem:[%s4989_s22 + $0x10] sm:$0xff] }
 0x5b8   : > { %v5488_v5 = vpop.eup %4732 }
 0x5b9   : > { %v926_v42 = vsel %vm861_vm3, %v5488_v5, 0.0 }
 0x5ba   : > { %927 = vadd.xlane.f32.xlu2 %v926_v42 }
 0x5bc   : > { %v1243_v30 = vpop.xlane.xlu0 %1242 }
 0x5bd   : > { %4734 = vrcp.f32 %v1243_v30 }
 0x5c3   : > { %v4735_v11 = vpop.eup %4734 }
 0x5c4   : > { %v1246_v32 = vpop.xlane.xlu1 %1245  ;;  %v1277_v13 = vmul.f32 %v4735_v11, %v5433_v60 }
 0x5cc   : > { %v1213_v8 = vpop.xlane.xlu1 %1212 }
 0x5cd   : > { %v1222_v21 = vsub.f32 %v5441_v6, %v1213_v8 }
 0x5cf   : > { %v1239_v9 = vmul.f32 1.442695, %v1222_v21  ;;  %v4622_v10 = vpop.permute.xlu0 %4621 }
 0x5d0   : > { %v4623_v12 = vunpack.i.l.bf16 %v4622_v10  ;;  %v4624_v55 = vunpack.i.h.bf16 %v4622_v10 }
 0x5d1   : > { %4736 = vpow2.f32 %v1239_v9 }
 0x5d2   : > { %4738 = vrcp.f32 %v1246_v32  ;;  %1355 = vmatpush.msrb.mxu0 %v4623_v12 }
 0x5d4   : > { %v1252_v14 = vpop.xlane.xlu2 %1251  ;;  %1356 = vmatpush.msrb.mxu0 %v4624_v55 }
 0x5d5   : > { %4415 = vmatmul.msk.f32.vlgmr.msrb.gmra.mxu0 %vm861_vm3, %v1277_v13  ;;  %v4911_v13 = vmov 0  }
 0x5d6   : > { %4625 = vset.pattern.permute.xlu1 %v4911_v13  ;;  %4626 = vset.pattern.permute.xlu2 %v4911_v13 }
 0x5d7   : > { %v4737_v48 = vpop.eup %4736  ;;  %4667 = vset.pattern.permute.xlu0 %v4911_v13 }
 0x5d8   : > { %v4739_v59 = vpop.eup %4738  ;;  %v1265_v58 = vsel %vm886_vm4, %v4737_v48, 0.0 }
 0x5d9   : > { %1266 = vadd.xlane.f32.xlu1 %v1265_v58  ;;  %v1278_v6 = vmul.f32 %v4739_v59, %v5437_v36  ;;  %v395_v58 = vld [vmem:[%s6857_s4] sm:$0xff] }
 0x5dc   : > { %v919_v43 = vpop.xlane.xlu2 %918 }
 0x5dd   : > { %4740 = vrcp.f32 %v919_v43  ;;  %4416 = vmatmul.msk.f32.gmra.mxu0 %vm861_vm3, %v1278_v6  ;;  %v396_v6 = vld [vmem:[%s6857_s4 + $0x8] sm:$0xff] }
 0x5e3   : > { %v4741_v37 = vpop.eup %4740 }
 0x5e4   : > { %v922_v25 = vpop.xlane.xlu2 %921  ;;  %v953_v40 = vmul.f32 %v4741_v37, %v5454_v34  ;;  %v1255_v34 = vpop.xlane.xlu1 %1254 }
 0x5e5   : > { %4742 = vrcp.f32 %v922_v25 }
 0x5e6   : > { %4387 = vmatmul.msk.f32.vlgmr.msra.gmra.mxu2 %vm861_vm3, %v953_v40 }
 0x5eb   : > { %v4743_v60 = vpop.eup %4742 }
 0x5ec   : > { %v925_v19 = vpop.xlane.xlu2 %924  ;;  %v954_v41 = vmul.f32 %v4743_v60, %v5463_v50  ;;  %v1258_v17 = vpop.xlane.xlu1 %1257 }
 0x5ed   : > { %4744 = vrcp.f32 %v925_v19 }
 0x5ee   : > { %4388 = vmatmul.msk.f32.gmra.mxu2 %vm861_vm3, %v954_v41 }
 0x5f3   : > { %v4745_v45 = vpop.eup %4744 }
 0x5f4   : > { %v955_v36 = vmul.f32 %v4745_v45, %v5472_v15  ;;  %v1261_v61 = vpop.xlane.xlu1 %1260 }
 0x5f6   : > { %4389 = vmatmul.msk.f32.gmra.mxu2 %vm861_vm3, %v955_v36 }
 0x5fa   : > { %v1249_v46 = vpop.xlane.xlu0 %1248 }
 0x5fb   : > { %4746 = vrcp.f32 %v1249_v46 }
 0x5fc   : > { %4748 = vrcp.f32 %v1252_v14 }
 0x5fd   : > { %4750 = vrcp.f32 %v1255_v34 }
 0x5fe   : > { %4752 = vrcp.f32 %v1258_v17 }
 0x5ff   : > { %4754 = vrcp.f32 %v1261_v61 }
 0x601   : > { %v4747_v51 = vpop.eup %4746 }
 0x602   : > { %v1279_v53 = vmul.f32 %v4747_v51, %v4729_v47  ;;  %v4749_v18 = vpop.eup %4748 }
 0x603   : > { %v1280_v50 = vmul.f32 %v4749_v18, %v5449_v7  ;;  %v4751_v2 = vpop.eup %4750 }
 0x604   : > { %4417 = vmatmul.msk.f32.gmra.mxu0 %vm861_vm3, %v1279_v53  ;;  %v1281_v15 = vmul.f32 %v4751_v2, %v5456_v38  ;;  %v4753_v35 = vpop.eup %4752  ;;  %v4885_v53 = vld [vmem:[%s4989_s22] sm:$0xff] }
 0x605   : > { %v1282_v16 = vmul.f32 %v4753_v35, %v5466_v52  ;;  %v4755_v54 = vpop.eup %4754 }
 0x606   : > { %v1283_v7 = vmul.f32 %v4755_v54, %v5475_v49 }
 0x607   : > { %v1264_v22 = vpop.xlane.xlu1 %1263 }
 0x608   : > { %4756 = vrcp.f32 %v1264_v22 }
 0x60c   : > { %4418 = vmatmul.msk.f32.gmra.mxu0 %vm861_vm3, %v1280_v50  ;;  %v4886_v50 = vld [vmem:[%s4989_s22 + $0x8] sm:$0xff] }
 0x60e   : > { %v4757_v27 = vpop.eup %4756 }
 0x60f   : > { %v1284_v26 = vmul.f32 %v4757_v27, %v5483_v57 }
 0x614   : > { %4419 = vmatmul.msk.f32.gmra.mxu0 %vm861_vm3, %v1281_v15 }
 0x61c   : > { %4420 = vmatmul.msk.f32.gmra.mxu0 %vm861_vm3, %v1282_v16 }
 0x624   : > { %4421 = vmatmul.msk.f32.gmra.mxu0 %vm861_vm3, %v1283_v7 }
 0x62c   : > { %4422 = vmatmul.msk.f32.gmra.mxu0 %vm861_vm3, %v1284_v26 }
 0x62d   : > { %v928_v38 = vpop.xlane.xlu2 %927 }
 0x62e   : > { %4758 = vrcp.f32 %v928_v38 }
 0x634   : > { %v4759_v44 = vpop.eup %4758 }
 0x635   : > { %v956_v56 = vmul.f32 %v4759_v44, %v5488_v5 }
 0x637   : > { %4390 = vmatmul.msk.f32.gmra.mxu2 %vm861_vm3, %v956_v56 }
 0x64c   : > { %v1267_v52 = vpop.xlane.xlu1 %1266 }
 0x64d   : > { %4760 = vrcp.f32 %v1267_v52 }
 0x652   : > { %v1358_v47 = vpop.f32.mrf.mxu0 }
 0x653   : > { %v4761_v63 = vpop.eup %4760  ;;  %1394 = vrot.lane.b32.xlu0 %v1358_v47, %s4910_s13 }
 0x654   : > { %v1285_v49 = vmul.f32 %v4761_v63, %v4737_v48 }
 0x656   : > { %4423 = vmatmul.msk.f32.gmra.mxu0 %vm861_vm3, %v1285_v49 }
 0x65a   : > { %v1361_v62 = vpop.f32.mrf.mxu0 }
 0x65b   : > { %1396 = vrot.lane.b32.xlu2 %v1361_v62, %s4910_s13  ;;  %v402_v62 = vld [vmem:[%s6860_s7] sm:$0xff] }
 0x65c   : > { %1852 = vmatpush.msra.mxu1 %v402_v62 }
 0x669   : > { %v1035_v42 = vpop.f32.mrf.mxu2 }
 0x671   : > { %v1038_v21 = vpop.f32.mrf.mxu2 }
 0x679   : > { %v1041_v11 = vpop.f32.mrf.mxu2 }
 0x681   : > { %v1364_v1 = vpop.f32.mrf.mxu0 }
 0x682   : > { %1398 = vrot.lane.b32.xlu1 %v1364_v1, %s4910_s13 }
 0x689   : > { %v1367_v3 = vpop.f32.mrf.mxu0 }
 0x68a   : > { %1400 = vrot.lane.b32.xlu0 %v1367_v3, %s4910_s13 }
 0x691   : > { %v1370_v57 = vpop.f32.mrf.mxu0 }
 0x692   : > { %1402 = vrot.lane.b32.xlu2 %v1370_v57, %s4910_s13 }
 0x699   : > { %v1373_v23 = vpop.f32.mrf.mxu0 }
 0x69a   : > { %1404 = vrot.lane.b32.xlu0 %v1373_v23, %s4910_s13 }
 0x6a1   : > { %v1376_v0 = vpop.f32.mrf.mxu0 }
 0x6a2   : > { %1406 = vrot.lane.b32.xlu1 %v1376_v0, %s4910_s13 }
 0x6a9   : > { %v1379_v5 = vpop.f32.mrf.mxu0 }
 0x6aa   : > { %1408 = vrot.lane.b32.xlu2 %v1379_v5, %s4910_s13  ;;  %1788 = vperm.xlu1 %4625, %v395_v58  }
 0x6b2   : > { %1801 = vperm.xlu2 %4626, %v396_v6  }
 0x6b5   : > { %v1397_v8 = vpop.permute.xlu2 %1396 }
 0x6b6   : > { %v1422_v9 = vsel %vm447_vm0, %v1038_v21, %v1397_v8 }
 0x6ba   : > { %v1044_v14 = vpop.f32.mrf.mxu2 }
 0x6c5   : > { %v1395_v32 = vpop.permute.xlu0 %1394 }
 0x6c6   : > { %v1421_v30 = vsel %vm447_vm0, %v1035_v42, %v1395_v32 }
 0x6c7   : > { %4424 = vmatmul.msk.f32.vlgmr.msrb.gmra.mxu2 %vm416_vm5, %v1421_v30 }
 0x6cf   : > { %4425 = vmatmul.msk.f32.gmra.mxu2 %vm416_vm5, %v1422_v9 }
 0x6d3   : > { %v1382_v10 = vpop.f32.mrf.mxu0 }
 0x6d4   : > { %1410 = vrot.lane.b32.xlu0 %v1382_v10, %s4910_s13 }
 0x6ec   : > { %v1403_v43 = vpop.permute.xlu2 %1402 }
 0x6ed   : > { %v1425_v37 = vsel %vm447_vm0, %v5397_v28, %v1403_v43 }
 0x6f4   : > { %v1399_v12 = vpop.permute.xlu1 %1398 }
 0x6f5   : > { %v1423_v55 = vsel %vm447_vm0, %v1041_v11, %v1399_v12  ;;  %v4888_v12 = vld [vmem:[%s4989_s22 + $0x18] sm:$0xff] }
 0x6f6   : > { %4426 = vmatmul.msk.f32.gmra.mxu2 %vm416_vm5, %v1423_v55 }
 0x6fc   : > { %v1401_v48 = vpop.permute.xlu0 %1400 }
 0x6fd   : > { %v1424_v59 = vsel %vm447_vm0, %v1044_v14, %v1401_v48 }
 0x6fe   : > { %4427 = vmatmul.msk.f32.gmra.mxu2 %vm416_vm5, %v1424_v59 }
 0x704   : > { %v1409_v41 = vpop.permute.xlu2 %1408 }
 0x705   : > { %v1428_v28 = vsel %vm447_vm0, %v5403_v33, %v1409_v41 }
 0x706   : > { %4428 = vmatmul.msk.f32.gmra.mxu2 %vm416_vm5, %v1425_v37 }
 0x70c   : > { %v1405_v25 = vpop.permute.xlu0 %1404 }
 0x70d   : > { %v1426_v40 = vsel %vm447_vm0, %v5399_v29, %v1405_v25 }
 0x70e   : > { %4429 = vmatmul.msk.f32.gmra.mxu2 %vm416_vm5, %v1426_v40 }
 0x714   : > { %v1407_v60 = vpop.permute.xlu1 %1406 }
 0x715   : > { %v1427_v19 = vsel %vm447_vm0, %v5401_v31, %v1407_v60  ;;  %v4884_v31 = vld [vmem:[%s6854_s1] sm:$0x7] }
 0x716   : > { %4430 = vmatmul.msk.f32.gmra.mxu2 %vm416_vm5, %v1427_v19  ;;  %v5565_v46 = vperm.slane %v4884_v31, 2 }
 0x71e   : > { %4431 = vmatmul.msk.f32.gmra.mxu2 %vm416_vm5, %v1428_v28 }
 0x746   : > { %v1411_v45 = vpop.permute.xlu0 %1410 }
 0x747   : > { %v1429_v29 = vsel %vm447_vm0, %v5405_v20, %v1411_v45  ;;  %v4889_v45 = vld [vmem:[%s4989_s22 + $0x20] sm:$0xff] }
 0x748   : > { %4432 = vmatmul.msk.f32.gmra.mxu2 %vm416_vm5, %v1429_v29 }
 0x74a   : > { %v1475_v36 = vpop.f32.mrf.mxu2 }
 0x74b   : > { %v1476_v51 = vadd.f32 %v1475_v36, %v5565_v46 }
 0x74d   : > { %v5569_v33 = vadd.f32 %v4885_v53, %v1476_v51 }
 0x74f   : > { %v1521_v20 = vrot.slane %v5569_v33, 1 }
 0x752   : > { %v1478_v34 = vpop.f32.mrf.mxu2 }
 0x753   : > { %v1479_v18 = vadd.f32 %v1478_v34, %v5565_v46 }
 0x755   : > { %v1503_v17 = vadd.f32 %v4886_v50, %v1479_v18  ;;  %v5603_v50 = vpop.permute.xlu1 %1788 }
 0x757   : > { %v1522_v2 = vrot.slane %v1503_v17, 1 }
 0x759   : > { %v5575_v15 = vsel %vm1520_vm6, %v1521_v20, %v1522_v2 }
 0x75a   : > { %v1546_v61 = vsel %vm447_vm0, %v5575_v15, 0.0 }
 0x75b   : > { %v1547_v35 = vrot.slane %v1546_v61, 4 }
 0x75d   : > { %v1548_v16 = vadd.f32 %v1547_v35, %v1546_v61 }
 0x75f   : > { %v1549_v22 = vrot.slane %v1548_v16, 2 }
 0x761   : > { %v1550_v54 = vadd.f32 %v1549_v22, %v1548_v16  ;;  %v5613_v22 = vpop.permute.xlu2 %1801 }
 0x763   : > { %v1551_v7 = vrot.slane %v1550_v54, 1 }
 0x765   : > { %v1552_v27 = vadd.f32 %v1551_v7, %v1550_v54 }
 0x767   : > { %v1602_v26 = vmul.f32 %v1552_v27, %v5009_v24 }
 0x769   : > { %v1610_v38 = vsub.f32 %v5575_v15, %v1602_v26 }
 0x76b   : > { %v1618_v44 = vmul.f32 %v1610_v38, %v1610_v38 }
 0x76d   : > { %v1626_v56 = vsel %vm447_vm0, %v1618_v44, 0.0 }
 0x76e   : > { %v1627_v52 = vrot.slane %v1626_v56, 4 }
 0x770   : > { %v1628_v47 = vadd.f32 %v1627_v52, %v1626_v56  ;;  %v4890_v56 = vld [vmem:[%s4989_s22 + $0x28] sm:$0xff] }
 0x772   : > { %v1629_v63 = vrot.slane %v1628_v47, 2 }
 0x774   : > { %v1630_v49 = vadd.f32 %v1629_v63, %v1628_v47 }
 0x776   : > { %v1631_v1 = vrot.slane %v1630_v49, 1 }
 0x778   : > { %v1632_v3 = vadd.f32 %v1631_v1, %v1630_v49 }
 0x779   : > { %v1481_v57 = vpop.f32.mrf.mxu2 }
 0x77a   : > { %v1682_v23 = vmul.f32 %v1632_v3, %v5009_v24  ;;  %v1482_v4 = vadd.f32 %v1481_v57, %v5565_v46 }
 0x77c   : > { %v1690_v0 = vadd.f32 1e-05, %v1682_v23  ;;  %v1504_v5 = vadd.f32 %v4887_v39, %v1482_v4 }
 0x77e   : > { %4762 = vrsqrt.f32 %v1690_v0  ;;  %v1524_v42 = vrot.slane %v1504_v5, 1  ;;  %vm1704_vm8 = vweird.f32 %v1690_v0 }
 0x780   : > { %v5589_v32 = vsel %vm1520_vm6, %v1522_v2, %v1524_v42 }
 0x781   : > { %v1553_v30 = vsel %vm447_vm0, %v5589_v32, 0.0  ;;  %v1484_v8 = vpop.f32.mrf.mxu2 }
 0x782   : > { %v1554_v21 = vrot.slane %v1553_v30, 4  ;;  %v1485_v9 = vadd.f32 %v1484_v8, %v5565_v46 }
 0x784   : > { %v4763_v10 = vpop.eup %4762  ;;  %v1555_v11 = vadd.f32 %v1554_v21, %v1553_v30  ;;  %v1505_v55 = vadd.f32 %v4888_v12, %v1485_v9 }
 0x785   : > { %v1699_v13 = vmul.f32 %v4763_v10, %v1690_v0  ;;  %vm1705_vm7 = vweird.f32 %v4763_v10 }
 0x786   : > { %v1556_v14 = vrot.slane %v1555_v11, 2  ;;  %v1526_v48 = vrot.slane %v1505_v55, 1  ;;  %vm1706_vm9 = vmor %vm1704_vm8, %vm1705_vm7  ;;  %v4891_v55 = vld [vmem:[%s4989_s22 + $0x30] sm:$0xff] }
 0x787   : > { %v1700_v59 = vmul.f32 %v4763_v10, %v1699_v13 }
 0x788   : > { %v1557_v58 = vadd.f32 %v1556_v14, %v1555_v11  ;;  %v5596_v6 = vsel %vm1520_vm6, %v1524_v42, %v1526_v48 }
 0x789   : > { %v1701_v43 = vmul.f32 0.5, %v1700_v59  ;;  %v1560_v37 = vsel %vm447_vm0, %v5596_v6, 0.0  ;;  %v1487_v25 = vpop.f32.mrf.mxu2 }
 0x78a   : > { %v1561_v40 = vrot.slane %v1560_v37, 4  ;;  %v1488_v60 = vadd.f32 %v1487_v25, %v5565_v46  ;;  %v1558_v19 = vrot.slane %v1557_v58, 1 }
 0x78b   : > { %v1702_v41 = vsub.f32 1.5, %v1701_v43 }
 0x78c   : > { %v1562_v28 = vadd.f32 %v1561_v40, %v1560_v37  ;;  %v1506_v29 = vadd.f32 %v4889_v45, %v1488_v60  ;;  %v1559_v36 = vadd.f32 %v1558_v19, %v1557_v58 }
 0x78d   : > { %v1703_v31 = vmul.f32 %v4763_v10, %v1702_v41 }
 0x78e   : > { %v1563_v51 = vrot.slane %v1562_v28, 2  ;;  %v1528_v34 = vrot.slane %v1506_v29, 1  ;;  %v1603_v53 = vmul.f32 %v1559_v36, %v5009_v24 }
 0x78f   : > { %v1707_v18 = vsel %vm1706_vm9, %v4763_v10, %v1703_v31 }
 0x790   : > { %v1778_v17 = vmul.f32 %v1707_v18, %v1610_v38  ;;  %v1564_v20 = vadd.f32 %v1563_v51, %v1562_v28  ;;  %v5606_v2 = vsel %vm1520_vm6, %v1526_v48, %v1528_v34  ;;  %v5609_v61 = vsub.f32 %v5589_v32, %v1603_v53 }
 0x791   : > { %v1567_v35 = vsel %vm447_vm0, %v5606_v2, 0.0  ;;  %v1490_v16 = vpop.f32.mrf.mxu2 }
 0x792   : > { %v1568_v54 = vrot.slane %v1567_v35, 4  ;;  %v1491_v7 = vadd.f32 %v1490_v16, %v5565_v46  ;;  %v1791_v27 = vmul.f32 %v5603_v50, %v1778_v17  ;;  %v1619_v26 = vmul.f32 %v5609_v61, %v5609_v61 }
 0x793   : > { %v1565_v38 = vrot.slane %v1564_v20, 1 }
 0x794   : > { %v1569_v44 = vadd.f32 %v1568_v54, %v1567_v35  ;;  %v1507_v52 = vadd.f32 %v4890_v56, %v1491_v7  ;;  %v1804_v47 = vadd.f32 %v5613_v22, %v1791_v27  ;;  %v1633_v63 = vsel %vm447_vm0, %v1619_v26, 0.0  ;;  %v4892_v35 = vld [vmem:[%s4989_s22 + $0x38] sm:$0xff] }
 0x795   : > { %v1634_v49 = vrot.slane %v1633_v63, 4  ;;  %v1566_v62 = vadd.f32 %v1565_v38, %v1564_v20 }
 0x796   : > { %v1570_v1 = vrot.slane %v1569_v44, 2  ;;  %v1530_v3 = vrot.slane %v1507_v52, 1  ;;  %4433 = vmatmul.msk.f32.vlgmr.msra.gmra.mxu1 %vm447_vm0, %v1804_v47 }
 0x797   : > { %v1635_v57 = vadd.f32 %v1634_v49, %v1633_v63  ;;  %v1604_v23 = vmul.f32 %v1566_v62, %v5009_v24 }
 0x798   : > { %v1571_v4 = vadd.f32 %v1570_v1, %v1569_v44  ;;  %v5625_v0 = vsel %vm1520_vm6, %v1528_v34, %v1530_v3 }
 0x799   : > { %v1574_v39 = vsel %vm447_vm0, %v5625_v0, 0.0  ;;  %v1493_v5 = vpop.f32.mrf.mxu2  ;;  %v1636_v42 = vrot.slane %v1635_v57, 2  ;;  %v5630_v30 = vsub.f32 %v5596_v6, %v1604_v23 }
 0x79a   : > { %v1575_v8 = vrot.slane %v1574_v39, 4  ;;  %v1494_v21 = vadd.f32 %v1493_v5, %v5565_v46  ;;  %v1572_v9 = vrot.slane %v1571_v4, 1 }
 0x79b   : > { %v1637_v10 = vadd.f32 %v1636_v42, %v1635_v57  ;;  %v1620_v11 = vmul.f32 %v5630_v30, %v5630_v30 }
 0x79c   : > { %v1576_v12 = vadd.f32 %v1575_v8, %v1574_v39  ;;  %v1508_v13 = vadd.f32 %v4891_v55, %v1494_v21  ;;  %v1573_v14 = vadd.f32 %v1572_v9, %v1571_v4 }
 0x79d   : > { %v1638_v48 = vrot.slane %v1637_v10, 1  ;;  %v1640_v59 = vsel %vm447_vm0, %v1620_v11, 0.0 }
 0x79e   : > { %v1577_v58 = vrot.slane %v1576_v12, 2  ;;  %v1532_v43 = vrot.slane %v1508_v13, 1  ;;  %v1641_v37 = vrot.slane %v1640_v59, 4  ;;  %v1605_v25 = vmul.f32 %v1573_v14, %v5009_v24 }
 0x79f   : > { %v1639_v40 = vadd.f32 %v1638_v48, %v1637_v10 }
 0x7a0   : > { %v1578_v60 = vadd.f32 %v1577_v58, %v1576_v12  ;;  %v5639_v19 = vsel %vm1520_vm6, %v1530_v3, %v1532_v43  ;;  %v1642_v41 = vadd.f32 %v1641_v37, %v1640_v59  ;;  %v5642_v28 = vsub.f32 %v5606_v2, %v1605_v25 }
 0x7a1   : > { %v1581_v45 = vsel %vm447_vm0, %v5639_v19, 0.0  ;;  %v1496_v29 = vpop.f32.mrf.mxu2  ;;  %v1683_v36 = vmul.f32 %v1639_v40, %v5009_v24 }
 0x7a2   : > { %v1582_v31 = vrot.slane %v1581_v45, 4  ;;  %v1497_v51 = vadd.f32 %v1496_v29, %v5565_v46  ;;  %v1643_v34 = vrot.slane %v1642_v41, 2  ;;  %v1621_v53 = vmul.f32 %v5642_v28, %v5642_v28 }
 0x7a3   : > { %v1691_v18 = vadd.f32 1e-05, %v1683_v36  ;;  %v1579_v17 = vrot.slane %v1578_v60, 1 }
 0x7a4   : > { %v1583_v20 = vadd.f32 %v1582_v31, %v1581_v45  ;;  %v5651_v16 = vadd.f32 %v4892_v35, %v1497_v51  ;;  %v1644_v54 = vadd.f32 %v1643_v34, %v1642_v41  ;;  %v1647_v7 = vsel %vm447_vm0, %v1621_v53, 0.0 }
 0x7a5   : > { %4764 = vrsqrt.f32 %v1691_v18  ;;  %v1648_v27 = vrot.slane %v1647_v7, 4  ;;  %v1580_v26 = vadd.f32 %v1579_v17, %v1578_v60  ;;  %vm1714_vm11 = vweird.f32 %v1691_v18 }
 0x7a6   : > { %v1584_v38 = vrot.slane %v1583_v20, 2  ;;  %v1534_v44 = vrot.slane %v5651_v16, 1  ;;  %v1645_v56 = vrot.slane %v1644_v54, 1 }
 0x7a7   : > { %v1649_v52 = vadd.f32 %v1648_v27, %v1647_v7  ;;  %v1606_v47 = vmul.f32 %v1580_v26, %v5009_v24 }
 0x7a8   : > { %v1585_v63 = vadd.f32 %v1584_v38, %v1583_v20  ;;  %v5659_v49 = vsel %vm1520_vm6, %v1532_v43, %v1534_v44  ;;  %v1646_v62 = vadd.f32 %v1645_v56, %v1644_v54 }
 0x7a9   : > { %v1588_v1 = vsel %vm447_vm0, %v5659_v49, 0.0  ;;  %v1650_v3 = vrot.slane %v1649_v52, 2  ;;  %v5664_v57 = vsub.f32 %v5625_v0, %v1606_v47 }
 0x7aa   : > { %v1589_v23 = vrot.slane %v1588_v1, 4  ;;  %v1684_v4 = vmul.f32 %v1646_v62, %v5009_v24  ;;  %v1586_v39 = vrot.slane %v1585_v63, 1 }
 0x7ab   : > { %v4765_v5 = vpop.eup %4764  ;;  %v1651_v42 = vadd.f32 %v1650_v3, %v1649_v52  ;;  %v1622_v8 = vmul.f32 %v5664_v57, %v5664_v57 }
 0x7ac   : > { %v1590_v21 = vadd.f32 %v1589_v23, %v1588_v1  ;;  %v1709_v9 = vmul.f32 %v4765_v5, %v1691_v18  ;;  %v1692_v10 = vadd.f32 1e-05, %v1684_v4  ;;  %v1587_v55 = vadd.f32 %v1586_v39, %v1585_v63 }
 0x7ad   : > { %v1652_v11 = vrot.slane %v1651_v42, 1  ;;  %v1654_v12 = vsel %vm447_vm0, %v1622_v8, 0.0  ;;  %vm1715_vm10 = vweird.f32 %v4765_v5 }
 0x7ae   : > { %v1591_v13 = vrot.slane %v1590_v21, 2  ;;  %v1710_v14 = vmul.f32 %v4765_v5, %v1709_v9  ;;  %4766 = vrsqrt.f32 %v1692_v10  ;;  %v1655_v59 = vrot.slane %v1654_v12, 4  ;;  %vm1716_vm12 = vmor %vm1714_vm11, %vm1715_vm10 }
 0x7af   : > { %v1653_v48 = vadd.f32 %v1652_v11, %v1651_v42  ;;  %v1607_v58 = vmul.f32 %v1587_v55, %v5009_v24  ;;  %vm1724_vm14 = vweird.f32 %v1692_v10 }
 0x7b0   : > { %v1592_v43 = vadd.f32 %v1591_v13, %v1590_v21  ;;  %v1711_v37 = vmul.f32 0.5, %v1710_v14  ;;  %v1656_v40 = vadd.f32 %v1655_v59, %v1654_v12 }
 0x7b1   : > { %v1685_v25 = vmul.f32 %v1653_v48, %v5009_v24  ;;  %v5673_v60 = vsub.f32 %v5639_v19, %v1607_v58 }
 0x7b2   : > { %v1712_v41 = vsub.f32 1.5, %v1711_v37  ;;  %v1593_v45 = vrot.slane %v1592_v43, 1  ;;  %v1657_v36 = vrot.slane %v1656_v40, 2 }
 0x7b3   : > { %v1693_v29 = vadd.f32 1e-05, %v1685_v25  ;;  %v1623_v31 = vmul.f32 %v5673_v60, %v5673_v60 }
 0x7b4   : > { %v4767_v51 = vpop.eup %4766  ;;  %v1713_v34 = vmul.f32 %v4765_v5, %v1712_v41  ;;  %v1594_v53 = vadd.f32 %v1593_v45, %v1592_v43  ;;  %v1658_v35 = vadd.f32 %v1657_v36, %v1656_v40 }
 0x7b5   : > { %v1719_v17 = vmul.f32 %v4767_v51, %v1692_v10  ;;  %4768 = vrsqrt.f32 %v1693_v29  ;;  %v1661_v54 = vsel %vm447_vm0, %v1623_v31, 0.0  ;;  %vm1725_vm13 = vweird.f32 %v4767_v51 }
 0x7b6   : > { %v1717_v20 = vsel %vm1716_vm12, %v4765_v5, %v1713_v34  ;;  %v1608_v7 = vmul.f32 %v1594_v53, %v5009_v24  ;;  %v1662_v38 = vrot.slane %v1661_v54, 4  ;;  %v1659_v56 = vrot.slane %v1658_v35, 1  ;;  %vm1726_vm15 = vmor %vm1724_vm14, %vm1725_vm13 }
 0x7b7   : > { %v1779_v27 = vmul.f32 %v1717_v20, %v5609_v61  ;;  %v1720_v26 = vmul.f32 %v4767_v51, %v1719_v17  ;;  %vm1734_vm8 = vweird.f32 %v1693_v29 }
 0x7b8   : > { %v5681_v52 = vsub.f32 %v5659_v49, %v1608_v7  ;;  %v1663_v63 = vadd.f32 %v1662_v38, %v1661_v54  ;;  %v1660_v62 = vadd.f32 %v1659_v56, %v1658_v35 }
 0x7b9   : > { %v1792_v18 = vmul.f32 %v5603_v50, %v1779_v27  ;;  %v1721_v47 = vmul.f32 0.5, %v1720_v26 }
 0x7ba   : > { %v1624_v1 = vmul.f32 %v5681_v52, %v5681_v52  ;;  %v1664_v61 = vrot.slane %v1663_v63, 2  ;;  %v1686_v5 = vmul.f32 %v1660_v62, %v5009_v24 }
 0x7bb   : > { %v4769_v3 = vpop.eup %4768  ;;  %v1805_v23 = vadd.f32 %v5613_v22, %v1792_v18  ;;  %v1722_v4 = vsub.f32 1.5, %v1721_v47  ;;  %v4893_v47 = vld [vmem:[%s4989_s22 + $0x40] sm:$0x1] }
 0x7bc   : > { %v1729_v39 = vmul.f32 %v4769_v3, %v1693_v29  ;;  %v1668_v42 = vsel %vm447_vm0, %v1624_v1, 0.0  ;;  %v1665_v21 = vadd.f32 %v1664_v61, %v1663_v63  ;;  %v1694_v12 = vadd.f32 1e-05, %v1686_v5 }
 0x7bd   : > { %4434 = vmatmul.msk.f32.gmra.mxu1 %vm447_vm0, %v1805_v23  ;;  %v1723_v8 = vmul.f32 %v4767_v51, %v1722_v4  ;;  %v1669_v9 = vrot.slane %v1668_v42, 4  ;;  %vm1735_vm7 = vweird.f32 %v4769_v3 }
 0x7be   : > { %v1730_v11 = vmul.f32 %v4769_v3, %v1729_v39  ;;  %v1666_v13 = vrot.slane %v1665_v21, 1  ;;  %4770 = vrsqrt.f32 %v1694_v12  ;;  %vm1736_vm9 = vmor %vm1734_vm8, %vm1735_vm7  ;;  %vm1744_vm11 = vweird.f32 %v1694_v12 }
 0x7bf   : > { %v1727_v55 = vsel %vm1726_vm15, %v4767_v51, %v1723_v8  ;;  %v1670_v14 = vadd.f32 %v1669_v9, %v1668_v42 }
 0x7c0   : > { %v1780_v48 = vmul.f32 %v1727_v55, %v5630_v30  ;;  %v1731_v59 = vmul.f32 0.5, %v1730_v11  ;;  %v1667_v58 = vadd.f32 %v1666_v13, %v1665_v21 }
 0x7c1   : > { %v1671_v43 = vrot.slane %v1670_v14, 2 }
 0x7c2   : > { %v1793_v37 = vmul.f32 %v5603_v50, %v1780_v48  ;;  %v1732_v25 = vsub.f32 1.5, %v1731_v59  ;;  %v1687_v10 = vmul.f32 %v1667_v58, %v5009_v24 }
 0x7c3   : > { %v1672_v40 = vadd.f32 %v1671_v43, %v1670_v14 }
 0x7c4   : > { %v1806_v41 = vadd.f32 %v5613_v22, %v1793_v37  ;;  %v1733_v45 = vmul.f32 %v4769_v3, %v1732_v25  ;;  %v1695_v36 = vadd.f32 1e-05, %v1687_v10  ;;  %v4771_v51 = vpop.eup %4770 }
 0x7c5   : > { %v1673_v31 = vrot.slane %v1672_v40, 1  ;;  %v1739_v53 = vmul.f32 %v4771_v51, %v1694_v12  ;;  %vm1745_vm10 = vweird.f32 %v4771_v51 }
 0x7c6   : > { %4435 = vmatmul.msk.f32.gmra.mxu1 %vm447_vm0, %v1806_v41  ;;  %v1737_v30 = vsel %vm1736_vm9, %v4769_v3, %v1733_v45  ;;  %4772 = vrsqrt.f32 %v1695_v36  ;;  %vm1746_vm12 = vmor %vm1744_vm11, %vm1745_vm10  ;;  %vm1754_vm14 = vweird.f32 %v1695_v36  ;;  %vm418_vm10 = vcmask 123904  }
 0x7c7   : > { %v1781_v34 = vmul.f32 %v1737_v30, %v5642_v28  ;;  %v1674_v17 = vadd.f32 %v1673_v31, %v1672_v40  ;;  %v1740_v35 = vmul.f32 %v4771_v51, %v1739_v53 }
 0x7c9   : > { %v1794_v20 = vmul.f32 %v5603_v50, %v1781_v34  ;;  %v1688_v54 = vmul.f32 %v1674_v17, %v5009_v24  ;;  %v1741_v27 = vmul.f32 0.5, %v1740_v35 }
 0x7cb   : > { %v1499_v7 = vpop.f32.mrf.mxu2  ;;  %v1807_v29 = vadd.f32 %v5613_v22, %v1794_v20  ;;  %v1696_v38 = vadd.f32 1e-05, %v1688_v54  ;;  %v1742_v18 = vsub.f32 1.5, %v1741_v27 }
 0x7cc   : > { %v1500_v26 = vadd.f32 %v1499_v7, %v5565_v46  ;;  %v4773_v56 = vpop.eup %4772 }
 0x7cd   : > { %v1749_v63 = vmul.f32 %v4773_v56, %v1695_v36  ;;  %4774 = vrsqrt.f32 %v1696_v38  ;;  %v1743_v62 = vmul.f32 %v4771_v51, %v1742_v18  ;;  %vm1755_vm13 = vweird.f32 %v4773_v56 }
 0x7ce   : > { %v1510_v28 = vadd.f32 %v4893_v47, %v1500_v26  ;;  %4436 = vmatmul.msk.f32.gmra.mxu1 %vm447_vm0, %v1807_v29  ;;  %vm1756_vm15 = vmor %vm1754_vm14, %vm1755_vm13  ;;  %vm1764_vm8 = vweird.f32 %v1696_v38 }
 0x7cf   : > { %v1750_v3 = vmul.f32 %v4773_v56, %v1749_v63  ;;  %v1747_v23 = vsel %vm1746_vm12, %v4771_v51, %v1743_v62 }
 0x7d0   : > { %v1536_v1 = vrot.slane %v1510_v28, 1  ;;  %v1782_v4 = vmul.f32 %v1747_v23, %v5664_v57  ;;  %v5753_v23 = vld [vmem:[%s6858_s5] sm:$0x7] }
 0x7d1   : > { %v1751_v61 = vmul.f32 0.5, %v1750_v3 }
 0x7d2   : > { %v5705_v46 = vsel %vm1520_vm6, %v1534_v44, %v1536_v1  ;;  %v1795_v8 = vmul.f32 %v5603_v50, %v1782_v4  ;;  %v5757_v4 = vperm.slane %v5753_v23, 0 }
 0x7d3   : > { %v1595_v39 = vsel %vm447_vm0, %v5705_v46, 0.0  ;;  %v4775_v5 = vpop.eup %4774  ;;  %v1752_v21 = vsub.f32 1.5, %v1751_v61 }
 0x7d4   : > { %v1596_v42 = vrot.slane %v1595_v39, 4  ;;  %v1759_v9 = vmul.f32 %v4775_v5, %v1696_v38  ;;  %v1808_v12 = vadd.f32 %v5613_v22, %v1795_v8  ;;  %vm1765_vm7 = vweird.f32 %v4775_v5 }
 0x7d5   : > { %v1753_v16 = vmul.f32 %v4773_v56, %v1752_v21  ;;  %vm1766_vm9 = vmor %vm1764_vm8, %vm1765_vm7 }
 0x7d6   : > { %v1597_v11 = vadd.f32 %v1596_v42, %v1595_v39  ;;  %v1760_v44 = vmul.f32 %v4775_v5, %v1759_v9  ;;  %4437 = vmatmul.msk.f32.gmra.mxu1 %vm447_vm0, %v1808_v12 }
 0x7d7   : > { %v1757_v57 = vsel %vm1756_vm15, %v4773_v56, %v1753_v16  ;;  %v409_v56 = vld [vmem:[%s6862_s9 + $0x8] sm:$0xff] }
 0x7d8   : > { %v1598_v55 = vrot.slane %v1597_v11, 2  ;;  %v1783_v13 = vmul.f32 %v1757_v57, %v5673_v60  ;;  %v1761_v14 = vmul.f32 0.5, %v1760_v44  ;;  %2201 = vmatpush.msra.mxu3 %v409_v56 }
 0x7da   : > { %v1599_v48 = vadd.f32 %v1598_v55, %v1597_v11  ;;  %v1796_v59 = vmul.f32 %v5603_v50, %v1783_v13  ;;  %v1762_v58 = vsub.f32 1.5, %v1761_v14  ;;  %v408_v55 = vld [vmem:[%s6862_s9] sm:$0xff] }
 0x7db   : > { %2202 = vmatpush.msra.mxu3 %v408_v55 }
 0x7dc   : > { %v1600_v43 = vrot.slane %v1599_v48, 1  ;;  %v1809_v37 = vadd.f32 %v5613_v22, %v1796_v59  ;;  %v1763_v25 = vmul.f32 %v4775_v5, %v1762_v58 }
 0x7de   : > { %v1601_v10 = vadd.f32 %v1600_v43, %v1599_v48  ;;  %v1767_v40 = vsel %vm1766_vm9, %v4775_v5, %v1763_v25  ;;  %4438 = vmatmul.msk.f32.gmra.mxu1 %vm447_vm0, %v1809_v37 }
 0x7df   : > { %v1784_v41 = vmul.f32 %v1767_v40, %v5681_v52  ;;  %v4912_v52 = vmov 0.0  }
 0x7e0   : > { %v1609_v60 = vmul.f32 %v1601_v10, %v5009_v24  ;;  %420 = vst.msk [vmem:[#allocation2 + $0x10] sm:$0xff] %vm416_vm5, %v4912_v52 }
 0x7e1   : > { %v1797_v45 = vmul.f32 %v5603_v50, %v1784_v41  ;;  %421 = vst.msk [vmem:[#allocation2 + $0x18] sm:$0x3] %vm418_vm10, %v4912_v52 }
 0x7e2   : > { %v1617_v36 = vsub.f32 %v5705_v46, %v1609_v60  ;;  %417 = vst.msk [vmem:[#allocation2] sm:$0xff] %vm416_vm5, %v4912_v52 }
 0x7e3   : > { %v1810_v31 = vadd.f32 %v5613_v22, %v1797_v45  ;;  %419 = vst.msk [vmem:[#allocation2 + $0x8] sm:$0x3] %vm418_vm10, %v4912_v52 }
 0x7e4   : > { %v1625_v51 = vmul.f32 %v1617_v36, %v1617_v36  ;;  %422 = vst.msk [vmem:[#allocation2 + $0x20] sm:$0xff] %vm416_vm5, %v4912_v52 }
 0x7e5   : > { %423 = vst.msk [vmem:[#allocation2 + $0x28] sm:$0x3] %vm418_vm10, %v4912_v52 }
 0x7e6   : > { %v1675_v30 = vsel %vm447_vm0, %v1625_v51, 0.0  ;;  %4439 = vmatmul.msk.f32.gmra.mxu1 %vm447_vm0, %v1810_v31  ;;  %424 = vst.msk [vmem:[#allocation2 + $0x30] sm:$0xff] %vm416_vm5, %v4912_v52 }
 0x7e7   : > { %v1676_v34 = vrot.slane %v1675_v30, 4  ;;  %425 = vst.msk [vmem:[#allocation2 + $0x38] sm:$0x3] %vm418_vm10, %v4912_v52 }
 0x7e8   : > { %426 = vst.msk [vmem:[#allocation2 + $0x40] sm:$0xff] %vm416_vm5, %v4912_v52 }
 0x7e9   : > { %v1677_v53 = vadd.f32 %v1676_v34, %v1675_v30  ;;  %427 = vst.msk [vmem:[#allocation2 + $0x48] sm:$0x3] %vm418_vm10, %v4912_v52  ;;  %v1927_v12 = vld [vmem:[#allocation2] sm:$0xff] }
 0x7ea   : > { %428 = vst.msk [vmem:[#allocation2 + $0x50] sm:$0xff] %vm416_vm5, %v4912_v52  ;;  %v1952_v16 = vld [vmem:[#allocation2 + $0x1] sm:$0xff] }
 0x7eb   : > { %v1678_v17 = vrot.slane %v1677_v53, 2  ;;  %429 = vst.msk [vmem:[#allocation2 + $0x58] sm:$0x3] %vm418_vm10, %v4912_v52  ;;  %v1977_v59 = vld [vmem:[#allocation2 + $0x2] sm:$0xff] }
 0x7ec   : > { %430 = vst.msk [vmem:[#allocation2 + $0x60] sm:$0xff] %vm416_vm5, %v4912_v52 }
 0x7ed   : > { %v1679_v20 = vadd.f32 %v1678_v17, %v1677_v53  ;;  %431 = vst.msk [vmem:[#allocation2 + $0x68] sm:$0x3] %vm418_vm10, %v4912_v52 }
 0x7ee   : > { %432 = vst.msk [vmem:[#allocation2 + $0x70] sm:$0xff] %vm416_vm5, %v4912_v52 }
 0x7ef   : > { %v1680_v35 = vrot.slane %v1679_v20, 1  ;;  %433 = vst.msk [vmem:[#allocation2 + $0x78] sm:$0x3] %vm418_vm10, %v4912_v52 }
 0x7f0   : > { %434 = vst.msk [vmem:[#allocation2 + $0x80] sm:$0xff] %vm416_vm5, %v4912_v52 }
 0x7f1   : > { %v1681_v54 = vadd.f32 %v1680_v35, %v1679_v20  ;;  %435 = vst.msk [vmem:[#allocation2 + $0x88] sm:$0x3] %vm418_vm10, %v4912_v52 }
 0x7f2   : > { %436 = vst.msk [vmem:[#allocation2 + $0x90] sm:$0xff] %vm416_vm5, %v4912_v52 }
 0x7f3   : > { %v1689_v7 = vmul.f32 %v1681_v54, %v5009_v24  ;;  %437 = vst.msk [vmem:[#allocation2 + $0x98] sm:$0x3] %vm418_vm10, %v4912_v52 }
 0x7f5   : > { %v1697_v29 = vadd.f32 1e-05, %v1689_v7 }
 0x7f7   : > { %4776 = vrsqrt.f32 %v1697_v29  ;;  %vm1774_vm12 = vweird.f32 %v1697_v29 }
 0x7fd   : > { %v4777_v27 = vpop.eup %4776 }
 0x7fe   : > { %v1769_v26 = vmul.f32 %v4777_v27, %v1697_v29  ;;  %vm1775_vm11 = vweird.f32 %v4777_v27 }
 0x7ff   : > { %vm1776_vm13 = vmor %vm1774_vm12, %vm1775_vm11 }
 0x800   : > { %v1770_v38 = vmul.f32 %v4777_v27, %v1769_v26 }
 0x802   : > { %v1771_v18 = vmul.f32 0.5, %v1770_v38 }
 0x804   : > { %v1772_v47 = vsub.f32 1.5, %v1771_v18 }
 0x806   : > { %v1773_v28 = vmul.f32 %v4777_v27, %v1772_v47 }
 0x808   : > { %v1777_v63 = vsel %vm1776_vm13, %v4777_v27, %v1773_v28 }
 0x809   : > { %v1785_v62 = vmul.f32 %v1777_v63, %v1617_v36 }
 0x80b   : > { %v1798_v1 = vmul.f32 %v5603_v50, %v1785_v62 }
 0x80d   : > { %v1811_v3 = vadd.f32 %v5613_v22, %v1798_v1  ;;  %v404_v22 = vld [vmem:[%s6861_s8] sm:$0xff] }
 0x80e   : > { %v5764_v9 = vperm.slane %v404_v22, 0  ;;  %v5766_v11 = vperm.slane %v404_v22, 1  ;;  %v5774_v48 = vperm.slane %v404_v22, 2  ;;  %v5777_v10 = vperm.slane %v404_v22, 3 }
 0x80f   : > { %4440 = vmatmul.msk.f32.gmra.mxu1 %vm447_vm0, %v1811_v3  ;;  %v5781_v53 = vperm.slane %v404_v22, 4  ;;  %v5787_v29 = vperm.slane %v404_v22, 5  ;;  %v5789_v18 = vperm.slane %v404_v22, 6  ;;  %v5792_v62 = vperm.slane %v404_v22, 7 }
 0x810   : > { %v1936_v13 = vmul.f32 %v5764_v9, %v1927_v12  ;;  %v1961_v14 = vmul.f32 %v5766_v11, %v1952_v16  ;;  %v1986_v25 = vmul.f32 %v5774_v48, %v1977_v59 }
 0x812   : > { %v1969_v37 = vadd.f32 %v1961_v14, %v1936_v13 }
 0x813   : > { %v1854_v61 = vpop.f32.mrf.mxu1 }
 0x814   : > { %v1855_v39 = vadd.f32 %v1854_v61, %v5757_v4  ;;  %v1994_v36 = vadd.f32 %v1986_v25, %v1969_v37  ;;  %v5809_v37 = vperm.slane %v5753_v23, 1 }
 0x816   : > { %v1878_v5 = vadd.f32 3.0, %v1855_v39 }
 0x818   : > { %v1886_v42 = vmax.f32 %v1878_v5, 0.0 }
 0x81a   : > { %v1894_v8 = vmin.f32 %v1886_v42, 6.0 }
 0x81c   : > { %v1902_v21 = vmul.f32 %v1894_v8, %v1855_v39 }
 0x81e   : > { %v1910_v50 = vmul.f32 0.16666667, %v1902_v21 }
 0x820   : > { %1919 = vst.msk [vmem:[#allocation2 + $0x11] sm:$0xff] %vm416_vm5, %v1910_v50  ;;  %v5800_v50 = vld [vmem:[%s6861_s8 + $0x8] ss:$0 sm:$0xff] }
 0x827   : > { %v2002_v40 = vld [vmem:[#allocation2 + $0x10] sm:$0xff] }
 0x828   : > { %v2011_v31 = vmul.f32 %v5777_v10, %v2002_v40  ;;  %v2027_v30 = vld [vmem:[#allocation2 + $0x11] sm:$0xff]  ;;  %v1937_v35 = vmul.f32 %v2002_v40, %v5764_v9 }
 0x829   : > { %v1962_v52 = vmul.f32 %v2027_v30, %v5766_v11  ;;  %v2036_v7 = vmul.f32 %v5781_v53, %v2027_v30  ;;  %v2052_v26 = vld [vmem:[#allocation2 + $0x12] sm:$0xff] }
 0x82a   : > { %v2019_v20 = vadd.f32 %v2011_v31, %v1994_v36  ;;  %v2061_v1 = vmul.f32 %v5787_v29, %v2052_v26  ;;  %v1987_v3 = vmul.f32 %v2052_v26, %v5774_v48 }
 0x82b   : > { %v1970_v47 = vadd.f32 %v1962_v52, %v1937_v35 }
 0x82c   : > { %v2044_v56 = vadd.f32 %v2036_v7, %v2019_v20 }
 0x82d   : > { %v1995_v12 = vadd.f32 %v1987_v3, %v1970_v47 }
 0x82e   : > { %v2069_v8 = vadd.f32 %v2061_v1, %v2044_v56 }
 0x83a   : > { %v1857_v44 = vpop.f32.mrf.mxu1 }
 0x83b   : > { %v1858_v57 = vadd.f32 %v1857_v44, %v5757_v4 }
 0x83d   : > { %v1879_v58 = vadd.f32 3.0, %v1858_v57 }
 0x83f   : > { %v1887_v43 = vmax.f32 %v1879_v58, 0.0 }
 0x841   : > { %v1895_v41 = vmin.f32 %v1887_v43, 6.0 }
 0x843   : > { %v1903_v60 = vmul.f32 %v1895_v41, %v1858_v57  ;;  %v1860_v45 = vpop.f32.mrf.mxu1 }
 0x844   : > { %v1861_v51 = vadd.f32 %v1860_v45, %v5757_v4 }
 0x845   : > { %v1911_v34 = vmul.f32 0.16666667, %v1903_v60 }
 0x846   : > { %v1880_v17 = vadd.f32 3.0, %v1861_v51 }
 0x847   : > { %1920 = vst.msk [vmem:[#allocation2 + $0x21] sm:$0xff] %vm416_vm5, %v1911_v34 }
 0x848   : > { %v1888_v54 = vmax.f32 %v1880_v17, 0.0 }
 0x84a   : > { %v1896_v27 = vmin.f32 %v1888_v54, 6.0 }
 0x84b   : > { %v1863_v38 = vpop.f32.mrf.mxu1 }
 0x84c   : > { %v1904_v28 = vmul.f32 %v1896_v27, %v1861_v51  ;;  %v1864_v63 = vadd.f32 %v1863_v38, %v5757_v4 }
 0x84e   : > { %v1912_v61 = vmul.f32 0.16666667, %v1904_v28  ;;  %v1881_v39 = vadd.f32 3.0, %v1864_v63  ;;  %v2078_v5 = vld [vmem:[#allocation2 + $0x20] sm:$0xff] }
 0x84f   : > { %v2103_v42 = vld [vmem:[#allocation2 + $0x21] sm:$0xff]  ;;  %v2087_v21 = vmul.f32 %v5789_v18, %v2078_v5  ;;  %v2012_v22 = vmul.f32 %v2078_v5, %v5777_v10  ;;  %v1938_v14 = vmul.f32 %v2078_v5, %v5764_v9 }
 0x850   : > { %1921 = vst.msk [vmem:[#allocation2 + $0x31] sm:$0xff] %vm416_vm5, %v1912_v61  ;;  %v1889_v16 = vmax.f32 %v1881_v39, 0.0  ;;  %v2112_v44 = vmul.f32 %v5792_v62, %v2103_v42  ;;  %v2128_v55 = vld [vmem:[#allocation2 + $0x22] sm:$0xff]  ;;  %v1963_v59 = vmul.f32 %v2103_v42, %v5766_v11  ;;  %v2037_v43 = vmul.f32 %v2103_v42, %v5781_v53 }
 0x851   : > { %v2095_v57 = vadd.f32 %v2087_v21, %v2069_v8  ;;  %v2020_v13 = vadd.f32 %v2012_v22, %v1995_v12  ;;  %v2137_v40 = vmul.f32 %v5800_v50, %v2128_v55  ;;  %v2062_v34 = vmul.f32 %v2128_v55, %v5787_v29 }
 0x852   : > { %v1897_v58 = vmin.f32 %v1889_v16, 6.0  ;;  %v1971_v31 = vadd.f32 %v1963_v59, %v1938_v14  ;;  %v1988_v52 = vmul.f32 %v2128_v55, %v5774_v48 }
 0x853   : > { %v2120_v25 = vadd.f32 %v2112_v44, %v2095_v57  ;;  %v2045_v60 = vadd.f32 %v2037_v43, %v2020_v13  ;;  %v1866_v45 = vpop.f32.mrf.mxu1 }
 0x854   : > { %v1905_v41 = vmul.f32 %v1897_v58, %v1864_v63  ;;  %v1867_v30 = vadd.f32 %v1866_v45, %v5757_v4  ;;  %v1996_v38 = vadd.f32 %v1988_v52, %v1971_v31 }
 0x855   : > { %v2145_v36 = vadd.f32 %v2137_v40, %v2120_v25  ;;  %v2070_v7 = vadd.f32 %v2062_v34, %v2045_v60 }
 0x856   : > { %v1913_v51 = vmul.f32 0.16666667, %v1905_v41  ;;  %v1882_v54 = vadd.f32 3.0, %v1867_v30 }
 0x857   : > { %v2154_v17 = vadd.f32 %v5809_v37, %v2145_v36  ;;  %v2079_v20 = vld [vmem:[#allocation2 + $0x30] sm:$0xff] }
 0x858   : > { %v2104_v35 = vld [vmem:[#allocation2 + $0x31] sm:$0xff]  ;;  %1922 = vst.msk [vmem:[#allocation2 + $0x41] sm:$0xff] %vm416_vm5, %v1913_v51  ;;  %v2088_v27 = vmul.f32 %v5789_v18, %v2079_v20  ;;  %v2013_v56 = vmul.f32 %v2079_v20, %v5777_v10  ;;  %v1939_v47 = vmul.f32 %v2079_v20, %v5764_v9  ;;  %v1890_v28 = vmax.f32 %v1882_v54, 0.0 }
 0x859   : > { %4441 = vmatmul.msk.f32.vlgmr.msra.gmra.mxu3 %vm416_vm5, %v2154_v17  ;;  %v2129_v26 = vld [vmem:[#allocation2 + $0x32] sm:$0xff]  ;;  %v2113_v1 = vmul.f32 %v5792_v62, %v2104_v35  ;;  %v1964_v3 = vmul.f32 %v2104_v35, %v5766_v11  ;;  %v2038_v39 = vmul.f32 %v2104_v35, %v5781_v53 }
 0x85a   : > { %v2096_v63 = vadd.f32 %v2088_v27, %v2070_v7  ;;  %v2021_v61 = vadd.f32 %v2013_v56, %v1996_v38  ;;  %v1898_v5 = vmin.f32 %v1890_v28, 6.0  ;;  %v2138_v8 = vmul.f32 %v5800_v50, %v2129_v26 }
 0x85b   : > { %v1869_v21 = vpop.f32.mrf.mxu1  ;;  %v2063_v22 = vmul.f32 %v2129_v26, %v5787_v29  ;;  %v1972_v16 = vadd.f32 %v1964_v3, %v1939_v47  ;;  %v1989_v58 = vmul.f32 %v2129_v26, %v5774_v48 }
 0x85c   : > { %v2121_v42 = vadd.f32 %v2113_v1, %v2096_v63  ;;  %v2046_v12 = vadd.f32 %v2038_v39, %v2021_v61  ;;  %v1906_v44 = vmul.f32 %v1898_v5, %v1867_v30  ;;  %v1870_v55 = vadd.f32 %v1869_v21, %v5757_v4 }
 0x85d   : > { %v1997_v45 = vadd.f32 %v1989_v58, %v1972_v16 }
 0x85e   : > { %v2146_v57 = vadd.f32 %v2138_v8, %v2121_v42  ;;  %v2071_v13 = vadd.f32 %v2063_v22, %v2046_v12  ;;  %v1914_v43 = vmul.f32 0.16666667, %v1906_v44  ;;  %v1883_v25 = vadd.f32 3.0, %v1870_v55 }
 0x85f   : > { %v2080_v14 = vld [vmem:[#allocation2 + $0x40] sm:$0xff] }
 0x860   : > { %v2105_v59 = vld [vmem:[#allocation2 + $0x41] sm:$0xff]  ;;  %v2155_v40 = vadd.f32 %v5809_v37, %v2146_v57  ;;  %v2089_v41 = vmul.f32 %v5789_v18, %v2080_v14  ;;  %v2014_v36 = vmul.f32 %v2080_v14, %v5777_v10  ;;  %1923 = vst.msk [vmem:[#allocation2 + $0x51] sm:$0xff] %vm416_vm5, %v1914_v43  ;;  %v1891_v31 = vmax.f32 %v1883_v25, 0.0 }
 0x861   : > { %v2130_v60 = vld [vmem:[#allocation2 + $0x42] sm:$0xff]  ;;  %v2114_v30 = vmul.f32 %v5792_v62, %v2105_v59  ;;  %v1940_v17 = vmul.f32 %v2080_v14, %v5764_v9  ;;  %v1965_v20 = vmul.f32 %v2105_v59, %v5766_v11  ;;  %v2039_v7 = vmul.f32 %v2105_v59, %v5781_v53 }
 0x862   : > { %4442 = vmatmul.msk.f32.gmra.mxu3 %vm416_vm5, %v2155_v40  ;;  %v2097_v51 = vadd.f32 %v2089_v41, %v2071_v13  ;;  %v2022_v34 = vadd.f32 %v2014_v36, %v1997_v45  ;;  %v1899_v35 = vmin.f32 %v1891_v31, 6.0  ;;  %v2139_v54 = vmul.f32 %v5800_v50, %v2130_v60 }
 0x863   : > { %v1872_v27 = vpop.f32.mrf.mxu1  ;;  %v1973_v28 = vadd.f32 %v1965_v20, %v1940_v17  ;;  %v2064_v61 = vmul.f32 %v2130_v60, %v5787_v29  ;;  %v1990_v42 = vmul.f32 %v2130_v60, %v5774_v48 }
 0x864   : > { %v2122_v52 = vadd.f32 %v2114_v30, %v2097_v51  ;;  %v1907_v26 = vmul.f32 %v1899_v35, %v1870_v55  ;;  %v1873_v38 = vadd.f32 %v1872_v27, %v5757_v4  ;;  %v2047_v47 = vadd.f32 %v2039_v7, %v2022_v34 }
 0x865   : > { %v1998_v16 = vadd.f32 %v1990_v42, %v1973_v28 }
 0x866   : > { %v2147_v56 = vadd.f32 %v2139_v54, %v2122_v52  ;;  %v1915_v63 = vmul.f32 0.16666667, %v1907_v26  ;;  %v1884_v1 = vadd.f32 3.0, %v1873_v38  ;;  %v2072_v21 = vadd.f32 %v2064_v61, %v2047_v47 }
 0x867   : > { %v2081_v39 = vld [vmem:[#allocation2 + $0x50] sm:$0xff] }
 0x868   : > { %v2156_v3 = vadd.f32 %v5809_v37, %v2147_v56  ;;  %v2106_v5 = vld [vmem:[#allocation2 + $0x51] sm:$0xff]  ;;  %1924 = vst.msk [vmem:[#allocation2 + $0x61] sm:$0xff] %vm416_vm5, %v1915_v63  ;;  %v1892_v8 = vmax.f32 %v1884_v1, 0.0  ;;  %v2090_v12 = vmul.f32 %v5789_v18, %v2081_v39  ;;  %v2015_v44 = vmul.f32 %v2081_v39, %v5777_v10 }
 0x869   : > { %v2131_v22 = vld [vmem:[#allocation2 + $0x52] sm:$0xff]  ;;  %v1941_v55 = vmul.f32 %v2081_v39, %v5764_v9  ;;  %v2115_v14 = vmul.f32 %v5792_v62, %v2106_v5  ;;  %v1966_v59 = vmul.f32 %v2106_v5, %v5766_v11  ;;  %v2040_v43 = vmul.f32 %v2106_v5, %v5781_v53 }
 0x86a   : > { %4443 = vmatmul.msk.f32.gmra.mxu3 %vm416_vm5, %v2156_v3  ;;  %v1900_v57 = vmin.f32 %v1892_v8, 6.0  ;;  %v2098_v13 = vadd.f32 %v2090_v12, %v2072_v21  ;;  %v2023_v58 = vadd.f32 %v2015_v44, %v1998_v16  ;;  %v2140_v41 = vmul.f32 %v5800_v50, %v2131_v22 }
 0x86b   : > { %v1974_v45 = vadd.f32 %v1966_v59, %v1941_v55  ;;  %v2065_v51 = vmul.f32 %v2131_v22, %v5787_v29  ;;  %v1991_v17 = vmul.f32 %v2131_v22, %v5774_v48 }
 0x86c   : > { %v1908_v25 = vmul.f32 %v1900_v57, %v1873_v38  ;;  %v2123_v40 = vadd.f32 %v2115_v14, %v2098_v13  ;;  %v2048_v60 = vadd.f32 %v2040_v43, %v2023_v58 }
 0x86d   : > { %v1999_v7 = vadd.f32 %v1991_v17, %v1974_v45  ;;  %v413_v45 = vld [vmem:[%s6863_s10 + $0x8] sm:$0xff] }
 0x86e   : > { %v1916_v36 = vmul.f32 0.16666667, %v1908_v25  ;;  %v2148_v31 = vadd.f32 %v2140_v41, %v2123_v40  ;;  %v2073_v35 = vadd.f32 %v2065_v51, %v2048_v60  ;;  %2307 = vmatpush.msra.mxu0 %v413_v45 }
 0x86f   : > { %v2082_v30 = vld [vmem:[#allocation2 + $0x60] sm:$0xff] }
 0x870   : > { %v2107_v34 = vld [vmem:[#allocation2 + $0x61] sm:$0xff]  ;;  %1925 = vst.msk [vmem:[#allocation2 + $0x71] sm:$0xff] %vm416_vm5, %v1916_v36  ;;  %v2157_v20 = vadd.f32 %v5809_v37, %v2148_v31  ;;  %v2091_v52 = vmul.f32 %v5789_v18, %v2082_v30  ;;  %v2016_v27 = vmul.f32 %v2082_v30, %v5777_v10  ;;  %v1942_v43 = vmul.f32 %v2082_v30, %v5764_v9 }
 0x871   : > { %v2132_v54 = vld [vmem:[#allocation2 + $0x62] sm:$0xff]  ;;  %v2116_v38 = vmul.f32 %v5792_v62, %v2107_v34  ;;  %v2041_v47 = vmul.f32 %v2107_v34, %v5781_v53  ;;  %v1967_v25 = vmul.f32 %v2107_v34, %v5766_v11 }
 0x872   : > { %4444 = vmatmul.msk.f32.gmra.mxu3 %vm416_vm5, %v2157_v20  ;;  %v2099_v26 = vadd.f32 %v2091_v52, %v2073_v35  ;;  %v2024_v56 = vadd.f32 %v2016_v27, %v1999_v7  ;;  %v2141_v63 = vmul.f32 %v5800_v50, %v2132_v54  ;;  %v2066_v61 = vmul.f32 %v2132_v54, %v5787_v29 }
 0x873   : > { %v1975_v60 = vadd.f32 %v1967_v25, %v1942_v43  ;;  %v1992_v31 = vmul.f32 %v2132_v54, %v5774_v48 }
 0x874   : > { %v2124_v28 = vadd.f32 %v2116_v38, %v2099_v26  ;;  %v2049_v1 = vadd.f32 %v2041_v47, %v2024_v56 }
 0x876   : > { %v2149_v3 = vadd.f32 %v2141_v63, %v2124_v28  ;;  %v2074_v8 = vadd.f32 %v2066_v61, %v2049_v1  ;;  %v2085_v1 = vld [vmem:[#allocation2 + $0x90] sm:$0xff] }
 0x877   : > { %v2083_v39 = vld [vmem:[#allocation2 + $0x70] sm:$0xff] }
 0x878   : > { %v2108_v5 = vld [vmem:[#allocation2 + $0x71] sm:$0xff]  ;;  %v2158_v42 = vadd.f32 %v5809_v37, %v2149_v3  ;;  %v2092_v21 = vmul.f32 %v5789_v18, %v2083_v39  ;;  %v2017_v51 = vmul.f32 %v2083_v39, %v5777_v10  ;;  %v1943_v34 = vmul.f32 %v2083_v39, %v5764_v9 }
 0x879   : > { %v2133_v12 = vld [vmem:[#allocation2 + $0x72] sm:$0xff]  ;;  %v2117_v16 = vmul.f32 %v5792_v62, %v2108_v5  ;;  %v1968_v20 = vmul.f32 %v2108_v5, %v5766_v11  ;;  %v2042_v35 = vmul.f32 %v2108_v5, %v5781_v53  ;;  %v2094_v5 = vmul.f32 %v5789_v18, %v2085_v1 }
 0x87a   : > { %4445 = vmatmul.msk.f32.gmra.mxu3 %vm416_vm5, %v2158_v42  ;;  %v2100_v22 = vadd.f32 %v2092_v21, %v2074_v8  ;;  %v2142_v55 = vmul.f32 %v5800_v50, %v2133_v12  ;;  %v2067_v27 = vmul.f32 %v2133_v12, %v5787_v29  ;;  %v1993_v26 = vmul.f32 %v2133_v12, %v5774_v48  ;;  %v2110_v42 = vld [vmem:[#allocation2 + $0x91] sm:$0xff] }
 0x87b   : > { %v1976_v7 = vadd.f32 %v1968_v20, %v1943_v34 }
 0x87c   : > { %v2125_v44 = vadd.f32 %v2117_v16, %v2100_v22  ;;  %v2135_v22 = vld [vmem:[#allocation2 + $0x92] sm:$0xff] }
 0x87d   : > { %v2001_v28 = vadd.f32 %v1993_v26, %v1976_v7 }
 0x87e   : > { %v2150_v57 = vadd.f32 %v2142_v55, %v2125_v44  ;;  %v2119_v44 = vmul.f32 %v5792_v62, %v2110_v42 }
 0x880   : > { %v2159_v13 = vadd.f32 %v5809_v37, %v2150_v57 }
 0x882   : > { %4446 = vmatmul.msk.f32.gmra.mxu3 %vm416_vm5, %v2159_v13  ;;  %v2144_v13 = vmul.f32 %v5800_v50, %v2135_v22 }
 0x88c   : > { %v1875_v14 = vpop.f32.mrf.mxu1 }
 0x88d   : > { %v1876_v59 = vadd.f32 %v1875_v14, %v5757_v4  ;;  %v2000_v4 = vadd.f32 %v1992_v31, %v1975_v60 }
 0x88f   : > { %v1885_v58 = vadd.f32 3.0, %v1876_v59  ;;  %v2025_v30 = vadd.f32 %v2017_v51, %v2000_v4 }
 0x891   : > { %v1893_v40 = vmax.f32 %v1885_v58, 0.0  ;;  %v2050_v52 = vadd.f32 %v2042_v35, %v2025_v30 }
 0x893   : > { %v1901_v41 = vmin.f32 %v1893_v40, 6.0  ;;  %v2075_v56 = vadd.f32 %v2067_v27, %v2050_v52 }
 0x895   : > { %v1909_v36 = vmul.f32 %v1901_v41, %v1876_v59 }
 0x897   : > { %v1917_v17 = vmul.f32 0.16666667, %v1909_v36 }
 0x899   : > { %1926 = vst.msk [vmem:[#allocation2 + $0x81] sm:$0xff] %vm416_vm5, %v1917_v17 }
 0x8a0   : > { %v2084_v54 = vld [vmem:[#allocation2 + $0x80] sm:$0xff] }
 0x8a1   : > { %v2109_v38 = vld [vmem:[#allocation2 + $0x81] sm:$0xff]  ;;  %v2093_v47 = vmul.f32 %v5789_v18, %v2084_v54  ;;  %v2018_v63 = vmul.f32 %v2084_v54, %v5777_v10 }
 0x8a2   : > { %v2134_v9 = vld [vmem:[#allocation2 + $0x82] sm:$0xff]  ;;  %v2118_v11 = vmul.f32 %v5792_v62, %v2109_v38  ;;  %v2043_v39 = vmul.f32 %v2109_v38, %v5781_v53  ;;  %v2162_v62 = vperm.slane %v5753_v23, 2 }
 0x8a3   : > { %v2101_v3 = vadd.f32 %v2093_v47, %v2075_v56  ;;  %v2026_v61 = vadd.f32 %v2018_v63, %v2001_v28  ;;  %v2143_v8 = vmul.f32 %v5800_v50, %v2134_v9  ;;  %v2068_v12 = vmul.f32 %v2134_v9, %v5787_v29  ;;  %v412_v29 = vld [vmem:[%s6863_s10] sm:$0xff] }
 0x8a4   : > { %2308 = vmatpush.msra.mxu0 %v412_v29 }
 0x8a5   : > { %v2126_v48 = vadd.f32 %v2118_v11, %v2101_v3  ;;  %v2051_v21 = vadd.f32 %v2043_v39, %v2026_v61 }
 0x8a7   : > { %v2151_v16 = vadd.f32 %v2143_v8, %v2126_v48  ;;  %v2076_v10 = vadd.f32 %v2068_v12, %v2051_v21 }
 0x8a9   : > { %v2160_v55 = vadd.f32 %v5809_v37, %v2151_v16  ;;  %v2102_v57 = vadd.f32 %v2094_v5, %v2076_v10 }
 0x8ab   : > { %4447 = vmatmul.msk.f32.gmra.mxu3 %vm416_vm5, %v2160_v55  ;;  %v2127_v53 = vadd.f32 %v2119_v44, %v2102_v57 }
 0x8ad   : > { %v2152_v18 = vadd.f32 %v2144_v13, %v2127_v53 }
 0x8af   : > { %v2161_v14 = vadd.f32 %v5809_v37, %v2152_v18 }
 0x8b3   : > { %4448 = vmatmul.msk.f32.gmra.mxu3 %vm416_vm5, %v2161_v14 }
 0x8dc   : > { %v2204_v59 = vpop.f32.mrf.mxu3 }
 0x8dd   : > { %v2205_v58 = vadd.f32 %v2204_v59, %v2162_v62 }
 0x8df   : > { %v2228_v43 = vadd.f32 3.0, %v2205_v58 }
 0x8e1   : > { %v2236_v25 = vmax.f32 %v2228_v43, 0.0 }
 0x8e3   : > { %v2244_v50 = vmin.f32 %v2236_v25, 6.0  ;;  %v401_v25 = vld [vmem:[%s6859_s6] sm:$0x3] }
 0x8e5   : > { %v2252_v40 = vmul.f32 %v2244_v50, %v2205_v58  ;;  %v2207_v41 = vpop.f32.mrf.mxu3  ;;  %v2268_v50 = vperm.slane %v401_v25, 0 }
 0x8e6   : > { %v2208_v60 = vadd.f32 %v2207_v41, %v2162_v62 }
 0x8e7   : > { %v2260_v45 = vmul.f32 0.16666667, %v2252_v40 }
 0x8e8   : > { %v2229_v36 = vadd.f32 3.0, %v2208_v60 }
 0x8e9   : > { %4449 = vmatmul.msk.f32.vlgmr.msra.gmra.mxu0 %vm416_vm5, %v2260_v45 }
 0x8ea   : > { %v2237_v37 = vmax.f32 %v2229_v36, 0.0 }
 0x8ec   : > { %v2245_v31 = vmin.f32 %v2237_v37, 6.0 }
 0x8ed   : > { %v2210_v51 = vpop.f32.mrf.mxu3 }
 0x8ee   : > { %v2253_v17 = vmul.f32 %v2245_v31, %v2208_v60  ;;  %v2211_v4 = vadd.f32 %v2210_v51, %v2162_v62 }
 0x8f0   : > { %v2261_v30 = vmul.f32 0.16666667, %v2253_v17  ;;  %v2230_v34 = vadd.f32 3.0, %v2211_v4 }
 0x8f2   : > { %v2238_v23 = vmax.f32 %v2230_v34, 0.0  ;;  %4450 = vmatmul.msk.f32.gmra.mxu0 %vm416_vm5, %v2261_v30 }
 0x8f4   : > { %v2246_v20 = vmin.f32 %v2238_v23, 6.0 }
 0x8f5   : > { %v2213_v52 = vpop.f32.mrf.mxu3 }
 0x8f6   : > { %v2254_v35 = vmul.f32 %v2246_v20, %v2211_v4  ;;  %v2214_v27 = vadd.f32 %v2213_v52, %v2162_v62 }
 0x8f8   : > { %v2262_v7 = vmul.f32 0.16666667, %v2254_v35  ;;  %v2231_v26 = vadd.f32 3.0, %v2214_v27 }
 0x8fa   : > { %4451 = vmatmul.msk.f32.gmra.mxu0 %vm416_vm5, %v2262_v7  ;;  %v2239_v54 = vmax.f32 %v2231_v26, 0.0 }
 0x8fc   : > { %v2247_v38 = vmin.f32 %v2239_v54, 6.0 }
 0x8fd   : > { %v2216_v56 = vpop.f32.mrf.mxu3 }
 0x8fe   : > { %v2255_v47 = vmul.f32 %v2247_v38, %v2214_v27  ;;  %v2217_v28 = vadd.f32 %v2216_v56, %v2162_v62 }
 0x900   : > { %v2263_v63 = vmul.f32 0.16666667, %v2255_v47  ;;  %v2232_v1 = vadd.f32 3.0, %v2217_v28 }
 0x902   : > { %v2240_v9 = vmax.f32 %v2232_v1, 0.0  ;;  %4452 = vmatmul.msk.f32.gmra.mxu0 %vm416_vm5, %v2263_v63 }
 0x904   : > { %v2248_v3 = vmin.f32 %v2240_v9, 6.0 }
 0x905   : > { %v2219_v11 = vpop.f32.mrf.mxu3 }
 0x906   : > { %v2256_v61 = vmul.f32 %v2248_v3, %v2217_v28  ;;  %v2220_v39 = vadd.f32 %v2219_v11, %v2162_v62 }
 0x908   : > { %v2264_v5 = vmul.f32 0.16666667, %v2256_v61  ;;  %v2233_v42 = vadd.f32 3.0, %v2220_v39 }
 0x90a   : > { %v2241_v48 = vmax.f32 %v2233_v42, 0.0  ;;  %4453 = vmatmul.msk.f32.gmra.mxu0 %vm416_vm5, %v2264_v5 }
 0x90c   : > { %v2249_v8 = vmin.f32 %v2241_v48, 6.0 }
 0x90e   : > { %v2257_v21 = vmul.f32 %v2249_v8, %v2220_v39 }
 0x910   : > { %v2265_v12 = vmul.f32 0.16666667, %v2257_v21 }
 0x912   : > { %4454 = vmatmul.msk.f32.gmra.mxu0 %vm416_vm5, %v2265_v12 }
 0x92e   : > { %v2222_v22 = vpop.f32.mrf.mxu3 }
 0x92f   : > { %v2223_v16 = vadd.f32 %v2222_v22, %v2162_v62 }
 0x931   : > { %v2234_v10 = vadd.f32 3.0, %v2223_v16 }
 0x933   : > { %v2242_v44 = vmax.f32 %v2234_v10, 0.0 }
 0x935   : > { %v2250_v55 = vmin.f32 %v2242_v44, 6.0 }
 0x936   : > { %v2225_v57 = vpop.f32.mrf.mxu3 }
 0x937   : > { %v2258_v13 = vmul.f32 %v2250_v55, %v2223_v16  ;;  %v2226_v53 = vadd.f32 %v2225_v57, %v2162_v62 }
 0x939   : > { %v2266_v18 = vmul.f32 0.16666667, %v2258_v13  ;;  %v2235_v14 = vadd.f32 3.0, %v2226_v53 }
 0x93b   : > { %v2243_v29 = vmax.f32 %v2235_v14, 0.0  ;;  %4455 = vmatmul.msk.f32.gmra.mxu0 %vm416_vm5, %v2266_v18 }
 0x93d   : > { %v2251_v59 = vmin.f32 %v2243_v29, 6.0 }
 0x93f   : > { %v2259_v58 = vmul.f32 %v2251_v59, %v2226_v53 }
 0x941   : > { %v2267_v43 = vmul.f32 0.16666667, %v2259_v58 }
 0x943   : > { %4456 = vmatmul.msk.f32.gmra.mxu0 %vm416_vm5, %v2267_v43 }
 0x966   : > { %v2310_v40 = vpop.f32.mrf.mxu0 }
 0x967   : > { %v2311_v41 = vadd.f32 %v2310_v40, %v2268_v50 }
 0x969   : > { %v2334_v60 = vadd.f32 %v2311_v41, %v5575_v15 }
 0x96b   : > { %v2350_v62 = vrot.slane %v2334_v60, 7 }
 0x96d   : > { %v5914_v45 = vsel %vm1015_vm2, %v5569_v33, %v2350_v62 }
 0x96e   : > { %v2375_v36 = vsel %vm447_vm0, %v5914_v45, 0.0 }
 0x96f   : > { %v2313_v37 = vpop.f32.mrf.mxu0  ;;  %2376 = vadd.xlane.f32.xlu0 %v2375_v36 }
 0x970   : > { %v2314_v31 = vadd.f32 %v2313_v37, %v2268_v50 }
 0x972   : > { %v2335_v51 = vadd.f32 %v2314_v31, %v5589_v32 }
 0x974   : > { %v2351_v17 = vrot.slane %v2335_v51, 7 }
 0x976   : > { %v5920_v4 = vsel %vm1015_vm2, %v2350_v62, %v2351_v17 }
 0x977   : > { %v2316_v30 = vpop.f32.mrf.mxu0  ;;  %v2378_v15 = vsel %vm447_vm0, %v5920_v4, 0.0 }
 0x978   : > { %v2317_v34 = vadd.f32 %v2316_v30, %v2268_v50  ;;  %2379 = vadd.xlane.f32.xlu1 %v2378_v15 }
 0x97a   : > { %v2336_v33 = vadd.f32 %v2317_v34, %v5596_v6 }
 0x97c   : > { %v2353_v23 = vrot.slane %v2336_v33, 7 }
 0x97e   : > { %v5926_v20 = vsel %vm1015_vm2, %v2351_v17, %v2353_v23 }
 0x97f   : > { %v2381_v35 = vsel %vm447_vm0, %v5926_v20, 0.0  ;;  %v2319_v32 = vpop.f32.mrf.mxu0 }
 0x980   : > { %2382 = vadd.xlane.f32.xlu2 %v2381_v35  ;;  %v2320_v52 = vadd.f32 %v2319_v32, %v2268_v50 }
 0x982   : > { %v2337_v7 = vadd.f32 %v2320_v52, %v5606_v2 }
 0x984   : > { %v2355_v27 = vrot.slane %v2337_v7, 7 }
 0x986   : > { %v5932_v26 = vsel %vm1015_vm2, %v2353_v23, %v2355_v27 }
 0x987   : > { %v2322_v54 = vpop.f32.mrf.mxu0  ;;  %v2384_v6 = vsel %vm447_vm0, %v5932_v26, 0.0 }
 0x988   : > { %v2323_v38 = vadd.f32 %v2322_v54, %v2268_v50  ;;  %2385 = vadd.xlane.f32.xlu0 %v2384_v6 }
 0x98a   : > { %v2338_v56 = vadd.f32 %v2323_v38, %v5625_v0 }
 0x98c   : > { %v2357_v47 = vrot.slane %v2338_v56, 7  ;;  %v390_v56 = vld [vmem:[%s6855_s2 + $0x8] sm:$0xff] }
 0x98d   : > { %2635 = vmatpush.msra.mxu2 %v390_v56 }
 0x98e   : > { %v5938_v28 = vsel %vm1015_vm2, %v2355_v27, %v2357_v47 }
 0x98f   : > { %v2325_v63 = vpop.f32.mrf.mxu0  ;;  %v2387_v2 = vsel %vm447_vm0, %v5938_v28, 0.0 }
 0x990   : > { %v2326_v1 = vadd.f32 %v2325_v63, %v2268_v50  ;;  %2388 = vadd.xlane.f32.xlu1 %v2387_v2 }
 0x992   : > { %v2339_v9 = vadd.f32 %v2326_v1, %v5639_v19 }
 0x994   : > { %v2359_v3 = vrot.slane %v2339_v9, 7 }
 0x996   : > { %v5944_v11 = vsel %vm1015_vm2, %v2357_v47, %v2359_v3 }
 0x997   : > { %v2390_v61 = vsel %vm447_vm0, %v5944_v11, 0.0 }
 0x998   : > { %2391 = vadd.xlane.f32.xlu2 %v2390_v61 }
 0x9b8   : > { %v2328_v0 = vpop.f32.mrf.mxu0 }
 0x9b9   : > { %v2329_v39 = vadd.f32 %v2328_v0, %v2268_v50 }
 0x9bb   : > { %v2340_v5 = vadd.f32 %v2329_v39, %v5659_v49 }
 0x9bd   : > { %v2361_v42 = vrot.slane %v2340_v5, 7 }
 0x9bf   : > { %v5950_v48 = vsel %vm1015_vm2, %v2359_v3, %v2361_v42 }
 0x9c0   : > { %v2393_v8 = vsel %vm447_vm0, %v5950_v48, 0.0  ;;  %v2331_v19 = vpop.f32.mrf.mxu0 }
 0x9c1   : > { %2394 = vadd.xlane.f32.xlu1 %v2393_v8  ;;  %v2332_v21 = vadd.f32 %v2331_v19, %v2268_v50 }
 0x9c3   : > { %v2341_v10 = vadd.f32 %v2332_v21, %v5705_v46 }
 0x9c5   : > { %v5962_v55 = vrot.slane %v2341_v10, 7  ;;  %v388_v10 = vld [vmem:[%s6854_s1 + $0x4] sm:$0x7] }
 0x9c7   : > { %v5970_v18 = vsel %vm1015_vm2, %v2361_v42, %v5962_v55  ;;  %v2399_v50 = vsel %vm472_vm1, %v5962_v55, 0.0 }
 0x9c8   : > { %v2396_v14 = vsel %vm447_vm0, %v5970_v18, 0.0 }
 0x9e2   : > { %v2377_v12 = vpop.xlane.xlu0 %2376 }
 0x9e3   : > { %v2402_v22 = vmul.f32 %v2377_v12, %v5009_v24 }
 0x9e5   : > { %v5956_v16 = vsub.f32 %v5914_v45, %v2402_v22 }
 0x9e7   : > { %v2420_v49 = vmul.f32 %v5956_v16, %v5956_v16 }
 0x9e9   : > { %v2429_v44 = vsel %vm447_vm0, %v2420_v49, 0.0 }
 0x9ea   : > { %2430 = vadd.xlane.f32.xlu0 %v2429_v44 }
 0x9eb   : > { %v2380_v57 = vpop.xlane.xlu1 %2379 }
 0x9ec   : > { %v2403_v13 = vmul.f32 %v2380_v57, %v5009_v24 }
 0x9ee   : > { %v5966_v53 = vsub.f32 %v5920_v4, %v2403_v13 }
 0x9f0   : > { %v2421_v46 = vmul.f32 %v5966_v53, %v5966_v53 }
 0x9f2   : > { %v2432_v29 = vsel %vm447_vm0, %v2421_v46, 0.0  ;;  %2397 = vadd.xlane.f32.xlu0 %v2396_v14 }
 0x9f3   : > { %v2383_v59 = vpop.xlane.xlu2 %2382  ;;  %2433 = vadd.xlane.f32.xlu2 %v2432_v29 }
 0x9f4   : > { %v2404_v58 = vmul.f32 %v2383_v59, %v5009_v24  ;;  %v6034_v59 = vperm.slane %v388_v10, 0 }
 0x9f6   : > { %v5979_v43 = vsub.f32 %v5926_v20, %v2404_v58 }
 0x9f8   : > { %v2422_v25 = vmul.f32 %v5979_v43, %v5979_v43 }
 0x9fa   : > { %v2435_v40 = vsel %vm447_vm0, %v2422_v25, 0.0 }
 0x9fb   : > { %2400 = vadd.xlane.f32.xlu2 %v2399_v50  ;;  %2436 = vadd.xlane.f32.xlu1 %v2435_v40  ;;  %v2386_v41 = vpop.xlane.xlu0 %2385 }
 0x9fc   : > { %v2405_v60 = vmul.f32 %v2386_v41, %v5009_v24 }
 0x9fe   : > { %v5988_v62 = vsub.f32 %v5932_v26, %v2405_v60  ;;  %v6039_v60 = vperm.slane %v388_v10, 1 }
 0xa00   : > { %v2423_v36 = vmul.f32 %v5988_v62, %v5988_v62 }
 0xa02   : > { %v2438_v37 = vsel %vm447_vm0, %v2423_v36, 0.0 }
 0xa03   : > { %v2389_v31 = vpop.xlane.xlu1 %2388  ;;  %2439 = vadd.xlane.f32.xlu0 %v2438_v37 }
 0xa04   : > { %v2406_v51 = vmul.f32 %v2389_v31, %v5009_v24 }
 0xa06   : > { %v5995_v17 = vsub.f32 %v5938_v28, %v2406_v51 }
 0xa08   : > { %v2424_v30 = vmul.f32 %v5995_v17, %v5995_v17 }
 0xa0a   : > { %v2441_v15 = vsel %vm447_vm0, %v2424_v30, 0.0 }
 0xa0b   : > { %v2392_v34 = vpop.xlane.xlu2 %2391  ;;  %2442 = vadd.xlane.f32.xlu1 %v2441_v15 }
 0xa0c   : > { %v2407_v33 = vmul.f32 %v2392_v34, %v5009_v24 }
 0xa0e   : > { %v6002_v23 = vsub.f32 %v5944_v11, %v2407_v33 }
 0xa10   : > { %v2425_v35 = vmul.f32 %v6002_v23, %v6002_v23 }
 0xa12   : > { %v2444_v32 = vsel %vm447_vm0, %v2425_v35, 0.0 }
 0xa13   : > { %2445 = vadd.xlane.f32.xlu2 %v2444_v32 }
 0xa34   : > { %v2395_v52 = vpop.xlane.xlu1 %2394 }
 0xa35   : > { %v2408_v7 = vmul.f32 %v2395_v52, %v5009_v24 }
 0xa37   : > { %v6009_v27 = vsub.f32 %v5950_v48, %v2408_v7 }
 0xa39   : > { %v2426_v54 = vmul.f32 %v6009_v27, %v6009_v27 }
 0xa3b   : > { %v2447_v6 = vsel %vm447_vm0, %v2426_v54, 0.0 }
 0xa3c   : > { %2448 = vadd.xlane.f32.xlu0 %v2447_v6 }
 0xa5d   : > { %v2431_v38 = vpop.xlane.xlu0 %2430 }
 0xa5e   : > { %v2456_v47 = vmul.f32 %v2431_v38, %v5009_v24 }
 0xa60   : > { %v2465_v63 = vadd.f32 1e-05, %v2456_v47 }
 0xa62   : > { %4778 = vrsqrt.f32 %v2465_v63  ;;  %vm2480_vm15 = vweird.f32 %v2465_v63 }
 0xa65   : > { %v2398_v2 = vpop.xlane.xlu0 %2397 }
 0xa66   : > { %v2434_v1 = vpop.xlane.xlu2 %2433  ;;  %v2409_v9 = vmul.f32 %v2398_v2, %v5009_v24 }
 0xa67   : > { %v2457_v3 = vmul.f32 %v2434_v1, %v5009_v24 }
 0xa68   : > { %v4779_v61 = vpop.eup %4778  ;;  %v6021_v0 = vsub.f32 %v5970_v18, %v2409_v9 }
 0xa69   : > { %v2475_v39 = vmul.f32 %v4779_v61, %v2465_v63  ;;  %v2466_v5 = vadd.f32 1e-05, %v2457_v3  ;;  %vm2481_vm14 = vweird.f32 %v4779_v61 }
 0xa6a   : > { %v2427_v42 = vmul.f32 %v6021_v0, %v6021_v0  ;;  %vm2482_vm7 = vmor %vm2480_vm15, %vm2481_vm14 }
 0xa6b   : > { %v2476_v8 = vmul.f32 %v4779_v61, %v2475_v39  ;;  %4780 = vrsqrt.f32 %v2466_v5  ;;  %vm2490_vm9 = vweird.f32 %v2466_v5 }
 0xa6c   : > { %v2450_v19 = vsel %vm447_vm0, %v2427_v42, 0.0 }
 0xa6d   : > { %v2477_v21 = vmul.f32 0.5, %v2476_v8  ;;  %2451 = vadd.xlane.f32.xlu1 %v2450_v19 }
 0xa6e   : > { %v2401_v12 = vpop.xlane.xlu2 %2400  ;;  %v2437_v22 = vpop.xlane.xlu1 %2436 }
 0xa6f   : > { %v2478_v49 = vsub.f32 1.5, %v2477_v21  ;;  %v2410_v44 = vmul.f32 %v2401_v12, %v5009_v24  ;;  %v2458_v57 = vmul.f32 %v2437_v22, %v5009_v24 }
 0xa71   : > { %v4781_v13 = vpop.eup %4780  ;;  %v2479_v46 = vmul.f32 %v4779_v61, %v2478_v49  ;;  %v6032_v14 = vsub.f32 %v5962_v55, %v2410_v44  ;;  %v2467_v29 = vadd.f32 1e-05, %v2458_v57 }
 0xa72   : > { %v2485_v58 = vmul.f32 %v4781_v13, %v2466_v5  ;;  %vm2491_vm8 = vweird.f32 %v4781_v13 }
 0xa73   : > { %v2483_v25 = vsel %vm2482_vm7, %v4779_v61, %v2479_v46  ;;  %4782 = vrsqrt.f32 %v2467_v29  ;;  %v2428_v50 = vmul.f32 %v6032_v14, %v6032_v14  ;;  %vm2492_vm10 = vmor %vm2490_vm9, %vm2491_vm8  ;;  %vm2500_vm12 = vweird.f32 %v2467_v29 }
 0xa74   : > { %v2564_v40 = vmul.f32 %v2483_v25, %v5956_v16  ;;  %v2486_v41 = vmul.f32 %v4781_v13, %v2485_v58 }
 0xa75   : > { %v2453_v36 = vsel %vm472_vm1, %v2428_v50, 0.0 }
 0xa76   : > { %v2574_v37 = vmul.f32 %v6034_v59, %v2564_v40  ;;  %v2487_v31 = vmul.f32 0.5, %v2486_v41  ;;  %2454 = vadd.xlane.f32.xlu2 %v2453_v36  ;;  %v2440_v30 = vpop.xlane.xlu0 %2439 }
 0xa77   : > { %v2459_v33 = vmul.f32 %v2440_v30, %v5009_v24 }
 0xa78   : > { %v2488_v51 = vsub.f32 1.5, %v2487_v31  ;;  %v2584_v15 = vadd.f32 %v6039_v60, %v2574_v37 }
 0xa79   : > { %v4783_v34 = vpop.eup %4782  ;;  %v2468_v32 = vadd.f32 1e-05, %v2459_v33 }
 0xa7a   : > { %v2489_v35 = vmul.f32 %v4781_v13, %v2488_v51  ;;  %v2495_v16 = vmul.f32 %v4783_v34, %v2467_v29  ;;  %4457 = vmatmul.msk.f32.vlgmr.msra.gmra.mxu2 %vm447_vm0, %v2584_v15  ;;  %vm2501_vm11 = vweird.f32 %v4783_v34 }
 0xa7b   : > { %4784 = vrsqrt.f32 %v2468_v32  ;;  %vm2502_vm13 = vmor %vm2500_vm12, %vm2501_vm11  ;;  %vm2510_vm15 = vweird.f32 %v2468_v32 }
 0xa7c   : > { %v2493_v52 = vsel %vm2492_vm10, %v4781_v13, %v2489_v35  ;;  %v2496_v7 = vmul.f32 %v4783_v34, %v2495_v16 }
 0xa7d   : > { %v2565_v54 = vmul.f32 %v2493_v52, %v5966_v53 }
 0xa7e   : > { %v2497_v6 = vmul.f32 0.5, %v2496_v7  ;;  %v2443_v47 = vpop.xlane.xlu1 %2442 }
 0xa7f   : > { %v2575_v38 = vmul.f32 %v6034_v59, %v2565_v54  ;;  %v2460_v63 = vmul.f32 %v2443_v47, %v5009_v24 }
 0xa80   : > { %v2498_v56 = vsub.f32 1.5, %v2497_v6 }
 0xa81   : > { %v2585_v2 = vadd.f32 %v6039_v60, %v2575_v38  ;;  %v4785_v9 = vpop.eup %4784  ;;  %v2469_v3 = vadd.f32 1e-05, %v2460_v63 }
 0xa82   : > { %v2499_v1 = vmul.f32 %v4783_v34, %v2498_v56  ;;  %v2505_v39 = vmul.f32 %v4785_v9, %v2468_v32  ;;  %vm2511_vm14 = vweird.f32 %v4785_v9 }
 0xa83   : > { %4458 = vmatmul.msk.f32.gmra.mxu2 %vm447_vm0, %v2585_v2  ;;  %4786 = vrsqrt.f32 %v2469_v3  ;;  %vm2512_vm7 = vmor %vm2510_vm15, %vm2511_vm14  ;;  %vm2520_vm9 = vweird.f32 %v2469_v3 }
 0xa84   : > { %v2503_v61 = vsel %vm2502_vm13, %v4783_v34, %v2499_v1  ;;  %v2506_v5 = vmul.f32 %v4785_v9, %v2505_v39 }
 0xa85   : > { %v2566_v53 = vmul.f32 %v2503_v61, %v5979_v43 }
 0xa86   : > { %v2507_v8 = vmul.f32 0.5, %v2506_v5  ;;  %v2446_v19 = vpop.xlane.xlu2 %2445 }
 0xa87   : > { %v2576_v42 = vmul.f32 %v6034_v59, %v2566_v53  ;;  %v2461_v21 = vmul.f32 %v2446_v19, %v5009_v24 }
 0xa88   : > { %v2508_v22 = vsub.f32 1.5, %v2507_v8 }
 0xa89   : > { %v2586_v12 = vadd.f32 %v6039_v60, %v2576_v42  ;;  %v4787_v10 = vpop.eup %4786  ;;  %v2470_v49 = vadd.f32 1e-05, %v2461_v21 }
 0xa8a   : > { %v2509_v44 = vmul.f32 %v4785_v9, %v2508_v22  ;;  %v2515_v57 = vmul.f32 %v4787_v10, %v2469_v3  ;;  %vm2521_vm8 = vweird.f32 %v4787_v10 }
 0xa8b   : > { %4459 = vmatmul.msk.f32.gmra.mxu2 %vm447_vm0, %v2586_v12  ;;  %4788 = vrsqrt.f32 %v2470_v49  ;;  %vm2522_vm10 = vmor %vm2520_vm9, %vm2521_vm8  ;;  %vm2530_vm12 = vweird.f32 %v2470_v49 }
 0xa8c   : > { %v2513_v43 = vsel %vm2512_vm7, %v4785_v9, %v2509_v44  ;;  %v2516_v13 = vmul.f32 %v4787_v10, %v2515_v57 }
 0xa8d   : > { %v2567_v46 = vmul.f32 %v2513_v43, %v5988_v62 }
 0xa8e   : > { %v2517_v29 = vmul.f32 0.5, %v2516_v13 }
 0xa8f   : > { %v2577_v58 = vmul.f32 %v6034_v59, %v2567_v46 }
 0xa90   : > { %v2518_v25 = vsub.f32 1.5, %v2517_v29 }
 0xa91   : > { %v4789_v50 = vpop.eup %4788  ;;  %v2587_v40 = vadd.f32 %v6039_v60, %v2577_v58 }
 0xa92   : > { %v2519_v41 = vmul.f32 %v4787_v10, %v2518_v25  ;;  %v2525_v36 = vmul.f32 %v4789_v50, %v2470_v49  ;;  %vm2531_vm11 = vweird.f32 %v4789_v50 }
 0xa93   : > { %4460 = vmatmul.msk.f32.gmra.mxu2 %vm447_vm0, %v2587_v40  ;;  %vm2532_vm13 = vmor %vm2530_vm12, %vm2531_vm11 }
 0xa94   : > { %v2523_v37 = vsel %vm2522_vm10, %v4787_v10, %v2519_v41  ;;  %v2526_v31 = vmul.f32 %v4789_v50, %v2525_v36 }
 0xa95   : > { %v2568_v51 = vmul.f32 %v2523_v37, %v5995_v17 }
 0xa96   : > { %v2527_v30 = vmul.f32 0.5, %v2526_v31 }
 0xa97   : > { %v2578_v62 = vmul.f32 %v6034_v59, %v2568_v51 }
 0xa98   : > { %v2528_v15 = vsub.f32 1.5, %v2527_v30 }
 0xa99   : > { %v2588_v34 = vadd.f32 %v6039_v60, %v2578_v62 }
 0xa9a   : > { %v2529_v33 = vmul.f32 %v4789_v50, %v2528_v15 }
 0xa9b   : > { %4461 = vmatmul.msk.f32.gmra.mxu2 %vm447_vm0, %v2588_v34 }
 0xa9c   : > { %v2533_v35 = vsel %vm2532_vm13, %v4789_v50, %v2529_v33 }
 0xa9d   : > { %v2569_v16 = vmul.f32 %v2533_v35, %v6002_v23 }
 0xa9f   : > { %v2579_v32 = vmul.f32 %v6034_v59, %v2569_v16 }
 0xaa1   : > { %v2589_v52 = vadd.f32 %v6039_v60, %v2579_v32 }
 0xaa3   : > { %4462 = vmatmul.msk.f32.gmra.mxu2 %vm447_vm0, %v2589_v52 }
 0xaaf   : > { %v2449_v17 = vpop.xlane.xlu0 %2448 }
 0xab0   : > { %v2462_v7 = vmul.f32 %v2449_v17, %v5009_v24 }
 0xab2   : > { %v2471_v54 = vadd.f32 1e-05, %v2462_v7 }
 0xab4   : > { %4790 = vrsqrt.f32 %v2471_v54  ;;  %vm2540_vm15 = vweird.f32 %v2471_v54 }
 0xaba   : > { %v4791_v6 = vpop.eup %4790 }
 0xabb   : > { %v2535_v38 = vmul.f32 %v4791_v6, %v2471_v54  ;;  %vm2541_vm14 = vweird.f32 %v4791_v6 }
 0xabc   : > { %vm2542_vm7 = vmor %vm2540_vm15, %vm2541_vm14 }
 0xabd   : > { %v2536_v56 = vmul.f32 %v4791_v6, %v2535_v38 }
 0xabf   : > { %v2537_v47 = vmul.f32 0.5, %v2536_v56 }
 0xac1   : > { %v2538_v63 = vsub.f32 1.5, %v2537_v47 }
 0xac3   : > { %v2539_v2 = vmul.f32 %v4791_v6, %v2538_v63 }
 0xac5   : > { %v2543_v23 = vsel %vm2542_vm7, %v4791_v6, %v2539_v2 }
 0xac6   : > { %v2570_v1 = vmul.f32 %v2543_v23, %v6009_v27 }
 0xac8   : > { %v2580_v9 = vmul.f32 %v6034_v59, %v2570_v1 }
 0xaca   : > { %v2590_v3 = vadd.f32 %v6039_v60, %v2580_v9 }
 0xacc   : > { %4463 = vmatmul.msk.f32.gmra.mxu2 %vm447_vm0, %v2590_v3 }
 0xae0   : > { %v2452_v61 = vpop.xlane.xlu1 %2451 }
 0xae1   : > { %v2463_v39 = vmul.f32 %v2452_v61, %v5009_v24 }
 0xae3   : > { %v2472_v53 = vadd.f32 1e-05, %v2463_v39 }
 0xae5   : > { %4792 = vrsqrt.f32 %v2472_v53  ;;  %vm2550_vm9 = vweird.f32 %v2472_v53 }
 0xae9   : > { %v2455_v5 = vpop.xlane.xlu2 %2454 }
 0xaea   : > { %v2464_v42 = vmul.f32 %v2455_v5, %v5009_v24 }
 0xaeb   : > { %v4793_v8 = vpop.eup %4792 }
 0xaec   : > { %v2545_v19 = vmul.f32 %v4793_v8, %v2472_v53  ;;  %v2473_v21 = vadd.f32 1e-05, %v2464_v42  ;;  %vm2551_vm8 = vweird.f32 %v4793_v8 }
 0xaed   : > { %vm2552_vm10 = vmor %vm2550_vm9, %vm2551_vm8 }
 0xaee   : > { %v2546_v12 = vmul.f32 %v4793_v8, %v2545_v19  ;;  %4794 = vrsqrt.f32 %v2473_v21  ;;  %vm2560_vm12 = vweird.f32 %v2473_v21 }
 0xaf0   : > { %v2547_v27 = vmul.f32 0.5, %v2546_v12 }
 0xaf2   : > { %v2548_v22 = vsub.f32 1.5, %v2547_v27 }
 0xaf4   : > { %v4795_v10 = vpop.eup %4794  ;;  %v2549_v49 = vmul.f32 %v4793_v8, %v2548_v22 }
 0xaf5   : > { %v2555_v44 = vmul.f32 %v4795_v10, %v2473_v21  ;;  %vm2561_vm11 = vweird.f32 %v4795_v10 }
 0xaf6   : > { %v2553_v57 = vsel %vm2552_vm10, %v4793_v8, %v2549_v49  ;;  %vm2562_vm13 = vmor %vm2560_vm12, %vm2561_vm11 }
 0xaf7   : > { %v2556_v43 = vmul.f32 %v4795_v10, %v2555_v44  ;;  %v2571_v13 = vmul.f32 %v2553_v57, %v6021_v0 }
 0xaf9   : > { %v2557_v46 = vmul.f32 0.5, %v2556_v43  ;;  %v2581_v29 = vmul.f32 %v6034_v59, %v2571_v13 }
 0xafb   : > { %v2558_v58 = vsub.f32 1.5, %v2557_v46  ;;  %v2591_v25 = vadd.f32 %v6039_v60, %v2581_v29 }
 0xafd   : > { %v2559_v50 = vmul.f32 %v4795_v10, %v2558_v58  ;;  %4464 = vmatmul.msk.f32.gmra.mxu2 %vm447_vm0, %v2591_v25  ;;  %v6083_v0 = vpop.f32.mrf.mxu2 }
 0xaff   : > { %v2563_v40 = vsel %vm2562_vm13, %v4795_v10, %v2559_v50 }
 0xb00   : > { %v2572_v41 = vmul.f32 %v2563_v40, %v6032_v14 }
 0xb02   : > { %v2582_v36 = vmul.f32 %v6034_v59, %v2572_v41 }
 0xb04   : > { %v2592_v37 = vadd.f32 %v6039_v60, %v2582_v36 }
 0xb06   : > { %4465 = vmatmul.msk.f32.gmra.mxu2 %vm447_vm0, %v2592_v37  ;;  %v6085_v31 = vpop.f32.mrf.mxu2 }
 0xb07   : > { %v6177_v32 = vpack.i.bf16 %v6083_v0, %v6085_v31 }
 0xb0e   : > { %v6087_v51 = vpop.f32.mrf.mxu2 }
 0xb16   : > { %v6089_v30 = vpop.f32.mrf.mxu2 }
 0xb17   : > { %v6153_v33 = vpack.i.bf16 %v6087_v51, %v6089_v30 }
 0xb1e   : > { %v6091_v62 = vpop.f32.mrf.mxu2 }
 0xb26   : > { %v6093_v15 = vpop.f32.mrf.mxu2 }
 0xb27   : > { %v6143_v60 = vpack.i.bf16 %v6091_v62, %v6093_v15 }
 0xb4f   : > { %v6095_v34 = vpop.f32.mrf.mxu2 }
 0xb50   : > { %3008 = vrot.lane.b32.xlu2 %v6095_v34, %s4907_s29 }
 0xb58   : > { %3002 = vrot.lane.b32.xlu2 %v6089_v30, %s4907_s29 }
 0xb60   : > { %2996 = vrot.lane.b32.xlu2 %v6083_v0, %s4907_s29 }
 0xb80   : > { %v6103_v14 = vpop.f32.mrf.mxu2 }
 0xb81   : > { %2687 = vrot.lane.b32.xlu2 %v6103_v14, %s4905_s27  ;;  %3010 = vrot.lane.b32.xlu1 %v6103_v14, %s4907_s29  ;;  %v4647_v35 = vpack.i.bf16 %v6095_v34, %v6103_v14 }
 0xb89   : > { %v6109_v59 = vpop.f32.mrf.mxu2  ;;  %2683 = vrot.lane.b32.xlu2 %v6093_v15, %s4905_s27  ;;  %3004 = vrot.lane.b32.xlu1 %v6091_v62, %s4907_s29 }
 0xb8a   : > { %3012 = vrot.lane.b32.xlu0 %v6109_v59, %s4907_s29 }
 0xb91   : > { %2679 = vrot.lane.b32.xlu2 %v6089_v30, %s4905_s27  ;;  %2998 = vrot.lane.b32.xlu1 %v6085_v31, %s4907_s29 }
 0xb92   : > { %3006 = vrot.lane.b32.xlu0 %v6093_v15, %s4907_s29 }
 0xb99   : > { %2675 = vrot.lane.b32.xlu2 %v6085_v31, %s4905_s27  ;;  %2689 = vrot.lane.b32.xlu1 %v6109_v59, %s4905_s27 }
 0xb9a   : > { %3000 = vrot.lane.b32.xlu0 %v6087_v51, %s4907_s29 }
 0xba1   : > { %2988 = vrot.lane.b32.xlu2 %v6093_v15, %s4908_s30  ;;  %2685 = vrot.lane.b32.xlu1 %v6095_v34, %s4905_s27 }
 0xba2   : > { %2978 = vrot.lane.b32.xlu0 %v6083_v0, %s4908_s30 }
 0xba9   : > { %2994 = vrot.lane.b32.xlu2 %v6109_v59, %s4908_s30  ;;  %2681 = vrot.lane.b32.xlu1 %v6091_v62, %s4905_s27 }
 0xbaa   : > { %2980 = vrot.lane.b32.xlu0 %v6085_v31, %s4908_s30  ;;  %v3009_v16 = vpop.permute.xlu2 %3008 }
 0xbb1   : > { %4633 = vrot.lane.b32.xlu2 %v6143_v60, %s4909_s12  ;;  %2677 = vrot.lane.b32.xlu1 %v6087_v51, %s4905_s27 }
 0xbb2   : > { %2982 = vrot.lane.b32.xlu0 %v6087_v51, %s4908_s30  ;;  %v3003_v52 = vpop.permute.xlu2 %3002 }
 0xbb9   : > { %4638 = vrot.lane.b32.xlu2 %v6153_v33, %s4909_s12  ;;  %2673 = vrot.lane.b32.xlu1 %v6083_v0, %s4905_s27 }
 0xbba   : > { %2984 = vrot.lane.b32.xlu0 %v6089_v30, %s4908_s30  ;;  %v2997_v17 = vpop.permute.xlu2 %2996 }
 0xbc1   : > { %4648 = vrot.lane.b32.xlu2 %v4647_v35, %s4906_s28  ;;  %2992 = vrot.lane.b32.xlu1 %v6103_v14, %s4908_s30 }
 0xbc2   : > { %2986 = vrot.lane.b32.xlu0 %v6091_v62, %s4908_s30 }
 0xbc9   : > { %3218 = vrot.lane.b32.xlu1 %v6109_v59, %s4909_s12 }
 0xbca   : > { %2990 = vrot.lane.b32.xlu0 %v6095_v34, %s4908_s30 }
 0xbd1   : > { %2895 = vrot.lane.b32.xlu1 %v6109_v59, %s4906_s28 }
 0xbd2   : > { %4628 = vrot.lane.b32.xlu0 %v4647_v35, %s4909_s12 }
 0xbda   : > { %4643 = vrot.lane.b32.xlu0 %v6177_v32, %s4909_s12 }
 0xbdb   : > { %v2688_v7 = vpop.permute.xlu2 %2687 }
 0xbe3   : > { %v2684_v6 = vpop.permute.xlu2 %2683 }
 0xbeb   : > { %v2680_v2 = vpop.permute.xlu2 %2679 }
 0xbf3   : > { %v3011_v54 = vpop.permute.xlu1 %3010  ;;  %v2676_v9 = vpop.permute.xlu2 %2675 }
 0xbfb   : > { %v3005_v38 = vpop.permute.xlu1 %3004  ;;  %v2989_v39 = vpop.permute.xlu2 %2988 }
 0xbfc   : > { %v3013_v56 = vpop.permute.xlu0 %3012 }
 0xbfd   : > { %4494 = vmatpush.xpose.msk.msrb.mxu0 %vm447_vm0, %v3013_v56 }
 0xc01   : > { %4495 = vmatpush.xpose.msk.msrb.mxu0 %vm447_vm0, %v3011_v54 }
 0xc03   : > { %v2999_v47 = vpop.permute.xlu1 %2998  ;;  %v2995_v42 = vpop.permute.xlu2 %2994 }
 0xc04   : > { %v3007_v63 = vpop.permute.xlu0 %3006 }
 0xc05   : > { %4496 = vmatpush.xpose.msk.msrb.mxu0 %vm447_vm0, %v3009_v16 }
 0xc09   : > { %4497 = vmatpush.xpose.msk.msrb.mxu0 %vm447_vm0, %v3007_v63 }
 0xc0b   : > { %v2690_v23 = vpop.permute.xlu1 %2689  ;;  %v4634_v27 = vpop.permute.xlu2 %4633 }
 0xc0c   : > { %v3001_v1 = vpop.permute.xlu0 %3000  ;;  %4466 = vmatpush.xpose.msk.msrb.mxu1 %vm447_vm0, %v2690_v23  ;;  %v4635_v40 = vunpack.i.l.bf16 %v4634_v27  ;;  %v4636_v41 = vunpack.i.h.bf16 %v4634_v27 }
 0xc0d   : > { %4498 = vmatpush.xpose.msk.msrb.mxu0 %vm447_vm0, %v3005_v38 }
 0xc10   : > { %4467 = vmatpush.xpose.msk.msrb.mxu1 %vm447_vm0, %v2688_v7 }
 0xc11   : > { %4499 = vmatpush.xpose.msk.msrb.mxu0 %vm447_vm0, %v3003_v52 }
 0xc13   : > { %v2686_v3 = vpop.permute.xlu1 %2685  ;;  %v4639_v49 = vpop.permute.xlu2 %4638 }
 0xc14   : > { %v2979_v61 = vpop.permute.xlu0 %2978  ;;  %4468 = vmatpush.xpose.msk.msrb.mxu1 %vm447_vm0, %v2686_v3  ;;  %v4640_v36 = vunpack.i.l.bf16 %v4639_v49 }
 0xc15   : > { %4500 = vmatpush.xpose.msk.msrb.mxu0 %vm447_vm0, %v3001_v1 }
 0xc18   : > { %4469 = vmatpush.xpose.msk.msrb.mxu1 %vm447_vm0, %v2684_v6 }
 0xc19   : > { %4501 = vmatpush.xpose.msk.msrb.mxu0 %vm447_vm0, %v2999_v47 }
 0xc1b   : > { %v2682_v53 = vpop.permute.xlu1 %2681  ;;  %v4649_v43 = vpop.permute.xlu2 %4648 }
 0xc1c   : > { %v2981_v5 = vpop.permute.xlu0 %2980  ;;  %4470 = vmatpush.xpose.msk.msrb.mxu1 %vm447_vm0, %v2682_v53  ;;  %v4650_v46 = vunpack.i.l.bf16 %v4649_v43  ;;  %v4651_v25 = vunpack.i.h.bf16 %v4649_v43 }
 0xc1d   : > { %4502 = vmatpush.xpose.msk.msrb.mxu0 %vm447_vm0, %v2997_v17 }
 0xc20   : > { %4503 = vmatmul.msk.f32.vlgmr.msrb.gmra.mxu0 %vm447_vm0, %v2979_v61  ;;  %4471 = vmatpush.xpose.msk.msrb.mxu1 %vm447_vm0, %v2680_v2 }
 0xc23   : > { %v2678_v8 = vpop.permute.xlu1 %2677 }
 0xc24   : > { %v2983_v19 = vpop.permute.xlu0 %2982  ;;  %4472 = vmatpush.xpose.msk.msrb.mxu1 %vm447_vm0, %v2678_v8 }
 0xc28   : > { %4504 = vmatmul.msk.f32.gmra.mxu0 %vm447_vm0, %v2981_v5  ;;  %4473 = vmatpush.xpose.msk.msrb.mxu1 %vm447_vm0, %v2676_v9 }
 0xc2b   : > { %v2674_v21 = vpop.permute.xlu1 %2673 }
 0xc2c   : > { %v2985_v12 = vpop.permute.xlu0 %2984  ;;  %4474 = vmatpush.xpose.msk.msrb.mxu1 %vm447_vm0, %v2674_v21 }
 0xc2f   : > { %4475 = vmatmul.msk.f32.vlgmr.msrb.gmra.mxu1 %vm447_vm0, %v6083_v0  ;;  %v4641_v0 = vunpack.i.h.bf16 %v4639_v49 }
 0xc30   : > { %4505 = vmatmul.msk.f32.gmra.mxu0 %vm447_vm0, %v2983_v19 }
 0xc33   : > { %v2993_v22 = vpop.permute.xlu1 %2992 }
 0xc34   : > { %v2987_v10 = vpop.permute.xlu0 %2986 }
 0xc37   : > { %4476 = vmatmul.msk.f32.gmra.mxu1 %vm447_vm0, %v6085_v31 }
 0xc38   : > { %4506 = vmatmul.msk.f32.gmra.mxu0 %vm447_vm0, %v2985_v12 }
 0xc3b   : > { %v3219_v44 = vpop.permute.xlu1 %3218 }
 0xc3c   : > { %v2991_v57 = vpop.permute.xlu0 %2990  ;;  %4512 = vmatpush.msk.msrb.mxu2 %vm1015_vm2, %v3219_v44 }
 0xc3f   : > { %4477 = vmatmul.msk.f32.gmra.mxu1 %vm447_vm0, %v6087_v51 }
 0xc40   : > { %4507 = vmatmul.msk.f32.gmra.mxu0 %vm447_vm0, %v2987_v10 }
 0xc43   : > { %v2896_v13 = vpop.permute.xlu1 %2895 }
 0xc44   : > { %v4629_v29 = vpop.permute.xlu0 %4628  ;;  %4484 = vmatpush.msk.msrb.mxu3 %vm1015_vm2, %v2896_v13 }
 0xc45   : > { %v4630_v58 = vunpack.i.l.bf16 %v4629_v29  ;;  %v4631_v50 = vunpack.i.h.bf16 %v4629_v29 }
 0xc46   : > { %2942 = vmatpush.msrb.mxu3 %v4650_v46 }
 0xc47   : > { %3265 = vmatpush.msrb.mxu2 %v4630_v58  ;;  %4478 = vmatmul.msk.f32.gmra.mxu1 %vm447_vm0, %v6089_v30 }
 0xc48   : > { %4508 = vmatmul.msk.f32.gmra.mxu0 %vm447_vm0, %v2989_v39  ;;  %2943 = vmatpush.msrb.mxu3 %v4651_v25 }
 0xc49   : > { %3266 = vmatpush.msrb.mxu2 %v4631_v50 }
 0xc4b   : > { %3267 = vmatpush.msrb.mxu2 %v4635_v40 }
 0xc4c   : > { %v4644_v37 = vpop.permute.xlu0 %4643 }
 0xc4d   : > { %3268 = vmatpush.msrb.mxu2 %v4636_v41  ;;  %v4645_v31 = vunpack.i.l.bf16 %v4644_v37  ;;  %v4646_v51 = vunpack.i.h.bf16 %v4644_v37 }
 0xc4f   : > { %3269 = vmatpush.msrb.mxu2 %v4640_v36  ;;  %4479 = vmatmul.msk.f32.gmra.mxu1 %vm447_vm0, %v6091_v62 }
 0xc50   : > { %4509 = vmatmul.msk.f32.gmra.mxu0 %vm447_vm0, %v2991_v57 }
 0xc51   : > { %3270 = vmatpush.msrb.mxu2 %v4641_v0 }
 0xc53   : > { %3271 = vmatpush.msrb.mxu2 %v4645_v31 }
 0xc55   : > { %3272 = vmatpush.msrb.mxu2 %v4646_v51 }
 0xc57   : > { %4480 = vmatmul.msk.f32.gmra.mxu1 %vm447_vm0, %v6093_v15 }
 0xc58   : > { %4510 = vmatmul.msk.f32.gmra.mxu0 %vm447_vm0, %v2993_v22 }
 0xc5f   : > { %4481 = vmatmul.msk.f32.gmra.mxu1 %vm447_vm0, %v6095_v34 }
 0xc60   : > { %4511 = vmatmul.msk.f32.gmra.mxu0 %vm447_vm0, %v2995_v42 }
 0xc67   : > { %4482 = vmatmul.msk.f32.gmra.mxu1 %vm447_vm0, %v6103_v14 }
 0xc6f   : > { %4483 = vmatmul.msk.f32.gmra.mxu1 %vm447_vm0, %v6109_v59 }
 0xc9d   : > { %v3067_v30 = vpop.f32.mrf.mxu0 }
 0xc9e   : > { %v6228_v62 = vmul.f32 0.35355338, %v3067_v30 }
 0xca0   : > { %v3103_v35 = vsel %vm861_vm3, %v6228_v62, -inf }
 0xca1   : > { %3104 = vmax.xlane.f32.xlu0 %v3103_v35 }
 0xca5   : > { %v3070_v15 = vpop.f32.mrf.mxu0 }
 0xca6   : > { %v6232_v16 = vmul.f32 0.35355338, %v3070_v15 }
 0xca8   : > { %v3106_v34 = vsel %vm861_vm3, %v6232_v16, -inf }
 0xca9   : > { %3107 = vmax.xlane.f32.xlu1 %v3106_v34 }
 0xcac   : > { %v2744_v52 = vpop.f32.mrf.mxu1 }
 0xcad   : > { %v6236_v17 = vmul.f32 0.35355338, %v2744_v52  ;;  %v3073_v14 = vpop.f32.mrf.mxu0 }
 0xcae   : > { %v6248_v63 = vmul.f32 0.35355338, %v3073_v14 }
 0xcaf   : > { %v2780_v59 = vsel %vm861_vm3, %v6236_v17, -inf }
 0xcb0   : > { %2781 = vmax.xlane.f32.xlu2 %v2780_v59  ;;  %v3109_v3 = vsel %vm861_vm3, %v6248_v63, -inf }
 0xcb4   : > { %v2747_v7 = vpop.f32.mrf.mxu1 }
 0xcb5   : > { %v6240_v54 = vmul.f32 0.35355338, %v2747_v7  ;;  %v3076_v6 = vpop.f32.mrf.mxu0 }
 0xcb6   : > { %v6242_v38 = vmul.f32 0.35355338, %v3076_v6 }
 0xcb7   : > { %v2783_v56 = vsel %vm861_vm3, %v6240_v54, -inf }
 0xcb8   : > { %2784 = vmax.xlane.f32.xlu2 %v2783_v56  ;;  %v3112_v47 = vsel %vm861_vm3, %v6242_v38, -inf }
 0xcb9   : > { %3113 = vmax.xlane.f32.xlu0 %v3112_v47 }
 0xcbc   : > { %v2750_v2 = vpop.f32.mrf.mxu1 }
 0xcbd   : > { %v6250_v23 = vmul.f32 0.35355338, %v2750_v2  ;;  %v3079_v1 = vpop.f32.mrf.mxu0 }
 0xcbe   : > { %v6264_v19 = vmul.f32 0.35355338, %v3079_v1 }
 0xcbf   : > { %v2786_v9 = vsel %vm861_vm3, %v6250_v23, -inf }
 0xcc0   : > { %2787 = vmax.xlane.f32.xlu1 %v2786_v9  ;;  %3110 = vmax.xlane.f32.xlu2 %v3109_v3  ;;  %v3115_v10 = vsel %vm861_vm3, %v6264_v19, -inf }
 0xcc4   : > { %v2753_v61 = vpop.f32.mrf.mxu1 }
 0xcc5   : > { %v6256_v39 = vmul.f32 0.35355338, %v2753_v61  ;;  %v3082_v53 = vpop.f32.mrf.mxu0 }
 0xcc6   : > { %v6258_v5 = vmul.f32 0.35355338, %v3082_v53 }
 0xcc7   : > { %v2789_v42 = vsel %vm861_vm3, %v6256_v39, -inf }
 0xcc8   : > { %2790 = vmax.xlane.f32.xlu1 %v2789_v42  ;;  %v3118_v8 = vsel %vm861_vm3, %v6258_v5, -inf }
 0xcc9   : > { %3119 = vmax.xlane.f32.xlu0 %v3118_v8 }
 0xccc   : > { %v2756_v21 = vpop.f32.mrf.mxu1 }
 0xccd   : > { %v6266_v12 = vmul.f32 0.35355338, %v2756_v21  ;;  %v3085_v27 = vpop.f32.mrf.mxu0 }
 0xcce   : > { %v6276_v13 = vmul.f32 0.35355338, %v3085_v27 }
 0xccf   : > { %v2792_v22 = vsel %vm861_vm3, %v6266_v12, -inf }
 0xcd0   : > { %2793 = vmax.xlane.f32.xlu2 %v2792_v22  ;;  %3116 = vmax.xlane.f32.xlu1 %v3115_v10  ;;  %v3121_v25 = vsel %vm861_vm3, %v6276_v13, -inf }
 0xcd4   : > { %v2759_v49 = vpop.f32.mrf.mxu1 }
 0xcd5   : > { %v6272_v44 = vmul.f32 0.35355338, %v2759_v49  ;;  %v3088_v57 = vpop.f32.mrf.mxu0 }
 0xcd6   : > { %v6284_v40 = vmul.f32 0.35355338, %v3088_v57 }
 0xcd7   : > { %v2795_v43 = vsel %vm861_vm3, %v6272_v44, -inf }
 0xcd8   : > { %2796 = vmax.xlane.f32.xlu2 %v2795_v43  ;;  %v3124_v36 = vsel %vm861_vm3, %v6284_v40, -inf }
 0xcdc   : > { %v2762_v46 = vpop.f32.mrf.mxu1 }
 0xcdd   : > { %v6278_v29 = vmul.f32 0.35355338, %v2762_v46  ;;  %v3091_v50 = vpop.f32.mrf.mxu0 }
 0xcde   : > { %v6286_v41 = vmul.f32 0.35355338, %v3091_v50 }
 0xcdf   : > { %v2798_v58 = vsel %vm861_vm3, %v6278_v29, -inf }
 0xce0   : > { %2799 = vmax.xlane.f32.xlu1 %v2798_v58  ;;  %3122 = vmax.xlane.f32.xlu2 %v3121_v25  ;;  %v3127_v37 = vsel %vm886_vm4, %v6286_v41, -inf }
 0xce4   : > { %v2765_v9 = vpop.f32.mrf.mxu1 }
 0xce8   : > { %3125 = vmax.xlane.f32.xlu2 %v3124_v36  ;;  %3128 = vmax.xlane.f32.xlu1 %v3127_v37 }
 0xd14   : > { %v3105_v0 = vpop.xlane.xlu0 %3104 }
 0xd15   : > { %v3130_v31 = vsub.f32 %v6228_v62, %v3105_v0 }
 0xd17   : > { %v3139_v51 = vmul.f32 1.442695, %v3130_v31 }
 0xd19   : > { %4796 = vpow2.f32 %v3139_v51 }
 0xd1c   : > { %v3108_v30 = vpop.xlane.xlu1 %3107 }
 0xd1d   : > { %v3131_v35 = vsub.f32 %v6232_v16, %v3108_v30 }
 0xd1f   : > { %v6294_v15 = vpop.eup %4796  ;;  %v3141_v34 = vmul.f32 1.442695, %v3131_v35 }
 0xd20   : > { %v3157_v52 = vsel %vm861_vm3, %v6294_v15, 0.0 }
 0xd21   : > { %4798 = vpow2.f32 %v3141_v34  ;;  %3158 = vadd.xlane.f32.xlu0 %v3157_v52  ;;  %v2768_v52 = vpop.f32.mrf.mxu1 }
 0xd23   : > { %v2782_v14 = vpop.xlane.xlu2 %2781 }
 0xd24   : > { %v2807_v59 = vsub.f32 %v6236_v17, %v2782_v14  ;;  %v6308_v17 = vmul.f32 0.35355338, %v2765_v9 }
 0xd26   : > { %v2816_v7 = vmul.f32 1.442695, %v2807_v59 }
 0xd27   : > { %v6299_v6 = vpop.eup %4798 }
 0xd28   : > { %4800 = vpow2.f32 %v2816_v7  ;;  %v3160_v62 = vsel %vm861_vm3, %v6299_v6, 0.0  ;;  %v6344_v7 = vmul.f32 0.35355338, %v2768_v52 }
 0xd29   : > { %3161 = vadd.xlane.f32.xlu1 %v3160_v62 }
 0xd2b   : > { %v2785_v8 = vpop.xlane.xlu2 %2784 }
 0xd2c   : > { %v3114_v16 = vpop.xlane.xlu0 %3113  ;;  %v2808_v58 = vsub.f32 %v6240_v54, %v2785_v8 }
 0xd2d   : > { %v3133_v56 = vsub.f32 %v6242_v38, %v3114_v16  ;;  %v2801_v38 = vsel %vm861_vm3, %v6308_v17, -inf }
 0xd2e   : > { %v6304_v47 = vpop.eup %4800 }
 0xd2f   : > { %v3145_v2 = vmul.f32 1.442695, %v3133_v56  ;;  %v2834_v1 = vsel %vm861_vm3, %v6304_v47, 0.0 }
 0xd30   : > { %2835 = vadd.xlane.f32.xlu2 %v2834_v1 }
 0xd31   : > { %4802 = vpow2.f32 %v3145_v2 }
 0xd33   : > { %v2788_v3 = vpop.xlane.xlu1 %2787  ;;  %v3111_v10 = vpop.xlane.xlu2 %3110 }
 0xd34   : > { %v2809_v30 = vsub.f32 %v6250_v23, %v2788_v3  ;;  %v2804_v23 = vsel %vm886_vm4, %v6344_v7, -inf }
 0xd35   : > { %4653 = vrot.lane.b32.xlu0 %v6143_v60, %s4906_s28  ;;  %v3132_v60 = vsub.f32 %v6248_v63, %v3111_v10 }
 0xd36   : > { %v2820_v59 = vmul.f32 1.442695, %v2809_v30 }
 0xd37   : > { %v6312_v61 = vpop.eup %4802  ;;  %v3143_v43 = vmul.f32 1.442695, %v3132_v60 }
 0xd38   : > { %2802 = vmax.xlane.f32.xlu2 %v2801_v38  ;;  %v3166_v53 = vsel %vm861_vm3, %v6312_v61, 0.0 }
 0xd39   : > { %3167 = vadd.xlane.f32.xlu1 %v3166_v53 }
 0xd3b   : > { %v2791_v42 = vpop.xlane.xlu1 %2790 }
 0xd3c   : > { %v3120_v25 = vpop.xlane.xlu0 %3119 }
 0xd3d   : > { %v3135_v63 = vsub.f32 %v6258_v5, %v3120_v25 }
 0xd3f   : > { %v3149_v0 = vmul.f32 1.442695, %v3135_v63 }
 0xd43   : > { %v3117_v21 = vpop.xlane.xlu1 %3116  ;;  %v2794_v46 = vpop.xlane.xlu2 %2793 }
 0xd44   : > { %v3134_v27 = vsub.f32 %v6264_v19, %v3117_v21  ;;  %v2818_v19 = vmul.f32 1.442695, %v2808_v58 }
 0xd46   : > { %v3147_v22 = vmul.f32 1.442695, %v3134_v27 }
 0xd48   : > { %4804 = vpow2.f32 %v3147_v22  ;;  %v2811_v22 = vsub.f32 %v6266_v12, %v2794_v46 }
 0xd49   : > { %4806 = vpow2.f32 %v3143_v43 }
 0xd4a   : > { %4808 = vpow2.f32 %v2818_v19  ;;  %v2824_v10 = vmul.f32 1.442695, %v2811_v22 }
 0xd4b   : > { %v2797_v36 = vpop.xlane.xlu2 %2796  ;;  %4810 = vpow2.f32 %v3149_v0 }
 0xd4c   : > { %v2812_v62 = vsub.f32 %v6272_v44, %v2797_v36 }
 0xd4e   : > { %v6320_v49 = vpop.eup %4804 }
 0xd4f   : > { %v3169_v57 = vsel %vm861_vm3, %v6320_v49, 0.0  ;;  %v6327_v50 = vpop.eup %4806 }
 0xd50   : > { %3170 = vadd.xlane.f32.xlu2 %v3169_v57  ;;  %v3163_v37 = vsel %vm861_vm3, %v6327_v50, 0.0  ;;  %v6332_v31 = vpop.eup %4808 }
 0xd51   : > { %v6339_v5 = vpop.eup %4810 }
 0xd52   : > { %4658 = vrot.lane.b32.xlu1 %v6153_v33, %s4906_s28  ;;  %v2837_v33 = vsel %vm861_vm3, %v6332_v31, 0.0  ;;  %v3172_v34 = vsel %vm861_vm3, %v6339_v5, 0.0 }
 0xd53   : > { %v3123_v54 = vpop.xlane.xlu2 %3122  ;;  %v2800_v14 = vpop.xlane.xlu1 %2799 }
 0xd54   : > { %v3136_v51 = vsub.f32 %v6276_v13, %v3123_v54  ;;  %v2826_v13 = vmul.f32 1.442695, %v2812_v62 }
 0xd56   : > { %v3151_v35 = vmul.f32 1.442695, %v3136_v51 }
 0xd58   : > { %4812 = vpow2.f32 %v3151_v35 }
 0xd59   : > { %4814 = vpow2.f32 %v2820_v59 }
 0xd5a   : > { %4816 = vpow2.f32 %v2826_v13 }
 0xd5b   : > { %v3129_v2 = vpop.xlane.xlu1 %3128  ;;  %v3126_v44 = vpop.xlane.xlu2 %3125 }
 0xd5c   : > { %v3137_v53 = vsub.f32 %v6284_v40, %v3126_v44  ;;  %v2813_v40 = vsub.f32 %v6278_v29, %v2800_v14 }
 0xd5e   : > { %v6350_v16 = vpop.eup %4812  ;;  %v3153_v27 = vmul.f32 1.442695, %v3137_v53  ;;  %v2828_v58 = vmul.f32 1.442695, %v2813_v40 }
 0xd5f   : > { %3164 = vadd.xlane.f32.xlu0 %v3163_v37  ;;  %v6352_v1 = vpop.eup %4814  ;;  %v3175_v9 = vsel %vm861_vm3, %v6350_v16, 0.0 }
 0xd60   : > { %v2840_v3 = vsel %vm861_vm3, %v6352_v1, 0.0  ;;  %v6359_v38 = vpop.eup %4816 }
 0xd61   : > { %v2849_v21 = vsel %vm861_vm3, %v6359_v38, 0.0 }
 0xd67   : > { %2838 = vadd.xlane.f32.xlu0 %v2837_v33 }
 0xd68   : > { %4663 = vrot.lane.b32.xlu2 %v6177_v32, %s4906_s28  ;;  %v2810_v32 = vsub.f32 %v6256_v39, %v2791_v42  ;;  %v3138_v39 = vsub.f32 %v6286_v41, %v3129_v2 }
 0xd6a   : > { %v2822_v56 = vmul.f32 1.442695, %v2810_v32  ;;  %v3155_v42 = vmul.f32 1.442695, %v3138_v39 }
 0xd6c   : > { %4818 = vpow2.f32 %v2822_v56 }
 0xd6d   : > { %4820 = vpow2.f32 %v3155_v42 }
 0xd6e   : > { %4822 = vpow2.f32 %v3153_v27 }
 0xd6f   : > { %3173 = vadd.xlane.f32.xlu0 %v3172_v34  ;;  %4824 = vpow2.f32 %v2824_v10 }
 0xd70   : > { %4826 = vpow2.f32 %v2828_v58 }
 0xd72   : > { %v6362_v8 = vpop.eup %4818 }
 0xd73   : > { %v2843_v41 = vsel %vm861_vm3, %v6362_v8, 0.0  ;;  %v6369_v60 = vpop.eup %4820 }
 0xd74   : > { %v6372_v57 = vpop.eup %4822  ;;  %v3181_v43 = vsel %vm886_vm4, %v6369_v60, 0.0 }
 0xd75   : > { %v3178_v12 = vsel %vm861_vm3, %v6372_v57, 0.0  ;;  %v6378_v46 = vpop.eup %4824 }
 0xd76   : > { %v2846_v29 = vsel %vm861_vm3, %v6378_v46, 0.0  ;;  %v6382_v25 = vpop.eup %4826 }
 0xd77   : > { %2805 = vmax.xlane.f32.xlu0 %v2804_v23  ;;  %v2852_v0 = vsel %vm861_vm3, %v6382_v25, 0.0 }
 0xd7c   : > { %3176 = vadd.xlane.f32.xlu1 %v3175_v9 }
 0xd7f   : > { %2841 = vadd.xlane.f32.xlu0 %v2840_v3 }
 0xd84   : > { %2850 = vadd.xlane.f32.xlu1 %v2849_v21 }
 0xd87   : > { %2844 = vadd.xlane.f32.xlu0 %v2843_v41 }
 0xd8f   : > { %3182 = vadd.xlane.f32.xlu0 %v3181_v43 }
 0xd91   : > { %3179 = vadd.xlane.f32.xlu2 %v3178_v12 }
 0xd94   : > { %v3159_v19 = vpop.xlane.xlu0 %3158 }
 0xd95   : > { %4828 = vrcp.f32 %v3159_v19 }
 0xd97   : > { %2847 = vadd.xlane.f32.xlu0 %v2846_v29 }
 0xd9b   : > { %v4829_v63 = vpop.eup %4828 }
 0xd9c   : > { %v3193_v36 = vmul.f32 %v4829_v63, %v6294_v15  ;;  %v3162_v37 = vpop.xlane.xlu1 %3161 }
 0xd9d   : > { %4830 = vrcp.f32 %v3162_v37 }
 0xd9e   : > { %4513 = vmatmul.msk.f32.vlgmr.msrb.gmra.mxu2 %vm861_vm3, %v3193_v36 }
 0xd9f   : > { %2853 = vadd.xlane.f32.xlu0 %v2852_v0 }
 0xda3   : > { %v4831_v33 = vpop.eup %4830  ;;  %v2836_v54 = vpop.xlane.xlu2 %2835 }
 0xda4   : > { %v3194_v51 = vmul.f32 %v4831_v33, %v6299_v6 }
 0xda6   : > { %4514 = vmatmul.msk.f32.gmra.mxu2 %vm861_vm3, %v3194_v51 }
 0xda7   : > { %v4654_v30 = vpop.permute.xlu0 %4653 }
 0xda8   : > { %v4655_v35 = vunpack.i.l.bf16 %v4654_v30  ;;  %v4656_v34 = vunpack.i.h.bf16 %v4654_v30 }
 0xdaa   : > { %2944 = vmatpush.msrb.mxu3 %v4655_v35 }
 0xdab   : > { %v2803_v52 = vpop.xlane.xlu2 %2802 }
 0xdac   : > { %v2814_v15 = vsub.f32 %v6308_v17, %v2803_v52  ;;  %2945 = vmatpush.msrb.mxu3 %v4656_v34  ;;  %v3168_v32 = vpop.xlane.xlu1 %3167 }
 0xdae   : > { %v2830_v14 = vmul.f32 1.442695, %v2814_v15 }
 0xdb0   : > { %4832 = vpow2.f32 %v2830_v14 }
 0xdb1   : > { %4834 = vrcp.f32 %v2836_v54 }
 0xdb6   : > { %v6391_v59 = vpop.eup %4832 }
 0xdb7   : > { %v2855_v62 = vsel %vm861_vm3, %v6391_v59, 0.0  ;;  %v4835_v9 = vpop.eup %4834 }
 0xdb8   : > { %2856 = vadd.xlane.f32.xlu1 %v2855_v62  ;;  %v2870_v39 = vmul.f32 %v4835_v9, %v6304_v47 }
 0xdc3   : > { %v3171_v6 = vpop.xlane.xlu2 %3170 }
 0xdc4   : > { %v4659_v13 = vpop.permute.xlu1 %4658 }
 0xdc5   : > { %v4660_v23 = vunpack.i.l.bf16 %v4659_v13  ;;  %v4661_v56 = vunpack.i.h.bf16 %v4659_v13 }
 0xdc7   : > { %2946 = vmatpush.msrb.mxu3 %v4660_v23 }
 0xdc9   : > { %2947 = vmatpush.msrb.mxu3 %v4661_v56 }
 0xdcb   : > { %v4664_v2 = vpop.permute.xlu2 %4663 }
 0xdcc   : > { %v4665_v17 = vunpack.i.l.bf16 %v4664_v2  ;;  %v4666_v44 = vunpack.i.h.bf16 %v4664_v2 }
 0xdce   : > { %2948 = vmatpush.msrb.mxu3 %v4665_v17 }
 0xdd0   : > { %2949 = vmatpush.msrb.mxu3 %v4666_v44 }
 0xdd1   : > { %4485 = vmatmul.msk.f32.vlgmr.msrb.gmra.mxu3 %vm861_vm3, %v2870_v39 }
 0xdd2   : > { %v3165_v3 = vpop.xlane.xlu0 %3164 }
 0xdd3   : > { %4836 = vrcp.f32 %v3165_v3  ;;  %v394_v3 = vld [vmem:[%s6856_s3 + $0x18] sm:$0xff] }
 0xdd4   : > { %4838 = vrcp.f32 %v3168_v32  ;;  %3388 = vmatpush.msra.mxu1 %v394_v3 }
 0xdd9   : > { %v4837_v53 = vpop.eup %4836 }
 0xdda   : > { %v2839_v42 = vpop.xlane.xlu0 %2838  ;;  %v3195_v21 = vmul.f32 %v4837_v53, %v6327_v50  ;;  %v4839_v27 = vpop.eup %4838 }
 0xddb   : > { %4840 = vrcp.f32 %v2839_v42  ;;  %v3196_v47 = vmul.f32 %v4839_v27, %v6312_v61 }
 0xddc   : > { %4515 = vmatmul.msk.f32.gmra.mxu2 %vm861_vm3, %v3195_v21  ;;  %4842 = vrcp.f32 %v3171_v6 }
 0xde1   : > { %v4841_v22 = vpop.eup %4840 }
 0xde2   : > { %v3174_v41 = vpop.xlane.xlu0 %3173  ;;  %v2871_v10 = vmul.f32 %v4841_v22, %v6332_v31  ;;  %v4843_v40 = vpop.eup %4842 }
 0xde3   : > { %4844 = vrcp.f32 %v3174_v41  ;;  %v3197_v50 = vmul.f32 %v4843_v40, %v6320_v49 }
 0xde4   : > { %4486 = vmatmul.msk.f32.gmra.mxu3 %vm861_vm3, %v2871_v10  ;;  %4516 = vmatmul.msk.f32.gmra.mxu2 %vm861_vm3, %v3196_v47  ;;  %v398_v10 = vld [vmem:[%s6857_s4 + $0x18] sm:$0xff] }
 0xde9   : > { %v4845_v19 = vpop.eup %4844 }
 0xdea   : > { %v2806_v43 = vpop.xlane.xlu0 %2805  ;;  %v3198_v61 = vmul.f32 %v4845_v19, %v6339_v5 }
 0xdeb   : > { %v2815_v58 = vsub.f32 %v6344_v7, %v2806_v43 }
 0xdec   : > { %4517 = vmatmul.msk.f32.gmra.mxu2 %vm861_vm3, %v3197_v50 }
 0xded   : > { %v2832_v12 = vmul.f32 1.442695, %v2815_v58  ;;  %v397_v58 = vld [vmem:[%s6857_s4 + $0x10] sm:$0xff] }
 0xdef   : > { %4846 = vpow2.f32 %v2832_v12  ;;  %v3177_v29 = vpop.xlane.xlu1 %3176 }
 0xdf0   : > { %4848 = vrcp.f32 %v3177_v29 }
 0xdf2   : > { %v2842_v31 = vpop.xlane.xlu0 %2841 }
 0xdf3   : > { %4850 = vrcp.f32 %v2842_v31 }
 0xdf4   : > { %4518 = vmatmul.msk.f32.gmra.mxu2 %vm861_vm3, %v3198_v61 }
 0xdf5   : > { %v4847_v63 = vpop.eup %4846 }
 0xdf6   : > { %v2858_v36 = vsel %vm886_vm4, %v4847_v63, 0.0  ;;  %v4849_v37 = vpop.eup %4848 }
 0xdf7   : > { %2859 = vadd.xlane.f32.xlu0 %v2858_v36  ;;  %v3199_v33 = vmul.f32 %v4849_v37, %v6350_v16  ;;  %v2851_v16 = vpop.xlane.xlu1 %2850 }
 0xdf9   : > { %v4851_v49 = vpop.eup %4850 }
 0xdfa   : > { %v2845_v7 = vpop.xlane.xlu0 %2844  ;;  %v2872_v0 = vmul.f32 %v4851_v49, %v6352_v1 }
 0xdfb   : > { %4852 = vrcp.f32 %v2845_v7 }
 0xdfc   : > { %4487 = vmatmul.msk.f32.gmra.mxu3 %vm861_vm3, %v2872_v0  ;;  %4519 = vmatmul.msk.f32.gmra.mxu2 %vm861_vm3, %v3199_v33 }
 0xe01   : > { %v4853_v5 = vpop.eup %4852 }
 0xe02   : > { %v3183_v54 = vpop.xlane.xlu0 %3182  ;;  %v2873_v51 = vmul.f32 %v4853_v5, %v6362_v8 }
 0xe04   : > { %4488 = vmatmul.msk.f32.gmra.mxu3 %vm861_vm3, %v2873_v51  ;;  %v3180_v30 = vpop.xlane.xlu2 %3179 }
 0xe05   : > { %4854 = vrcp.f32 %v3180_v30 }
 0xe0a   : > { %v2848_v35 = vpop.xlane.xlu0 %2847 }
 0xe0b   : > { %4856 = vrcp.f32 %v2848_v35  ;;  %v4855_v34 = vpop.eup %4854 }
 0xe0c   : > { %4858 = vrcp.f32 %v3183_v54  ;;  %v3200_v1 = vmul.f32 %v4855_v34, %v6372_v57 }
 0xe0d   : > { %4860 = vrcp.f32 %v2851_v16 }
 0xe0e   : > { %4520 = vmatmul.msk.f32.gmra.mxu2 %vm861_vm3, %v3200_v1 }
 0xe11   : > { %v4857_v52 = vpop.eup %4856 }
 0xe12   : > { %v4859_v15 = vpop.eup %4858  ;;  %v2874_v14 = vmul.f32 %v4857_v52, %v6378_v46  ;;  %v2854_v62 = vpop.xlane.xlu0 %2853 }
 0xe13   : > { %v3201_v8 = vmul.f32 %v4859_v15, %v6369_v60  ;;  %v4861_v32 = vpop.eup %4860  ;;  %4862 = vrcp.f32 %v2854_v62 }
 0xe14   : > { %4489 = vmatmul.msk.f32.gmra.mxu3 %vm861_vm3, %v2874_v14  ;;  %v2875_v6 = vmul.f32 %v4861_v32, %v6359_v38  ;;  %v4894_v14 = vld [vmem:[%s6854_s1 + $0x4] sm:$0x7] }
 0xe16   : > { %4521 = vmatmul.msk.f32.gmra.mxu2 %vm861_vm3, %v3201_v8  ;;  %v6470_v8 = vperm.slane %v4894_v14, 2 }
 0xe19   : > { %v4863_v57 = vpop.eup %4862 }
 0xe1a   : > { %v2876_v23 = vmul.f32 %v4863_v57, %v6382_v25 }
 0xe1c   : > { %4490 = vmatmul.msk.f32.gmra.mxu3 %vm861_vm3, %v2875_v6 }
 0xe21   : > { %v3274_v13 = vpop.f32.mrf.mxu2 }
 0xe22   : > { %3310 = vrot.lane.b32.xlu1 %v3274_v13, %s4910_s13 }
 0xe24   : > { %4491 = vmatmul.msk.f32.gmra.mxu3 %vm861_vm3, %v2876_v23 }
 0xe29   : > { %v3277_v46 = vpop.f32.mrf.mxu2 }
 0xe2a   : > { %3312 = vrot.lane.b32.xlu2 %v3277_v46, %s4910_s13 }
 0xe2b   : > { %v2857_v60 = vpop.xlane.xlu1 %2856 }
 0xe2c   : > { %4864 = vrcp.f32 %v2857_v60 }
 0xe32   : > { %v4865_v56 = vpop.eup %4864 }
 0xe33   : > { %v2877_v2 = vmul.f32 %v4865_v56, %v6391_v59  ;;  %v393_v59 = vld [vmem:[%s6856_s3 + $0x10] sm:$0xff] }
 0xe34   : > { %3389 = vmatpush.msra.mxu1 %v393_v59 }
 0xe35   : > { %4492 = vmatmul.msk.f32.gmra.mxu3 %vm861_vm3, %v2877_v2 }
 0xe54   : > { %v2951_v27 = vpop.f32.mrf.mxu3 }
 0xe5f   : > { %v3280_v38 = vpop.f32.mrf.mxu2 }
 0xe60   : > { %3314 = vrot.lane.b32.xlu0 %v3280_v38, %s4910_s13 }
 0xe67   : > { %v3283_v9 = vpop.f32.mrf.mxu2  ;;  %v2954_v43 = vpop.f32.mrf.mxu3 }
 0xe68   : > { %3316 = vrot.lane.b32.xlu0 %v3283_v9, %s4910_s13 }
 0xe6a   : > { %v2860_v17 = vpop.xlane.xlu0 %2859 }
 0xe6b   : > { %4866 = vrcp.f32 %v2860_v17 }
 0xe6f   : > { %v3286_v25 = vpop.f32.mrf.mxu2 }
 0xe70   : > { %3318 = vrot.lane.b32.xlu1 %v3286_v25, %s4910_s13 }
 0xe71   : > { %v4867_v44 = vpop.eup %4866 }
 0xe72   : > { %v2878_v39 = vmul.f32 %v4867_v44, %v4847_v63 }
 0xe74   : > { %4493 = vmatmul.msk.f32.gmra.mxu3 %vm861_vm3, %v2878_v39 }
 0xe77   : > { %v3289_v53 = vpop.f32.mrf.mxu2 }
 0xe78   : > { %3320 = vrot.lane.b32.xlu2 %v3289_v53, %s4910_s13 }
 0xe7f   : > { %v3292_v42 = vpop.f32.mrf.mxu2  ;;  %v2957_v12 = vpop.f32.mrf.mxu3 }
 0xe80   : > { %3322 = vrot.lane.b32.xlu0 %v3292_v42, %s4910_s13 }
 0xe84   : > { %v3313_v47 = vpop.permute.xlu2 %3312 }
 0xe85   : > { %v3338_v50 = vsel %vm447_vm0, %v2954_v43, %v3313_v47 }
 0xe87   : > { %v2960_v31 = vpop.f32.mrf.mxu3 }
 0xe88   : > { %3703 = vperm.xlu0 %4667, %v397_v58  }
 0xe91   : > { %v3295_v21 = vpop.f32.mrf.mxu2 }
 0xe92   : > { %3324 = vrot.lane.b32.xlu1 %v3295_v21, %s4910_s13 }
 0xe94   : > { %v3311_v22 = vpop.permute.xlu1 %3310 }
 0xe95   : > { %v3337_v41 = vsel %vm447_vm0, %v2951_v27, %v3311_v22 }
 0xe96   : > { %4522 = vmatmul.msk.f32.vlgmr.msra.gmra.mxu1 %vm416_vm5, %v3337_v41  ;;  %v403_v41 = vld [vmem:[%s6860_s7 + $0x8] sm:$0xff] }
 0xe97   : > { %v2963_v36 = vpop.f32.mrf.mxu3  ;;  %3767 = vmatpush.msra.mxu3 %v403_v41 }
 0xe99   : > { %v3298_v40 = vpop.f32.mrf.mxu2 }
 0xe9a   : > { %3716 = vperm.xlu1 %4625, %v398_v10   ;;  %3326 = vrot.lane.b32.xlu2 %v3298_v40, %s4910_s13 }
 0xe9e   : > { %4523 = vmatmul.msk.f32.gmra.mxu1 %vm416_vm5, %v3338_v50 }
 0xe9f   : > { %v2966_v7 = vpop.f32.mrf.mxu3 }
 0xea7   : > { %v2969_v5 = vpop.f32.mrf.mxu3 }
 0xeb8   : > { %v2972_v30 = vpop.f32.mrf.mxu3 }
 0xed2   : > { %v3315_v19 = vpop.permute.xlu0 %3314  ;;  %v3321_v0 = vpop.permute.xlu2 %3320 }
 0xed3   : > { %v3339_v29 = vsel %vm447_vm0, %v2957_v12, %v3315_v19  ;;  %v3342_v33 = vsel %vm447_vm0, %v2966_v7, %v3321_v0 }
 0xed4   : > { %4524 = vmatmul.msk.f32.gmra.mxu1 %vm416_vm5, %v3339_v29 }
 0xeda   : > { %v3317_v61 = vpop.permute.xlu0 %3316 }
 0xedb   : > { %v3340_v63 = vsel %vm447_vm0, %v2960_v31, %v3317_v61 }
 0xedc   : > { %4525 = vmatmul.msk.f32.gmra.mxu1 %vm416_vm5, %v3340_v63 }
 0xee2   : > { %v3319_v37 = vpop.permute.xlu1 %3318 }
 0xee3   : > { %v3341_v49 = vsel %vm447_vm0, %v2963_v36, %v3319_v37 }
 0xee4   : > { %4526 = vmatmul.msk.f32.gmra.mxu1 %vm416_vm5, %v3341_v49 }
 0xeec   : > { %4527 = vmatmul.msk.f32.gmra.mxu1 %vm416_vm5, %v3342_v33 }
 0xef2   : > { %v3323_v54 = vpop.permute.xlu0 %3322 }
 0xef3   : > { %v3343_v51 = vsel %vm447_vm0, %v2969_v5, %v3323_v54 }
 0xef4   : > { %4528 = vmatmul.msk.f32.gmra.mxu1 %vm416_vm5, %v3343_v51  ;;  %v3327_v16 = vpop.permute.xlu2 %3326 }
 0xef7   : > { %v2975_v1 = vpop.f32.mrf.mxu3 }
 0xef8   : > { %v3345_v52 = vsel %vm447_vm0, %v2975_v1, %v3327_v16 }
 0xefa   : > { %v6496_v49 = vpop.permute.xlu0 %3703 }
 0xf04   : > { %v3325_v35 = vpop.permute.xlu1 %3324 }
 0xf05   : > { %v3344_v34 = vsel %vm447_vm0, %v2972_v30, %v3325_v35 }
 0xf06   : > { %4529 = vmatmul.msk.f32.gmra.mxu1 %vm416_vm5, %v3344_v34 }
 0xf0c   : > { %v6502_v51 = vpop.permute.xlu1 %3716 }
 0xf0e   : > { %4530 = vmatmul.msk.f32.gmra.mxu1 %vm416_vm5, %v3345_v52 }
 0xf13   : > { %v3391_v15 = vpop.f32.mrf.mxu1 }
 0xf14   : > { %v3392_v62 = vadd.f32 %v3391_v15, %v6470_v8 }
 0xf16   : > { %v6474_v6 = vadd.f32 %v3392_v62, %v5914_v45 }
 0xf18   : > { %v3436_v23 = vrot.slane %v6474_v6, 1 }
 0xf1b   : > { %v3394_v32 = vpop.f32.mrf.mxu1 }
 0xf1c   : > { %v3395_v57 = vadd.f32 %v3394_v32, %v6470_v8 }
 0xf1e   : > { %v3419_v13 = vadd.f32 %v3395_v57, %v5920_v4 }
 0xf20   : > { %v3437_v46 = vrot.slane %v3419_v13, 1 }
 0xf22   : > { %v6480_v60 = vsel %vm1520_vm6, %v3436_v23, %v3437_v46 }
 0xf23   : > { %v3461_v56 = vsel %vm447_vm0, %v6480_v60, 0.0 }
 0xf24   : > { %v3462_v2 = vrot.slane %v3461_v56, 4 }
 0xf26   : > { %v3463_v38 = vadd.f32 %v3462_v2, %v3461_v56 }
 0xf28   : > { %v3464_v9 = vrot.slane %v3463_v38, 2 }
 0xf2a   : > { %v3465_v17 = vadd.f32 %v3464_v9, %v3463_v38 }
 0xf2c   : > { %v3466_v25 = vrot.slane %v3465_v17, 1 }
 0xf2e   : > { %v3467_v45 = vadd.f32 %v3466_v25, %v3465_v17 }
 0xf30   : > { %v3517_v44 = vmul.f32 %v3467_v45, %v5009_v24 }
 0xf32   : > { %v3525_v39 = vsub.f32 %v6480_v60, %v3517_v44 }
 0xf34   : > { %v3533_v4 = vmul.f32 %v3525_v39, %v3525_v39 }
 0xf36   : > { %v3541_v3 = vsel %vm447_vm0, %v3533_v4, 0.0 }
 0xf37   : > { %v3542_v59 = vrot.slane %v3541_v3, 4 }
 0xf39   : > { %v3543_v53 = vadd.f32 %v3542_v59, %v3541_v3 }
 0xf3b   : > { %v3544_v42 = vrot.slane %v3543_v53, 2 }
 0xf3d   : > { %v3545_v21 = vadd.f32 %v3544_v42, %v3543_v53 }
 0xf3f   : > { %v3546_v27 = vrot.slane %v3545_v21, 1 }
 0xf41   : > { %v3547_v22 = vadd.f32 %v3546_v27, %v3545_v21 }
 0xf43   : > { %v3597_v10 = vmul.f32 %v3547_v22, %v5009_v24 }
 0xf45   : > { %v3605_v47 = vadd.f32 1e-05, %v3597_v10 }
 0xf47   : > { %4868 = vrsqrt.f32 %v3605_v47  ;;  %vm3619_vm4 = vweird.f32 %v3605_v47 }
 0xf4d   : > { %v4869_v40 = vpop.eup %4868 }
 0xf4e   : > { %v3614_v43 = vmul.f32 %v4869_v40, %v3605_v47  ;;  %vm3620_vm3 = vweird.f32 %v4869_v40 }
 0xf4f   : > { %vm3621_vm14 = vmor %vm3619_vm4, %vm3620_vm3 }
 0xf50   : > { %v3615_v50 = vmul.f32 %v4869_v40, %v3614_v43 }
 0xf51   : > { %v3397_v58 = vpop.f32.mrf.mxu1 }
 0xf52   : > { %v3616_v12 = vmul.f32 0.5, %v3615_v50  ;;  %v3398_v19 = vadd.f32 %v3397_v58, %v6470_v8 }
 0xf54   : > { %v3617_v29 = vsub.f32 1.5, %v3616_v12  ;;  %v3420_v31 = vadd.f32 %v3398_v19, %v5926_v20 }
 0xf56   : > { %v3618_v61 = vmul.f32 %v4869_v40, %v3617_v29  ;;  %v3439_v63 = vrot.slane %v3420_v31, 1 }
 0xf58   : > { %v3622_v36 = vsel %vm3621_vm14, %v4869_v40, %v3618_v61  ;;  %v6494_v37 = vsel %vm1520_vm6, %v3437_v46, %v3439_v63 }
 0xf59   : > { %v3693_v7 = vmul.f32 %v3622_v36, %v3525_v39  ;;  %v3468_v0 = vsel %vm447_vm0, %v6494_v37, 0.0  ;;  %v3400_v33 = vpop.f32.mrf.mxu1 }
 0xf5a   : > { %v3469_v5 = vrot.slane %v3468_v0, 4  ;;  %v3401_v54 = vadd.f32 %v3400_v33, %v6470_v8 }
 0xf5b   : > { %v3706_v20 = vmul.f32 %v6496_v49, %v3693_v7 }
 0xf5c   : > { %v3470_v30 = vadd.f32 %v3469_v5, %v3468_v0  ;;  %v3421_v35 = vadd.f32 %v3401_v54, %v5932_v26 }
 0xf5d   : > { %v3719_v34 = vadd.f32 %v6502_v51, %v3706_v20 }
 0xf5e   : > { %v3471_v1 = vrot.slane %v3470_v30, 2  ;;  %v3441_v16 = vrot.slane %v3421_v35, 1 }
 0xf5f   : > { %4531 = vmatmul.msk.f32.vlgmr.msra.gmra.mxu3 %vm447_vm0, %v3719_v34 }
 0xf60   : > { %v3472_v52 = vadd.f32 %v3471_v1, %v3470_v30  ;;  %v6508_v15 = vsel %vm1520_vm6, %v3439_v63, %v3441_v16 }
 0xf61   : > { %v3475_v14 = vsel %vm447_vm0, %v6508_v15, 0.0  ;;  %v3403_v62 = vpop.f32.mrf.mxu1 }
 0xf62   : > { %v3473_v32 = vrot.slane %v3472_v52, 1  ;;  %v3476_v57 = vrot.slane %v3475_v14, 4  ;;  %v3404_v13 = vadd.f32 %v3403_v62, %v6470_v8 }
 0xf64   : > { %v3474_v23 = vadd.f32 %v3473_v32, %v3472_v52  ;;  %v3477_v26 = vadd.f32 %v3476_v57, %v3475_v14  ;;  %v3422_v46 = vadd.f32 %v3404_v13, %v5938_v28 }
 0xf66   : > { %v3518_v56 = vmul.f32 %v3474_v23, %v5009_v24  ;;  %v3478_v2 = vrot.slane %v3477_v26, 2  ;;  %v3443_v38 = vrot.slane %v3422_v46, 1 }
 0xf68   : > { %v6516_v9 = vsub.f32 %v6494_v37, %v3518_v56  ;;  %v3479_v17 = vadd.f32 %v3478_v2, %v3477_v26  ;;  %v6519_v25 = vsel %vm1520_vm6, %v3441_v16, %v3443_v38 }
 0xf69   : > { %v3482_v45 = vsel %vm447_vm0, %v6519_v25, 0.0  ;;  %v3406_v44 = vpop.f32.mrf.mxu1 }
 0xf6a   : > { %v3534_v39 = vmul.f32 %v6516_v9, %v6516_v9  ;;  %v3480_v4 = vrot.slane %v3479_v17, 1  ;;  %v3483_v28 = vrot.slane %v3482_v45, 4  ;;  %v3407_v3 = vadd.f32 %v3406_v44, %v6470_v8 }
 0xf6c   : > { %v3548_v59 = vsel %vm447_vm0, %v3534_v39, 0.0  ;;  %v3481_v53 = vadd.f32 %v3480_v4, %v3479_v17  ;;  %v3484_v42 = vadd.f32 %v3483_v28, %v3482_v45  ;;  %v3423_v21 = vadd.f32 %v3407_v3, %v5944_v11 }
 0xf6d   : > { %v3549_v27 = vrot.slane %v3548_v59, 4 }
 0xf6e   : > { %v3519_v22 = vmul.f32 %v3481_v53, %v5009_v24  ;;  %v3485_v41 = vrot.slane %v3484_v42, 2  ;;  %v3445_v10 = vrot.slane %v3423_v21, 1 }
 0xf6f   : > { %v3550_v47 = vadd.f32 %v3549_v27, %v3548_v59 }
 0xf70   : > { %v6530_v40 = vsub.f32 %v6508_v15, %v3519_v22  ;;  %v3486_v43 = vadd.f32 %v3485_v41, %v3484_v42  ;;  %v6533_v50 = vsel %vm1520_vm6, %v3443_v38, %v3445_v10 }
 0xf71   : > { %v3551_v58 = vrot.slane %v3550_v47, 2  ;;  %v3489_v12 = vsel %vm447_vm0, %v6533_v50, 0.0  ;;  %v3409_v19 = vpop.f32.mrf.mxu1 }
 0xf72   : > { %v3535_v11 = vmul.f32 %v6530_v40, %v6530_v40  ;;  %v3487_v29 = vrot.slane %v3486_v43, 1  ;;  %v3490_v31 = vrot.slane %v3489_v12, 4  ;;  %v3410_v61 = vadd.f32 %v3409_v19, %v6470_v8 }
 0xf73   : > { %v3552_v63 = vadd.f32 %v3551_v58, %v3550_v47 }
 0xf74   : > { %v3555_v36 = vsel %vm447_vm0, %v3535_v11, 0.0  ;;  %v3488_v7 = vadd.f32 %v3487_v29, %v3486_v43  ;;  %v3491_v0 = vadd.f32 %v3490_v31, %v3489_v12  ;;  %v6542_v33 = vadd.f32 %v3410_v61, %v5950_v48 }
 0xf75   : > { %v3553_v5 = vrot.slane %v3552_v63, 1  ;;  %v3556_v54 = vrot.slane %v3555_v36, 4 }
 0xf76   : > { %v3520_v20 = vmul.f32 %v3488_v7, %v5009_v24  ;;  %v3492_v30 = vrot.slane %v3491_v0, 2  ;;  %v3447_v35 = vrot.slane %v6542_v33, 1 }
 0xf77   : > { %v3554_v34 = vadd.f32 %v3553_v5, %v3552_v63  ;;  %v3557_v1 = vadd.f32 %v3556_v54, %v3555_v36 }
 0xf78   : > { %v6547_v16 = vsub.f32 %v6519_v25, %v3520_v20  ;;  %v3493_v52 = vadd.f32 %v3492_v30, %v3491_v0  ;;  %v6550_v14 = vsel %vm1520_vm6, %v3445_v10, %v3447_v35 }
 0xf79   : > { %v3558_v62 = vrot.slane %v3557_v1, 2  ;;  %v3496_v48 = vsel %vm447_vm0, %v6550_v14, 0.0  ;;  %v3598_v32 = vmul.f32 %v3554_v34, %v5009_v24 }
 0xf7a   : > { %v3536_v57 = vmul.f32 %v6547_v16, %v6547_v16  ;;  %v3494_v13 = vrot.slane %v3493_v52, 1  ;;  %v3497_v23 = vrot.slane %v3496_v48, 4 }
 0xf7b   : > { %v3559_v26 = vadd.f32 %v3558_v62, %v3557_v1  ;;  %v3606_v46 = vadd.f32 1e-05, %v3598_v32 }
 0xf7c   : > { %v3562_v56 = vsel %vm447_vm0, %v3536_v57, 0.0  ;;  %v3495_v2 = vadd.f32 %v3494_v13, %v3493_v52  ;;  %v3498_v38 = vadd.f32 %v3497_v23, %v3496_v48 }
 0xf7d   : > { %v3560_v17 = vrot.slane %v3559_v26, 1  ;;  %v3563_v45 = vrot.slane %v3562_v56, 4  ;;  %4870 = vrsqrt.f32 %v3606_v46  ;;  %vm3629_vm7 = vweird.f32 %v3606_v46 }
 0xf7e   : > { %v3521_v44 = vmul.f32 %v3495_v2, %v5009_v24  ;;  %v3499_v39 = vrot.slane %v3498_v38, 2 }
 0xf7f   : > { %v3561_v4 = vadd.f32 %v3560_v17, %v3559_v26  ;;  %v3564_v28 = vadd.f32 %v3563_v45, %v3562_v56 }
 0xf80   : > { %v6560_v3 = vsub.f32 %v6533_v50, %v3521_v44  ;;  %v3500_v59 = vadd.f32 %v3499_v39, %v3498_v38 }
 0xf81   : > { %v3565_v53 = vrot.slane %v3564_v28, 2  ;;  %v3599_v42 = vmul.f32 %v3561_v4, %v5009_v24 }
 0xf82   : > { %v3537_v21 = vmul.f32 %v6560_v3, %v6560_v3  ;;  %v3501_v27 = vrot.slane %v3500_v59, 1 }
 0xf83   : > { %v4871_v22 = vpop.eup %4870  ;;  %v3566_v41 = vadd.f32 %v3565_v53, %v3564_v28  ;;  %v6565_v10 = vadd.f32 1e-05, %v3599_v42  ;;  %v3412_v58 = vpop.f32.mrf.mxu1 }
 0xf84   : > { %v3569_v47 = vsel %vm447_vm0, %v3537_v21, 0.0  ;;  %v3502_v43 = vadd.f32 %v3501_v27, %v3500_v59  ;;  %v3624_v12 = vmul.f32 %v4871_v22, %v3606_v46  ;;  %v3413_v29 = vadd.f32 %v3412_v58, %v6470_v8 }
 0xf85   : > { %v3567_v19 = vrot.slane %v3566_v41, 1  ;;  %v3570_v11 = vrot.slane %v3569_v47, 4  ;;  %4872 = vrsqrt.f32 %v6565_v10  ;;  %vm3630_vm15 = vweird.f32 %v4871_v22 }
 0xf86   : > { %v3522_v31 = vmul.f32 %v3502_v43, %v5009_v24  ;;  %v3625_v61 = vmul.f32 %v4871_v22, %v3624_v12  ;;  %v3425_v7 = vadd.f32 %v3413_v29, %v5970_v18  ;;  %vm3631_vm8 = vmor %vm3629_vm7, %vm3630_vm15  ;;  %vm3639_vm10 = vweird.f32 %v6565_v10 }
 0xf87   : > { %v3568_v63 = vadd.f32 %v3567_v19, %v3566_v41  ;;  %v3571_v36 = vadd.f32 %v3570_v11, %v3569_v47 }
 0xf88   : > { %v6573_v0 = vsub.f32 %v6550_v14, %v3522_v31  ;;  %v3626_v33 = vmul.f32 0.5, %v3625_v61  ;;  %v3449_v54 = vrot.slane %v3425_v7, 1 }
 0xf89   : > { %v3572_v5 = vrot.slane %v3571_v36, 2  ;;  %v3600_v20 = vmul.f32 %v3568_v63, %v5009_v24 }
 0xf8a   : > { %v3538_v30 = vmul.f32 %v6573_v0, %v6573_v0  ;;  %v3627_v34 = vsub.f32 1.5, %v3626_v33  ;;  %v6579_v62 = vsel %vm1520_vm6, %v3447_v35, %v3449_v54 }
 0xf8b   : > { %v4873_v1 = vpop.eup %4872  ;;  %v3573_v52 = vadd.f32 %v3572_v5, %v3571_v36  ;;  %v6581_v18 = vadd.f32 1e-05, %v3600_v20  ;;  %v3503_v32 = vsel %vm447_vm0, %v6579_v62, 0.0  ;;  %v3415_v57 = vpop.f32.mrf.mxu1 }
 0xf8c   : > { %v3576_v48 = vsel %vm447_vm0, %v3538_v30, 0.0  ;;  %v3628_v13 = vmul.f32 %v4871_v22, %v3627_v34  ;;  %v3634_v23 = vmul.f32 %v4873_v1, %v6565_v10  ;;  %v3504_v2 = vrot.slane %v3503_v32, 4 }
 0xf8d   : > { %v3574_v26 = vrot.slane %v3573_v52, 1  ;;  %v3577_v56 = vrot.slane %v3576_v48, 4  ;;  %v3416_v38 = vadd.f32 %v3415_v57, %v6470_v8  ;;  %4874 = vrsqrt.f32 %v6581_v18 }
 0xf8e   : > { %v3632_v35 = vsel %vm3631_vm8, %v4871_v22, %v3628_v13  ;;  %v3635_v46 = vmul.f32 %v4873_v1, %v3634_v23  ;;  %v3505_v44 = vadd.f32 %v3504_v2, %v3503_v32  ;;  %vm3640_vm9 = vweird.f32 %v4873_v1 }
 0xf8f   : > { %v3575_v17 = vadd.f32 %v3574_v26, %v3573_v52  ;;  %v3578_v45 = vadd.f32 %v3577_v56, %v3576_v48  ;;  %v3426_v39 = vadd.f32 %v3416_v38, %v5962_v55  ;;  %v3694_v4 = vmul.f32 %v3632_v35, %v6516_v9  ;;  %vm3641_vm11 = vmor %vm3639_vm10, %vm3640_vm9 }
 0xf90   : > { %v3636_v28 = vmul.f32 0.5, %v3635_v46  ;;  %v3506_v53 = vrot.slane %v3505_v44, 2  ;;  %vm3649_vm12 = vweird.f32 %v6581_v18 }
 0xf91   : > { %v3579_v59 = vrot.slane %v3578_v45, 2  ;;  %v3451_v42 = vrot.slane %v3426_v39, 1  ;;  %v3601_v21 = vmul.f32 %v3575_v17, %v5009_v24  ;;  %v3707_v8 = vmul.f32 %v6496_v49, %v3694_v4 }
 0xf92   : > { %v3637_v27 = vsub.f32 1.5, %v3636_v28  ;;  %v3507_v41 = vadd.f32 %v3506_v53, %v3505_v44 }
 0xf93   : > { %v3580_v22 = vadd.f32 %v3579_v59, %v3578_v45  ;;  %v6595_v47 = vsel %vm1520_vm6, %v3449_v54, %v3451_v42  ;;  %v3609_v43 = vadd.f32 1e-05, %v3601_v21  ;;  %v4875_v58 = vpop.eup %4874  ;;  %v3720_v9 = vadd.f32 %v6502_v51, %v3707_v8 }
 0xf94   : > { %v3510_v55 = vsel %vm447_vm0, %v6595_v47, 0.0  ;;  %v3638_v12 = vmul.f32 %v4873_v1, %v3637_v27  ;;  %v3508_v11 = vrot.slane %v3507_v41, 1  ;;  %v3644_v31 = vmul.f32 %v4875_v58, %v6581_v18 }
 0xf95   : > { %v3581_v19 = vrot.slane %v3580_v22, 1  ;;  %v3511_v29 = vrot.slane %v3510_v55, 4  ;;  %4532 = vmatmul.msk.f32.gmra.mxu3 %vm447_vm0, %v3720_v9  ;;  %4876 = vrsqrt.f32 %v3609_v43  ;;  %vm3650_vm6 = vweird.f32 %v4875_v58 }
 0xf96   : > { %v3642_v61 = vsel %vm3641_vm11, %v4873_v1, %v3638_v12  ;;  %v3509_v36 = vadd.f32 %v3508_v11, %v3507_v41  ;;  %v3645_v5 = vmul.f32 %v4875_v58, %v3644_v31  ;;  %vm3651_vm13 = vmor %vm3649_vm12, %vm3650_vm6  ;;  %vm3659_vm4 = vweird.f32 %v3609_v43 }
 0xf97   : > { %v3582_v63 = vadd.f32 %v3581_v19, %v3580_v22  ;;  %v3512_v7 = vadd.f32 %v3511_v29, %v3510_v55  ;;  %v3695_v33 = vmul.f32 %v3642_v61, %v6530_v40 }
 0xf98   : > { %v3523_v54 = vmul.f32 %v3509_v36, %v5009_v24  ;;  %v3646_v34 = vmul.f32 0.5, %v3645_v5 }
 0xf99   : > { %v3513_v20 = vrot.slane %v3512_v7, 2  ;;  %v3708_v10 = vmul.f32 %v6496_v49, %v3695_v33  ;;  %v3602_v30 = vmul.f32 %v3582_v63, %v5009_v24 }
 0xf9a   : > { %v6608_v52 = vsub.f32 %v6579_v62, %v3523_v54  ;;  %v3647_v13 = vsub.f32 1.5, %v3646_v34 }
 0xf9b   : > { %v3514_v48 = vadd.f32 %v3513_v20, %v3512_v7  ;;  %v3721_v1 = vadd.f32 %v6502_v51, %v3708_v10  ;;  %v3610_v32 = vadd.f32 1e-05, %v3602_v30  ;;  %v4877_v57 = vpop.eup %4876 }
 0xf9c   : > { %v3539_v40 = vmul.f32 %v6608_v52, %v6608_v52  ;;  %v3654_v26 = vmul.f32 %v4877_v57, %v3609_v43  ;;  %v3648_v56 = vmul.f32 %v4875_v58, %v3647_v13  ;;  %vm3660_vm3 = vweird.f32 %v4877_v57 }
 0xf9d   : > { %v3515_v23 = vrot.slane %v3514_v48, 1  ;;  %4533 = vmatmul.msk.f32.gmra.mxu3 %vm447_vm0, %v3721_v1  ;;  %4878 = vrsqrt.f32 %v3610_v32  ;;  %vm3661_vm14 = vmor %vm3659_vm4, %vm3660_vm3  ;;  %vm3669_vm7 = vweird.f32 %v3610_v32 }
 0xf9e   : > { %v3583_v2 = vsel %vm447_vm0, %v3539_v40, 0.0  ;;  %v3655_v35 = vmul.f32 %v4877_v57, %v3654_v26  ;;  %v3652_v17 = vsel %vm3651_vm13, %v4875_v58, %v3648_v56 }
 0xf9f   : > { %v3516_v38 = vadd.f32 %v3515_v23, %v3514_v48  ;;  %v3584_v46 = vrot.slane %v3583_v2, 4  ;;  %v3696_v44 = vmul.f32 %v3652_v17, %v6547_v16 }
 0xfa0   : > { %v3656_v39 = vmul.f32 0.5, %v3655_v35 }
 0xfa1   : > { %v3524_v45 = vmul.f32 %v3516_v38, %v5009_v24  ;;  %v3585_v4 = vadd.f32 %v3584_v46, %v3583_v2  ;;  %v3709_v59 = vmul.f32 %v6496_v49, %v3696_v44 }
 0xfa2   : > { %v3657_v18 = vsub.f32 1.5, %v3656_v39 }
 0xfa3   : > { %v6619_v28 = vsub.f32 %v6595_v47, %v3524_v45  ;;  %v4879_v53 = vpop.eup %4878  ;;  %v3586_v42 = vrot.slane %v3585_v4, 2  ;;  %v3722_v8 = vadd.f32 %v6502_v51, %v3709_v59 }
 0xfa4   : > { %v3658_v27 = vmul.f32 %v4877_v57, %v3657_v18  ;;  %v3664_v22 = vmul.f32 %v4879_v53, %v3610_v32  ;;  %vm3670_vm15 = vweird.f32 %v4879_v53 }
 0xfa5   : > { %v3540_v21 = vmul.f32 %v6619_v28, %v6619_v28  ;;  %v3587_v16 = vadd.f32 %v3586_v42, %v3585_v4  ;;  %4534 = vmatmul.msk.f32.gmra.mxu3 %vm447_vm0, %v3722_v8  ;;  %vm3671_vm8 = vmor %vm3669_vm7, %vm3670_vm15  ;;  %v6651_v42 = vld [vmem:[%s6858_s5 + $0x4] sm:$0x7] }
 0xfa6   : > { %v3662_v58 = vsel %vm3661_vm14, %v4877_v57, %v3658_v27  ;;  %v3665_v55 = vmul.f32 %v4879_v53, %v3664_v22 }
 0xfa7   : > { %v3590_v41 = vsel %vm447_vm0, %v3540_v21, 0.0  ;;  %v3588_v9 = vrot.slane %v3587_v16, 1  ;;  %v3697_v19 = vmul.f32 %v3662_v58, %v6560_v3  ;;  %v6654_v21 = vperm.slane %v6651_v42, 0 }
 0xfa8   : > { %v3591_v12 = vrot.slane %v3590_v41, 4  ;;  %v3666_v43 = vmul.f32 0.5, %v3665_v55 }
 0xfa9   : > { %v3589_v11 = vadd.f32 %v3588_v9, %v3587_v16  ;;  %v3710_v31 = vmul.f32 %v6496_v49, %v3697_v19  ;;  %v3841_v9 = vld [vmem:[#allocation2] sm:$0xff] }
 0xfaa   : > { %v3592_v29 = vadd.f32 %v3591_v12, %v3590_v41  ;;  %v3667_v61 = vsub.f32 1.5, %v3666_v43  ;;  %v406_v41 = vld [vmem:[%s6861_s8 + $0x10] sm:$0xff]  ;;  %v3866_v12 = vld [vmem:[#allocation2 + $0x1] sm:$0xff] }
 0xfab   : > { %v3723_v36 = vadd.f32 %v6502_v51, %v3710_v31  ;;  %v3603_v7 = vmul.f32 %v3589_v11, %v5009_v24  ;;  %v6661_v58 = vperm.slane %v406_v41, 0  ;;  %v6663_v55 = vperm.slane %v406_v41, 1  ;;  %v410_v43 = vld [vmem:[%s6862_s9 + $0x10] sm:$0xff] }
 0xfac   : > { %v3593_v63 = vrot.slane %v3592_v29, 2  ;;  %v3668_v33 = vmul.f32 %v4879_v53, %v3667_v61  ;;  %v6671_v61 = vperm.slane %v406_v41, 2 }
 0xfad   : > { %v3611_v54 = vadd.f32 1e-05, %v3603_v7  ;;  %4535 = vmatmul.msk.f32.gmra.mxu3 %vm447_vm0, %v3723_v36  ;;  %v3875_v31 = vmul.f32 %v6663_v55, %v3866_v12 }
 0xfae   : > { %v3594_v5 = vadd.f32 %v3593_v63, %v3592_v29  ;;  %v3672_v3 = vsel %vm3671_vm8, %v4879_v53, %v3668_v33  ;;  %v3850_v29 = vmul.f32 %v6661_v58, %v3841_v9  ;;  %v3891_v63 = vld [vmem:[#allocation2 + $0x2] sm:$0xff] }
 0xfaf   : > { %v3698_v10 = vmul.f32 %v3672_v3, %v6573_v0  ;;  %4880 = vrsqrt.f32 %v3611_v54  ;;  %vm3679_vm10 = vweird.f32 %v3611_v54 }
 0xfb0   : > { %v3595_v20 = vrot.slane %v3594_v5, 1  ;;  %v3883_v33 = vadd.f32 %v3875_v31, %v3850_v29 }
 0xfb1   : > { %v3711_v34 = vmul.f32 %v6496_v49, %v3698_v10 }
 0xfb2   : > { %v3596_v30 = vadd.f32 %v3595_v20, %v3594_v5  ;;  %v3900_v5 = vmul.f32 %v6671_v61, %v3891_v63 }
 0xfb3   : > { %v3724_v48 = vadd.f32 %v6502_v51, %v3711_v34 }
 0xfb4   : > { %v3604_v1 = vmul.f32 %v3596_v30, %v5009_v24 }
 0xfb5   : > { %v4881_v57 = vpop.eup %4880  ;;  %4536 = vmatmul.msk.f32.gmra.mxu3 %vm447_vm0, %v3724_v48  ;;  %v3908_v48 = vadd.f32 %v3900_v5, %v3883_v33 }
 0xfb6   : > { %v3612_v13 = vadd.f32 1e-05, %v3604_v1  ;;  %v3674_v32 = vmul.f32 %v4881_v57, %v3611_v54  ;;  %vm3680_vm9 = vweird.f32 %v4881_v57  ;;  %v6674_v54 = vperm.slane %v406_v41, 3 }
 0xfb7   : > { %vm3681_vm11 = vmor %vm3679_vm10, %vm3680_vm9 }
 0xfb8   : > { %4882 = vrsqrt.f32 %v3612_v13  ;;  %v3675_v40 = vmul.f32 %v4881_v57, %v3674_v32  ;;  %vm3689_vm12 = vweird.f32 %v3612_v13 }
 0xfba   : > { %v3676_v23 = vmul.f32 0.5, %v3675_v40  ;;  %v6678_v40 = vperm.slane %v406_v41, 4 }
 0xfbc   : > { %v3677_v26 = vsub.f32 1.5, %v3676_v23 }
 0xfbe   : > { %v4883_v56 = vpop.eup %4882  ;;  %v3678_v0 = vmul.f32 %v4881_v57, %v3677_v26 }
 0xfbf   : > { %v3684_v2 = vmul.f32 %v4883_v56, %v3612_v13  ;;  %vm3690_vm6 = vweird.f32 %v4883_v56 }
 0xfc0   : > { %v3682_v38 = vsel %vm3681_vm11, %v4881_v57, %v3678_v0  ;;  %vm3691_vm13 = vmor %vm3689_vm12, %vm3690_vm6 }
 0xfc1   : > { %v3685_v35 = vmul.f32 %v4883_v56, %v3684_v2  ;;  %v3699_v46 = vmul.f32 %v3682_v38, %v6608_v52  ;;  %v411_v52 = vld [vmem:[%s6862_s9 + $0x18] sm:$0xff] }
 0xfc2   : > { %4114 = vmatpush.msra.mxu0 %v411_v52 }
 0xfc3   : > { %v3686_v24 = vmul.f32 0.5, %v3685_v35  ;;  %v3712_v17 = vmul.f32 %v6496_v49, %v3699_v46  ;;  %v6684_v35 = vperm.slane %v406_v41, 5 }
 0xfc4   : > { %4115 = vmatpush.msra.mxu0 %v410_v43 }
 0xfc5   : > { %v3687_v45 = vsub.f32 1.5, %v3686_v24  ;;  %v3725_v44 = vadd.f32 %v6502_v51, %v3712_v17 }
 0xfc7   : > { %v3688_v39 = vmul.f32 %v4883_v56, %v3687_v45  ;;  %4537 = vmatmul.msk.f32.gmra.mxu3 %vm447_vm0, %v3725_v44  ;;  %v6686_v44 = vperm.slane %v406_v41, 6 }
 0xfc9   : > { %v3692_v4 = vsel %vm3691_vm13, %v4883_v56, %v3688_v39 }
 0xfca   : > { %v3700_v59 = vmul.f32 %v3692_v4, %v6619_v28 }
 0xfcc   : > { %v3713_v18 = vmul.f32 %v6496_v49, %v3700_v59  ;;  %v6689_v59 = vperm.slane %v406_v41, 7 }
 0xfce   : > { %v3726_v53 = vadd.f32 %v6502_v51, %v3713_v18 }
 0xfd0   : > { %4538 = vmatmul.msk.f32.gmra.mxu3 %vm447_vm0, %v3726_v53 }
 0xfe2   : > { %v3769_v28 = vpop.f32.mrf.mxu3 }
 0xfe3   : > { %v3770_v49 = vadd.f32 %v3769_v28, %v6654_v21 }
 0xfe5   : > { %v3793_v8 = vadd.f32 3.0, %v3770_v49 }
 0xfe7   : > { %v3801_v51 = vmax.f32 %v3793_v8, 0.0 }
 0xfe9   : > { %v3809_v27 = vmin.f32 %v3801_v51, 6.0 }
 0xfeb   : > { %v3817_v22 = vmul.f32 %v3809_v27, %v3770_v49 }
 0xfed   : > { %v3825_v16 = vmul.f32 0.16666667, %v3817_v22  ;;  %v6698_v22 = vld [vmem:[%s6861_s8 + $0x18] ss:$0 sm:$0xff] }
 0xfef   : > { %3833 = vst.msk [vmem:[#allocation2 + $0x11] sm:$0xff] %vm416_vm5, %v3825_v16 }
 0xff6   : > { %v3916_v3 = vld [vmem:[#allocation2 + $0x10] sm:$0xff] }
 0xff7   : > { %v3925_v1 = vmul.f32 %v6674_v54, %v3916_v3  ;;  %v3941_v57 = vld [vmem:[#allocation2 + $0x11] sm:$0xff]  ;;  %v3851_v56 = vmul.f32 %v3916_v3, %v6661_v58 }
 0xff8   : > { %v3876_v0 = vmul.f32 %v3941_v57, %v6663_v55  ;;  %v3950_v38 = vmul.f32 %v6678_v40, %v3941_v57  ;;  %v3966_v46 = vld [vmem:[#allocation2 + $0x12] sm:$0xff] }
 0xff9   : > { %v3933_v26 = vadd.f32 %v3925_v1, %v3908_v48  ;;  %v3975_v53 = vmul.f32 %v6684_v35, %v3966_v46  ;;  %v3901_v52 = vmul.f32 %v3966_v46, %v6671_v61 }
 0xffa   : > { %v3884_v39 = vadd.f32 %v3876_v0, %v3851_v56 }
 0xffb   : > { %v3958_v45 = vadd.f32 %v3950_v38, %v3933_v26 }
 0xffc   : > { %v3909_v16 = vadd.f32 %v3901_v52, %v3884_v39 }
 0xffd   : > { %v3983_v51 = vadd.f32 %v3975_v53, %v3958_v45 }
0x1018   : > { %v3772_v19 = vpop.f32.mrf.mxu3 }
0x1019   : > { %v3773_v11 = vadd.f32 %v3772_v19, %v6654_v21 }
0x101b   : > { %v3794_v36 = vadd.f32 3.0, %v3773_v11 }
0x101d   : > { %v3802_v7 = vmax.f32 %v3794_v36, 0.0 }
0x101f   : > { %v3810_v20 = vmin.f32 %v3802_v7, 6.0  ;;  %v6706_v7 = vperm.slane %v6651_v42, 1 }
0x1020   : > { %v3775_v10 = vpop.f32.mrf.mxu3 }
0x1021   : > { %v3818_v30 = vmul.f32 %v3810_v20, %v3773_v11  ;;  %v3776_v34 = vadd.f32 %v3775_v10, %v6654_v21 }
0x1023   : > { %v3826_v13 = vmul.f32 0.16666667, %v3818_v30  ;;  %v3795_v32 = vadd.f32 3.0, %v3776_v34 }
0x1025   : > { %3834 = vst.msk [vmem:[#allocation2 + $0x21] sm:$0xff] %vm416_vm5, %v3826_v13  ;;  %v3803_v23 = vmax.f32 %v3795_v32, 0.0 }
0x1027   : > { %v3811_v2 = vmin.f32 %v3803_v23, 6.0 }
0x1028   : > { %v3778_v17 = vpop.f32.mrf.mxu3 }
0x1029   : > { %v3819_v24 = vmul.f32 %v3811_v2, %v3776_v34  ;;  %v3779_v4 = vadd.f32 %v3778_v17, %v6654_v21 }
0x102b   : > { %v3827_v18 = vmul.f32 0.16666667, %v3819_v24  ;;  %v3796_v28 = vadd.f32 3.0, %v3779_v4 }
0x102c   : > { %v3991_v49 = vld [vmem:[#allocation2 + $0x20] sm:$0xff] }
0x102d   : > { %v4016_v8 = vld [vmem:[#allocation2 + $0x21] sm:$0xff]  ;;  %3835 = vst.msk [vmem:[#allocation2 + $0x31] sm:$0xff] %vm416_vm5, %v3827_v18  ;;  %v4000_v27 = vmul.f32 %v6686_v44, %v3991_v49  ;;  %v3926_v41 = vmul.f32 %v3991_v49, %v6674_v54  ;;  %v3804_v9 = vmax.f32 %v3796_v28, 0.0  ;;  %v3852_v43 = vmul.f32 %v3991_v49, %v6661_v58 }
0x102e   : > { %v4025_v12 = vmul.f32 %v6689_v59, %v4016_v8  ;;  %v4041_v19 = vld [vmem:[#allocation2 + $0x22] sm:$0xff]  ;;  %v3951_v31 = vmul.f32 %v4016_v8, %v6678_v40  ;;  %v3877_v63 = vmul.f32 %v4016_v8, %v6663_v55 }
0x102f   : > { %v4008_v11 = vadd.f32 %v4000_v27, %v3983_v51  ;;  %v3934_v29 = vadd.f32 %v3926_v41, %v3909_v16  ;;  %v3812_v36 = vmin.f32 %v3804_v9, 6.0  ;;  %v4050_v3 = vmul.f32 %v6698_v22, %v4041_v19 }
0x1030   : > { %v3781_v33 = vpop.f32.mrf.mxu3  ;;  %v3885_v34 = vadd.f32 %v3877_v63, %v3852_v43  ;;  %v3976_v1 = vmul.f32 %v4041_v19, %v6684_v35  ;;  %v3902_v26 = vmul.f32 %v4041_v19, %v6671_v61 }
0x1031   : > { %v4033_v5 = vadd.f32 %v4025_v12, %v4008_v11  ;;  %v3959_v20 = vadd.f32 %v3951_v31, %v3934_v29  ;;  %v3820_v10 = vmul.f32 %v3812_v36, %v3779_v4  ;;  %v3782_v30 = vadd.f32 %v3781_v33, %v6654_v21 }
0x1032   : > { %v3910_v24 = vadd.f32 %v3902_v26, %v3885_v34 }
0x1033   : > { %v4058_v48 = vadd.f32 %v4050_v3, %v4033_v5  ;;  %v3828_v57 = vmul.f32 0.16666667, %v3820_v10  ;;  %v3797_v13 = vadd.f32 3.0, %v3782_v30  ;;  %v3984_v0 = vadd.f32 %v3976_v1, %v3959_v20 }
0x1034   : > { %v3992_v32 = vld [vmem:[#allocation2 + $0x30] sm:$0xff] }
0x1035   : > { %v4017_v23 = vld [vmem:[#allocation2 + $0x31] sm:$0xff]  ;;  %v4067_v56 = vadd.f32 %v6706_v7, %v4058_v48  ;;  %v4001_v2 = vmul.f32 %v6686_v44, %v3992_v32  ;;  %3836 = vst.msk [vmem:[#allocation2 + $0x41] sm:$0xff] %vm416_vm5, %v3828_v57  ;;  %v3805_v38 = vmax.f32 %v3797_v13, 0.0  ;;  %v3927_v17 = vmul.f32 %v3992_v32, %v6674_v54 }
0x1036   : > { %v4042_v46 = vld [vmem:[#allocation2 + $0x32] sm:$0xff]  ;;  %v4026_v39 = vmul.f32 %v6689_v59, %v4017_v23  ;;  %v3853_v4 = vmul.f32 %v3992_v32, %v6661_v58  ;;  %v3878_v18 = vmul.f32 %v4017_v23, %v6663_v55  ;;  %v3952_v28 = vmul.f32 %v4017_v23, %v6678_v40 }
0x1037   : > { %4539 = vmatmul.msk.f32.vlgmr.msra.gmra.mxu0 %vm416_vm5, %v4067_v56  ;;  %v4009_v45 = vadd.f32 %v4001_v2, %v3984_v0  ;;  %v3813_v53 = vmin.f32 %v3805_v38, 6.0  ;;  %v3935_v52 = vadd.f32 %v3927_v17, %v3910_v24  ;;  %v4051_v51 = vmul.f32 %v6698_v22, %v4042_v46 }
0x1038   : > { %v3784_v49 = vpop.f32.mrf.mxu3  ;;  %v3886_v12 = vadd.f32 %v3878_v18, %v3853_v4  ;;  %v3977_v11 = vmul.f32 %v4042_v46, %v6684_v35  ;;  %v3903_v36 = vmul.f32 %v4042_v46, %v6671_v61 }
0x1039   : > { %v4034_v8 = vadd.f32 %v4026_v39, %v4009_v45  ;;  %v3821_v27 = vmul.f32 %v3813_v53, %v3782_v30  ;;  %v3785_v16 = vadd.f32 %v3784_v49, %v6654_v21  ;;  %v3960_v41 = vadd.f32 %v3952_v28, %v3935_v52 }
0x103a   : > { %v3911_v10 = vadd.f32 %v3903_v36, %v3886_v12 }
0x103b   : > { %v4059_v9 = vadd.f32 %v4051_v51, %v4034_v8  ;;  %v3829_v19 = vmul.f32 0.16666667, %v3821_v27  ;;  %v3798_v43 = vadd.f32 3.0, %v3785_v16  ;;  %v3985_v5 = vadd.f32 %v3977_v11, %v3960_v41 }
0x103c   : > { %v3993_v31 = vld [vmem:[#allocation2 + $0x40] sm:$0xff] }
0x103d   : > { %v4068_v29 = vadd.f32 %v6706_v7, %v4059_v9  ;;  %v4018_v63 = vld [vmem:[#allocation2 + $0x41] sm:$0xff]  ;;  %3837 = vst.msk [vmem:[#allocation2 + $0x51] sm:$0xff] %vm416_vm5, %v3829_v19  ;;  %v3806_v33 = vmax.f32 %v3798_v43, 0.0  ;;  %v4002_v3 = vmul.f32 %v6686_v44, %v3993_v31  ;;  %v3928_v30 = vmul.f32 %v3993_v31, %v6674_v54 }
0x103e   : > { %v4043_v20 = vld [vmem:[#allocation2 + $0x42] sm:$0xff]  ;;  %v3854_v34 = vmul.f32 %v3993_v31, %v6661_v58  ;;  %v4027_v57 = vmul.f32 %v6689_v59, %v4018_v63  ;;  %v3879_v13 = vmul.f32 %v4018_v63, %v6663_v55  ;;  %v3953_v23 = vmul.f32 %v4018_v63, %v6678_v40 }
0x103f   : > { %4540 = vmatmul.msk.f32.gmra.mxu0 %vm416_vm5, %v4068_v29  ;;  %v3814_v48 = vmin.f32 %v3806_v33, 6.0  ;;  %v4010_v1 = vadd.f32 %v4002_v3, %v3985_v5  ;;  %v3936_v32 = vadd.f32 %v3928_v30, %v3911_v10  ;;  %v4052_v0 = vmul.f32 %v6698_v22, %v4043_v20 }
0x1040   : > { %v3887_v38 = vadd.f32 %v3879_v13, %v3854_v34  ;;  %v3978_v17 = vmul.f32 %v4043_v20, %v6684_v35  ;;  %v3904_v4 = vmul.f32 %v4043_v20, %v6671_v61 }
0x1041   : > { %v3822_v26 = vmul.f32 %v3814_v48, %v3785_v16  ;;  %v4035_v56 = vadd.f32 %v4027_v57, %v4010_v1  ;;  %v3961_v2 = vadd.f32 %v3953_v23, %v3936_v32 }
0x1042   : > { %v3912_v49 = vadd.f32 %v3904_v4, %v3887_v38 }
0x1043   : > { %v3830_v46 = vmul.f32 0.16666667, %v3822_v26  ;;  %v4060_v24 = vadd.f32 %v4052_v0, %v4035_v56  ;;  %v3986_v53 = vadd.f32 %v3978_v17, %v3961_v2 }
0x1044   : > { %v3994_v45 = vld [vmem:[#allocation2 + $0x50] sm:$0xff] }
0x1045   : > { %v4019_v39 = vld [vmem:[#allocation2 + $0x51] sm:$0xff]  ;;  %3838 = vst.msk [vmem:[#allocation2 + $0x61] sm:$0xff] %vm416_vm5, %v3830_v46  ;;  %v4069_v18 = vadd.f32 %v6706_v7, %v4060_v24  ;;  %v4003_v52 = vmul.f32 %v6686_v44, %v3994_v45  ;;  %v3929_v8 = vmul.f32 %v3994_v45, %v6674_v54  ;;  %v3855_v5 = vmul.f32 %v3994_v45, %v6661_v58 }
0x1046   : > { %v4044_v28 = vld [vmem:[#allocation2 + $0x52] sm:$0xff]  ;;  %v4028_v27 = vmul.f32 %v6689_v59, %v4019_v39  ;;  %v3954_v41 = vmul.f32 %v4019_v39, %v6678_v40  ;;  %v3880_v3 = vmul.f32 %v4019_v39, %v6663_v55 }
0x1047   : > { %4541 = vmatmul.msk.f32.gmra.mxu0 %vm416_vm5, %v4069_v18  ;;  %v4011_v51 = vadd.f32 %v4003_v52, %v3986_v53  ;;  %v3937_v16 = vadd.f32 %v3929_v8, %v3912_v49  ;;  %v4053_v19 = vmul.f32 %v6698_v22, %v4044_v28  ;;  %v3979_v31 = vmul.f32 %v4044_v28, %v6684_v35  ;;  %v415_v8 = vld [vmem:[%s6863_s10 + $0x18] sm:$0xff] }
0x1048   : > { %v3888_v32 = vadd.f32 %v3880_v3, %v3855_v5  ;;  %v3905_v38 = vmul.f32 %v4044_v28, %v6671_v61  ;;  %4220 = vmatpush.msra.mxu2 %v415_v8 }
0x1049   : > { %v4036_v12 = vadd.f32 %v4028_v27, %v4011_v51  ;;  %v3962_v11 = vadd.f32 %v3954_v41, %v3937_v16 }
0x104a   : > { %v3787_v9 = vpop.f32.mrf.mxu3  ;;  %v3913_v39 = vadd.f32 %v3905_v38, %v3888_v32 }
0x104b   : > { %v3788_v43 = vadd.f32 %v3787_v9, %v6654_v21  ;;  %v4061_v29 = vadd.f32 %v4053_v19, %v4036_v12  ;;  %v3987_v10 = vadd.f32 %v3979_v31, %v3962_v11 }
0x104c   : > { %v3995_v36 = vld [vmem:[#allocation2 + $0x60] sm:$0xff] }
0x104d   : > { %v3799_v63 = vadd.f32 3.0, %v3788_v43  ;;  %v4020_v33 = vld [vmem:[#allocation2 + $0x61] sm:$0xff]  ;;  %v4070_v20 = vadd.f32 %v6706_v7, %v4061_v29  ;;  %v4004_v30 = vmul.f32 %v6686_v44, %v3995_v36  ;;  %v3930_v46 = vmul.f32 %v3995_v36, %v6674_v54 }
0x104e   : > { %v4045_v48 = vld [vmem:[#allocation2 + $0x62] sm:$0xff]  ;;  %v4029_v57 = vmul.f32 %v6689_v59, %v4020_v33  ;;  %v3856_v52 = vmul.f32 %v3995_v36, %v6661_v58  ;;  %v3881_v49 = vmul.f32 %v4020_v33, %v6663_v55  ;;  %v3955_v28 = vmul.f32 %v4020_v33, %v6678_v40 }
0x104f   : > { %v3807_v34 = vmax.f32 %v3799_v63, 0.0  ;;  %4542 = vmatmul.msk.f32.gmra.mxu0 %vm416_vm5, %v4070_v20  ;;  %v4012_v1 = vadd.f32 %v4004_v30, %v3987_v10  ;;  %v4054_v56 = vmul.f32 %v6698_v22, %v4045_v48  ;;  %v3938_v53 = vadd.f32 %v3930_v46, %v3913_v39 }
0x1050   : > { %v3889_v16 = vadd.f32 %v3881_v49, %v3856_v52  ;;  %v3980_v9 = vmul.f32 %v4045_v48, %v6684_v35  ;;  %v3906_v12 = vmul.f32 %v4045_v48, %v6671_v61 }
0x1051   : > { %v3815_v13 = vmin.f32 %v3807_v34, 6.0  ;;  %v4037_v26 = vadd.f32 %v4029_v57, %v4012_v1  ;;  %v3963_v27 = vadd.f32 %v3955_v28, %v3938_v53  ;;  %v4023_v53 = vld [vmem:[#allocation2 + $0x91] sm:$0xff] }
0x1052   : > { %v3914_v31 = vadd.f32 %v3906_v12, %v3889_v16 }
0x1053   : > { %v3790_v23 = vpop.f32.mrf.mxu3  ;;  %v3823_v0 = vmul.f32 %v3815_v13, %v3788_v43  ;;  %v4062_v24 = vadd.f32 %v4054_v56, %v4037_v26  ;;  %v3988_v11 = vadd.f32 %v3980_v9, %v3963_v27 }
0x1054   : > { %v3791_v2 = vadd.f32 %v3790_v23, %v6654_v21 }
0x1055   : > { %v3831_v17 = vmul.f32 0.16666667, %v3823_v0  ;;  %v4071_v4 = vadd.f32 %v6706_v7, %v4062_v24 }
0x1056   : > { %v3800_v45 = vadd.f32 3.0, %v3791_v2 }
0x1057   : > { %3839 = vst.msk [vmem:[#allocation2 + $0x71] sm:$0xff] %vm416_vm5, %v3831_v17  ;;  %4543 = vmatmul.msk.f32.gmra.mxu0 %vm416_vm5, %v4071_v4 }
0x1058   : > { %v3808_v18 = vmax.f32 %v3800_v45, 0.0  ;;  %v3998_v45 = vld [vmem:[#allocation2 + $0x90] sm:$0xff] }
0x105a   : > { %v3816_v21 = vmin.f32 %v3808_v18, 6.0 }
0x105c   : > { %v3824_v51 = vmul.f32 %v3816_v21, %v3791_v2  ;;  %v4007_v21 = vmul.f32 %v6686_v44, %v3998_v45 }
0x105e   : > { %v3832_v41 = vmul.f32 0.16666667, %v3824_v51  ;;  %v3996_v19 = vld [vmem:[#allocation2 + $0x70] sm:$0xff]  ;;  %v4032_v51 = vmul.f32 %v6689_v59, %v4023_v53 }
0x105f   : > { %v4021_v43 = vld [vmem:[#allocation2 + $0x71] sm:$0xff]  ;;  %v4005_v29 = vmul.f32 %v6686_v44, %v3996_v19  ;;  %v3931_v63 = vmul.f32 %v3996_v19, %v6674_v54  ;;  %v3857_v33 = vmul.f32 %v3996_v19, %v6661_v58 }
0x1060   : > { %3840 = vst.msk [vmem:[#allocation2 + $0x81] sm:$0xff] %vm416_vm5, %v3832_v41  ;;  %v4046_v36 = vld [vmem:[#allocation2 + $0x72] sm:$0xff]  ;;  %v3882_v5 = vmul.f32 %v4021_v43, %v6663_v55  ;;  %v4030_v20 = vmul.f32 %v6689_v59, %v4021_v43  ;;  %v3956_v30 = vmul.f32 %v4021_v43, %v6678_v40 }
0x1061   : > { %v4013_v3 = vadd.f32 %v4005_v29, %v3988_v11  ;;  %v3939_v10 = vadd.f32 %v3931_v63, %v3914_v31  ;;  %v4055_v48 = vmul.f32 %v6698_v22, %v4046_v36  ;;  %v3981_v32 = vmul.f32 %v4046_v36, %v6684_v35 }
0x1062   : > { %v3890_v57 = vadd.f32 %v3882_v5, %v3857_v33  ;;  %v3907_v58 = vmul.f32 %v4046_v36, %v6671_v61 }
0x1063   : > { %v4038_v34 = vadd.f32 %v4030_v20, %v4013_v3  ;;  %v3964_v1 = vadd.f32 %v3956_v30, %v3939_v10 }
0x1064   : > { %v3915_v38 = vadd.f32 %v3907_v58, %v3890_v57 }
0x1065   : > { %v4063_v13 = vadd.f32 %v4055_v48, %v4038_v34  ;;  %v3989_v56 = vadd.f32 %v3981_v32, %v3964_v1 }
0x1067   : > { %v3997_v23 = vld [vmem:[#allocation2 + $0x80] sm:$0xff]  ;;  %v4072_v55 = vadd.f32 %v6706_v7, %v4063_v13 }
0x1068   : > { %v4022_v26 = vld [vmem:[#allocation2 + $0x81] sm:$0xff]  ;;  %v4006_v0 = vmul.f32 %v6686_v44, %v3997_v23  ;;  %v3932_v46 = vmul.f32 %v3997_v23, %v6674_v54  ;;  %v4048_v54 = vld [vmem:[#allocation2 + $0x92] sm:$0xff]  ;;  %v4075_v44 = vperm.slane %v6651_v42, 2 }
0x1069   : > { %v4047_v2 = vld [vmem:[#allocation2 + $0x82] sm:$0xff]  ;;  %4544 = vmatmul.msk.f32.gmra.mxu0 %vm416_vm5, %v4072_v55  ;;  %v4031_v17 = vmul.f32 %v6689_v59, %v4022_v26  ;;  %v3957_v4 = vmul.f32 %v4022_v26, %v6678_v40  ;;  %v4057_v41 = vmul.f32 %v6698_v22, %v4048_v54 }
0x106a   : > { %v4014_v24 = vadd.f32 %v4006_v0, %v3989_v56  ;;  %v3940_v39 = vadd.f32 %v3932_v46, %v3915_v38  ;;  %v4056_v61 = vmul.f32 %v6698_v22, %v4047_v2  ;;  %v3982_v49 = vmul.f32 %v4047_v2, %v6684_v35  ;;  %v414_v35 = vld [vmem:[%s6863_s10 + $0x10] sm:$0xff] }
0x106b   : > { %4221 = vmatpush.msra.mxu2 %v414_v35 }
0x106c   : > { %v4039_v18 = vadd.f32 %v4031_v17, %v4014_v24  ;;  %v3965_v52 = vadd.f32 %v3957_v4, %v3940_v39 }
0x106e   : > { %v4064_v28 = vadd.f32 %v4056_v61, %v4039_v18  ;;  %v3990_v8 = vadd.f32 %v3982_v49, %v3965_v52 }
0x1070   : > { %v4073_v27 = vadd.f32 %v6706_v7, %v4064_v28  ;;  %v4015_v16 = vadd.f32 %v4007_v21, %v3990_v8 }
0x1072   : > { %4545 = vmatmul.msk.f32.gmra.mxu0 %vm416_vm5, %v4073_v27  ;;  %v4040_v40 = vadd.f32 %v4032_v51, %v4015_v16 }
0x1074   : > { %v4065_v9 = vadd.f32 %v4057_v41, %v4040_v40 }
0x1076   : > { %v4074_v12 = vadd.f32 %v6706_v7, %v4065_v9 }
0x107a   : > { %4546 = vmatmul.msk.f32.gmra.mxu0 %vm416_vm5, %v4074_v12 }
0x10b4   : > { %v4117_v59 = vpop.f32.mrf.mxu0 }
0x10b5   : > { %v4118_v19 = vadd.f32 %v4117_v59, %v4075_v44 }
0x10b7   : > { %v4141_v43 = vadd.f32 3.0, %v4118_v19 }
0x10b9   : > { %v4149_v11 = vmax.f32 %v4141_v43, 0.0  ;;  %v4895_v43 = vld [vmem:[%s6859_s6] sm:$0x3] }
0x10bb   : > { %v4157_v22 = vmin.f32 %v4149_v11, 6.0  ;;  %v4181_v11 = vperm.slane %v4895_v43, 1 }
0x10bc   : > { %v4120_v29 = vpop.f32.mrf.mxu0 }
0x10bd   : > { %v4165_v31 = vmul.f32 %v4157_v22, %v4118_v19  ;;  %v4121_v63 = vadd.f32 %v4120_v29, %v4075_v44 }
0x10bf   : > { %v4173_v36 = vmul.f32 0.16666667, %v4165_v31  ;;  %v4142_v33 = vadd.f32 3.0, %v4121_v63 }
0x10c1   : > { %v4150_v7 = vmax.f32 %v4142_v33, 0.0  ;;  %4547 = vmatmul.msk.f32.vlgmr.msra.gmra.mxu2 %vm416_vm5, %v4173_v36 }
0x10c3   : > { %v4158_v5 = vmin.f32 %v4150_v7, 6.0 }
0x10c4   : > { %v4123_v20 = vpop.f32.mrf.mxu0 }
0x10c5   : > { %v4166_v3 = vmul.f32 %v4158_v5, %v4121_v63  ;;  %v4124_v10 = vadd.f32 %v4123_v20, %v4075_v44 }
0x10c7   : > { %v4174_v30 = vmul.f32 0.16666667, %v4166_v3  ;;  %v4143_v34 = vadd.f32 3.0, %v4124_v10 }
0x10c9   : > { %4548 = vmatmul.msk.f32.gmra.mxu2 %vm416_vm5, %v4174_v30  ;;  %v4151_v42 = vmax.f32 %v4143_v34, 0.0 }
0x10cb   : > { %v4159_v48 = vmin.f32 %v4151_v42, 6.0 }
0x10cc   : > { %v4126_v1 = vpop.f32.mrf.mxu0 }
0x10cd   : > { %v4167_v57 = vmul.f32 %v4159_v48, %v4124_v10  ;;  %v4127_v13 = vadd.f32 %v4126_v1, %v4075_v44 }
0x10cf   : > { %v4175_v32 = vmul.f32 0.16666667, %v4167_v57  ;;  %v4144_v23 = vadd.f32 3.0, %v4127_v13 }
0x10d1   : > { %v4152_v26 = vmax.f32 %v4144_v23, 0.0  ;;  %4549 = vmatmul.msk.f32.gmra.mxu2 %vm416_vm5, %v4175_v32 }
0x10d3   : > { %v4160_v58 = vmin.f32 %v4152_v26, 6.0 }
0x10d4   : > { %v4129_v55 = vpop.f32.mrf.mxu0 }
0x10d5   : > { %v4168_v56 = vmul.f32 %v4160_v58, %v4127_v13  ;;  %v4130_v0 = vadd.f32 %v4129_v55, %v4075_v44 }
0x10d7   : > { %v4176_v2 = vmul.f32 0.16666667, %v4168_v56  ;;  %v4145_v38 = vadd.f32 3.0, %v4130_v0 }
0x10d9   : > { %v4153_v46 = vmax.f32 %v4145_v38, 0.0  ;;  %4550 = vmatmul.msk.f32.gmra.mxu2 %vm416_vm5, %v4176_v2 }
0x10db   : > { %v4161_v24 = vmin.f32 %v4153_v46, 6.0 }
0x10dd   : > { %v4169_v17 = vmul.f32 %v4161_v24, %v4130_v0 }
0x10df   : > { %v4177_v45 = vmul.f32 0.16666667, %v4169_v17 }
0x10e1   : > { %4551 = vmatmul.msk.f32.gmra.mxu2 %vm416_vm5, %v4177_v45 }
0x10e6   : > { %v4132_v39 = vpop.f32.mrf.mxu0 }
0x10e7   : > { %v4133_v4 = vadd.f32 %v4132_v39, %v4075_v44 }
0x10e9   : > { %v4146_v18 = vadd.f32 3.0, %v4133_v4 }
0x10eb   : > { %v4154_v61 = vmax.f32 %v4146_v18, 0.0 }
0x10ed   : > { %v4162_v53 = vmin.f32 %v4154_v61, 6.0 }
0x10ef   : > { %v4135_v52 = vpop.f32.mrf.mxu0  ;;  %v4170_v49 = vmul.f32 %v4162_v53, %v4133_v4 }
0x10f0   : > { %v4136_v21 = vadd.f32 %v4135_v52, %v4075_v44 }
0x10f1   : > { %v4178_v28 = vmul.f32 0.16666667, %v4170_v49 }
0x10f2   : > { %v4147_v54 = vadd.f32 3.0, %v4136_v21 }
0x10f3   : > { %4552 = vmatmul.msk.f32.gmra.mxu2 %vm416_vm5, %v4178_v28 }
0x10f4   : > { %v4155_v8 = vmax.f32 %v4147_v54, 0.0 }
0x10f6   : > { %v4163_v51 = vmin.f32 %v4155_v8, 6.0 }
0x10f7   : > { %v4138_v27 = vpop.f32.mrf.mxu0 }
0x10f8   : > { %v4171_v16 = vmul.f32 %v4163_v51, %v4136_v21  ;;  %v4139_v41 = vadd.f32 %v4138_v27, %v4075_v44 }
0x10fa   : > { %v4179_v40 = vmul.f32 0.16666667, %v4171_v16  ;;  %v4148_v9 = vadd.f32 3.0, %v4139_v41 }
0x10fc   : > { %v4156_v12 = vmax.f32 %v4148_v9, 0.0  ;;  %4553 = vmatmul.msk.f32.gmra.mxu2 %vm416_vm5, %v4179_v40 }
0x10fe   : > { %v4164_v35 = vmin.f32 %v4156_v12, 6.0 }
0x1100   : > { %v4172_v59 = vmul.f32 %v4164_v35, %v4139_v41 }
0x1102   : > { %v4180_v19 = vmul.f32 0.16666667, %v4172_v59 }
0x1104   : > { %4554 = vmatmul.msk.f32.gmra.mxu2 %vm416_vm5, %v4180_v19 }
0x1144   : > { %v4223_v22 = vpop.f32.mrf.mxu2 }
0x1145   : > { %v4224_v29 = vadd.f32 %v4223_v22, %v4181_v11 }
0x1147   : > { %v4247_v31 = vadd.f32 %v4224_v29, %v6480_v60 }
0x1149   : > { %v4263_v44 = vrot.slane %v4247_v31, 7 }
0x114b   : > { %v4287_v63 = vsel %vm1015_vm2, %v6474_v6, %v4263_v44 }
0x114c   : > { %4288 = vst.msk [vmem:[%s6814_s15] sm:$0xff] %vm447_vm0, %v4287_v63  ;;  %v4226_v36 = vpop.f32.mrf.mxu2 }
0x114d   : > { %v4227_v33 = vadd.f32 %v4226_v36, %v4181_v11 }
0x114f   : > { %v4248_v60 = vadd.f32 %v4227_v33, %v6494_v37 }
0x1151   : > { %v4264_v7 = vrot.slane %v4248_v60, 7 }
0x1153   : > { %v4265_v5 = vsel %vm1015_vm2, %v4263_v44, %v4264_v7 }
0x1154   : > { %4289 = vst.msk [vmem:[%s6814_s15 + $0x8] sm:$0xff] %vm447_vm0, %v4265_v5  ;;  %v4229_v3 = vpop.f32.mrf.mxu2 }
0x1155   : > { %v4230_v20 = vadd.f32 %v4229_v3, %v4181_v11 }
0x1157   : > { %v4249_v10 = vadd.f32 %v4230_v20, %v6508_v15 }
0x1159   : > { %v4266_v30 = vrot.slane %v4249_v10, 7 }
0x115b   : > { %v4267_v6 = vsel %vm1015_vm2, %v4264_v7, %v4266_v30 }
0x115c   : > { %4290 = vst.msk [vmem:[%s6814_s15 + $0x10] sm:$0xff] %vm447_vm0, %v4267_v6  ;;  %v4232_v34 = vpop.f32.mrf.mxu2 }
0x115d   : > { %v4233_v42 = vadd.f32 %v4232_v34, %v4181_v11 }
0x115f   : > { %v4250_v37 = vadd.f32 %v4233_v42, %v6519_v25 }
0x1161   : > { %v4268_v48 = vrot.slane %v4250_v37, 7 }
0x1163   : > { %v4269_v1 = vsel %vm1015_vm2, %v4266_v30, %v4268_v48 }
0x1164   : > { %4291 = vst.msk [vmem:[%s6814_s15 + $0x18] sm:$0xff] %vm447_vm0, %v4269_v1  ;;  %v4235_v57 = vpop.f32.mrf.mxu2 }
0x1165   : > { %v4236_v13 = vadd.f32 %v4235_v57, %v4181_v11 }
0x1167   : > { %v4251_v15 = vadd.f32 %v4236_v13, %v6533_v50 }
0x1169   : > { %v4270_v32 = vrot.slane %v4251_v15, 7 }
0x116b   : > { %v4271_v23 = vsel %vm1015_vm2, %v4268_v48, %v4270_v32 }
0x116c   : > { %4292 = vst.msk [vmem:[%s6814_s15 + $0x20] sm:$0xff] %vm447_vm0, %v4271_v23 }
0x1176   : > { %v4238_v26 = vpop.f32.mrf.mxu2 }
0x1177   : > { %v4239_v58 = vadd.f32 %v4238_v26, %v4181_v11 }
0x1179   : > { %v4252_v25 = vadd.f32 %v4239_v58, %v6550_v14 }
0x117b   : > { %v4272_v55 = vrot.slane %v4252_v25, 7 }
0x117d   : > { %v4273_v56 = vsel %vm1015_vm2, %v4270_v32, %v4272_v55 }
0x117e   : > { %4293 = vst.msk [vmem:[%s6814_s15 + $0x28] sm:$0xff] %vm447_vm0, %v4273_v56 }
0x117f   : > { %v4241_v0 = vpop.f32.mrf.mxu2 }
0x1180   : > { %v4242_v2 = vadd.f32 %v4241_v0, %v4181_v11 }
0x1182   : > { %v4253_v50 = vadd.f32 %v4242_v2, %v6579_v62 }
0x1184   : > { %v4274_v38 = vrot.slane %v4253_v50, 7 }
0x1186   : > { %v4275_v46 = vsel %vm1015_vm2, %v4272_v55, %v4274_v38 }
0x1187   : > { %4294 = vst.msk [vmem:[%s6814_s15 + $0x30] sm:$0xff] %vm447_vm0, %v4275_v46  ;;  %v4244_v24 = vpop.f32.mrf.mxu2 }
0x1188   : > { %v4245_v17 = vadd.f32 %v4244_v24, %v4181_v11 }
0x118a   : > { %v4254_v45 = vadd.f32 %v4245_v17, %v6595_v47 }
0x118c   : > { %v4276_v14 = vrot.slane %v4254_v45, 7 }
0x118e   : > { %v4277_v39 = vsel %vm1015_vm2, %v4274_v38, %v4276_v14  ;;  %4296 = vst.msk [vmem:[%s6814_s15 + $0x40] sm:$0x1] %vm472_vm1, %v4276_v14 }
0x118f   : > { %4295 = vst.msk [vmem:[%s6814_s15 + $0x38] sm:$0xff] %vm447_vm0, %v4277_v39 }
0x1190 PF: > { %s21_s17 = sadd.s32 1, %s4902_s17  }
0x1191   : > { %p18_p4 = scmp.ge.s32.totalorder %s21_s17, 4  }
0x1193   :  { %20 = sbr.rel (!%p18_p4) target bundleno = 1 (0x1), region = 96 }

</bundles_post_ra>
